<compile_context>
chip_gen: v6e
topology: v6e:2x2x1
jax: 0.10.0
libtpu: 0.0.40
codegen_flags: <defaults>
</compile_context>

<pallas_src>
import jax
import jax.numpy as jnp
from jax.experimental import pallas as pl
from jax.experimental.pallas import tpu as pltpu

CH = 32          # discriminator width ("ch")
N_CLASSES = 10   # number of classes for the projection embedding
N_BLOCKS = 2


# ----------------------------------------------------------------------------
# Parameter setup (plain JAX glue): deterministic init + spectral normalization
# ----------------------------------------------------------------------------
def _spectral_sigma(w2d, n_iter=10):
    """Largest singular value via power iteration (torch spectral_norm style)."""
    u = jnp.ones((w2d.shape[0],), jnp.float32)
    v = jnp.ones((w2d.shape[1],), jnp.float32)
    for _ in range(n_iter):
        v = w2d.T @ u
        v = v / (jnp.linalg.norm(v) + 1e-12)
        u = w2d @ v
        u = u / (jnp.linalg.norm(u) + 1e-12)
    return u @ (w2d @ v)


def init_params(key, in_ch, ch, n_classes, n_blocks=N_BLOCKS):
    keys = jax.random.split(key, 2 * n_blocks + 3)
    blocks = []
    cin = in_ch
    for i in range(n_blocks):
        w = jax.random.normal(keys[2 * i], (3, 3, cin, ch), jnp.float32) * 0.1
        # PyTorch SN views the conv weight as (C_out, C_in*kh*kw).
        w2d = jnp.transpose(w, (3, 0, 1, 2)).reshape(ch, -1)
        w = w / _spectral_sigma(w2d)
        b = jax.random.normal(keys[2 * i + 1], (1, ch), jnp.float32) * 0.01
        blocks.append((w, b))
        cin = ch
    w_lin = jax.random.normal(keys[-3], (ch, 1), jnp.float32) * 0.1
    w_lin = w_lin / _spectral_sigma(w_lin.T)          # SN on the (out, in) view
    b_lin = jax.random.normal(keys[-2], (1, 1), jnp.float32) * 0.01
    emb = jax.random.normal(keys[-1], (n_classes, ch), jnp.float32) * 0.1
    emb = emb / _spectral_sigma(emb)
    return {"blocks": blocks, "w_lin": w_lin, "b_lin": b_lin, "emb": emb}


# ----------------------------------------------------------------------------
# Fused kernel: [pad -> conv3x3(im2col matmul) -> +bias -> ReLU -> avgpool2x2] x 2
#               -> spatial sum -> linear -> + projection term
# One grid step processes one batch element; everything stays in VMEM.
# ----------------------------------------------------------------------------
def _fused_disc_kernel(x_ref, w1_ref, b1_ref, w2_ref, b2_ref,
                       wlin_ref, blin_ref, wy_ref, out_ref,
                       pad1_ref, pad2_ref):
    H, W = x_ref.shape[1], x_ref.shape[2]
    C2 = w2_ref.shape[-1]
    H2, W2 = H // 2, W // 2
    H4, W4 = H2 // 2, W2 // 2

    def conv_relu_pool(pad_ref, w_ref, b_ref):
        h = pad_ref.shape[0] - 2
        w = pad_ref.shape[1] - 2
        cin = pad_ref.shape[2]
        # im2col: (h*w, 9*cin) patch slab built from 9 shifted windows of the
        # zero-padded VMEM scratch, then ONE wide bf16 MXU matmul (f32 acc).
        slab = jnp.concatenate(
            [pad_ref[dy:dy + h, dx:dx + w, :].reshape(h * w, cin)
             for dy in range(3) for dx in range(3)],
            axis=1)
        acc = jnp.dot(slab.astype(jnp.bfloat16), w_ref[...],
                      preferred_element_type=jnp.float32)      # (h*w, cout)
        acc = jnp.maximum(acc + b_ref[...], 0.0)                # bias + ReLU (f32)
        cout = acc.shape[-1]
        # 2x2 average pool (row index of acc is hh*w + ww).
        a = acc.reshape(h // 2, 2, w, cout)
        a = a[:, 0] + a[:, 1]                                   # sum row pairs
        a = a.reshape(h // 2, w // 2, 2, cout)
        return (a[:, :, 0] + a[:, :, 1]) * 0.25                 # (h/2, w/2, cout)

    # ---- block 1: zero-pad in VMEM, conv/relu/pool ----
    pad1_ref[...] = jnp.zeros_like(pad1_ref)
    pad1_ref[1:H + 1, 1:W + 1, :] = x_ref[0].astype(jnp.float32)
    pooled1 = conv_relu_pool(pad1_ref, w1_ref, b1_ref)          # (H/2, W/2, C1)

    # ---- block 2: write block-1 output straight into block-2's padded scratch
    pad2_ref[...] = jnp.zeros_like(pad2_ref)
    pad2_ref[1:H2 + 1, 1:W2 + 1, :] = pooled1
    pooled2 = conv_relu_pool(pad2_ref, w2_ref, b2_ref)          # (H/4, W/4, C2)

    # ---- head: (ReLU is a no-op on pooled ReLU output) sum spatial,
    #            linear + class projection, all f32 on the VPU.
    h = pooled2.reshape(H4 * W4, C2).sum(axis=0, keepdims=True)          # (1, C2)
    lin = jnp.sum(h * wlin_ref[...], axis=1, keepdims=True) + blin_ref[...]
    proj = jnp.sum(h * wy_ref[0], axis=1, keepdims=True)
    out_ref[0] = (lin + proj).astype(out_ref.dtype)


# ----------------------------------------------------------------------------
# Module forward (wrapper): one pallas_call for the whole forward pass.
# ----------------------------------------------------------------------------
def discriminator_forward(params, x_nchw, y=None):
    x = jnp.transpose(x_nchw, (0, 2, 3, 1)).astype(jnp.float32)   # NCHW -> NHWC
    N, H, W, cin0 = x.shape
    assert H % 4 == 0 and W % 4 == 0, "two 2x2 pools require H, W % 4 == 0"
    (w1, b1), (w2, b2) = params["blocks"]
    C1, C2 = w1.shape[-1], w2.shape[-1]
    H2, W2 = H // 2, W // 2

    # im2col-reshaped bf16 MXU weights; biases / head weights stay f32.
    w1_m = w1.reshape(9 * cin0, C1).astype(jnp.bfloat16)
    w2_m = w2.reshape(9 * C1, C2).astype(jnp.bfloat16)
    wlin_t = params["w_lin"].reshape(1, C2).astype(jnp.float32)
    b_lin = params["b_lin"].astype(jnp.float32)

    if y is None:
        w_y = jnp.zeros((N, 1, C2), jnp.float32)   # projection term absent
    else:
        # TODO(synk): class-embedding gather (l_y(y)) stays in plain JAX glue.
        w_y = params["emb"][y].reshape(N, 1, C2).astype(jnp.float32)

    out = pl.pallas_call(
        _fused_disc_kernel,
        out_shape=jax.ShapeDtypeStruct((N, 1, 1), jnp.float32),
        grid=(N,),
        in_specs=[
            pl.BlockSpec((1, H, W, cin0), lambda n: (n, 0, 0, 0)),   # x
            pl.BlockSpec((9 * cin0, C1), lambda n: (0, 0)),          # w1 (bf16)
            pl.BlockSpec((1, C1), lambda n: (0, 0)),                 # b1
            pl.BlockSpec((9 * C1, C2), lambda n: (0, 0)),            # w2 (bf16)
            pl.BlockSpec((1, C2), lambda n: (0, 0)),                 # b2
            pl.BlockSpec((1, C2), lambda n: (0, 0)),                 # w_lin^T
            pl.BlockSpec((1, 1), lambda n: (0, 0)),                  # b_lin
            pl.BlockSpec((1, 1, C2), lambda n: (n, 0, 0)),           # w_y
        ],
        out_specs=pl.BlockSpec((1, 1, 1), lambda n: (n, 0, 0)),
        scratch_shapes=[
            pltpu.VMEM((H + 2, W + 2, cin0), jnp.float32),    # padded block-1 input
            pltpu.VMEM((H2 + 2, W2 + 2, C1), jnp.float32),    # padded block-2 input
        ],
        compiler_params=pltpu.CompilerParams(
            dimension_semantics=("parallel",)),               # batch over v7x's 2 TCs
    )(x, w1_m, b1.astype(jnp.float32), w2_m, b2.astype(jnp.float32),
      wlin_t, b_lin, w_y)
    return out.reshape(N, 1)


# ----------------------------------------------------------------------------
# Pure-JAX reference (same math, incl. bf16 MXU operands) for correctness check
# ----------------------------------------------------------------------------
def _reference_forward(params, x_nchw, y):
    h = jnp.transpose(x_nchw, (0, 2, 3, 1)).astype(jnp.float32)
    for (w, b) in params["blocks"]:
        N, H, W, cin = h.shape
        cout = w.shape[-1]
        xp = jnp.pad(h, ((0, 0), (1, 1), (1, 1), (0, 0)))
        cols = jnp.concatenate(
            [xp[:, dy:dy + H, dx:dx + W, :].reshape(N, H * W, cin)
             for dy in range(3) for dx in range(3)], axis=-1)
        wm = w.reshape(9 * cin, cout)
        acc = jnp.einsum("npk,ko->npo",
                         cols.astype(jnp.bfloat16), wm.astype(jnp.bfloat16),
                         preferred_element_type=jnp.float32)
        acc = jnp.maximum(acc.reshape(N, H, W, cout) + b[0], 0.0)
        h = acc.reshape(N, H // 2, 2, W // 2, 2, cout).mean(axis=(2, 4))
    h = jnp.maximum(h, 0.0).sum(axis=(1, 2))                    # (N, C)
    out = h @ params["w_lin"] + params["b_lin"]
    if y is not None:
        w_y = params["emb"][y]
        out = out + jnp.sum(w_y * h, axis=1, keepdims=True)
    return out


if __name__ == "__main__":
    key = jax.random.PRNGKey(0)
    k_x, k_p = jax.random.split(key)

    x = jax.random.normal(k_x, (2, 4, 16, 16), jnp.float32)     # NCHW input
    y = jnp.array([1, 3], dtype=jnp.int32)                      # class labels
    params = init_params(k_p, in_ch=4, ch=CH, n_classes=N_CLASSES)

    fwd = jax.jit(discriminator_forward)

    out = jax.block_until_ready(fwd(params, x, y))
    assert out.shape == (2, 1), out.shape

    ref = _reference_forward(params, x, y)
    assert jnp.allclose(out, ref, rtol=1e-2, atol=1e-2), (out, ref)

    # Also exercise the y=None path (no projection term).
    out_noy = jax.block_until_ready(fwd(params, x, None))
    ref_noy = _reference_forward(params, x, None)
    assert out_noy.shape == (2, 1)
    assert jnp.allclose(out_noy, ref_noy, rtol=1e-2, atol=1e-2), (out_noy, ref_noy)

    print("KERNEL_OK")
</pallas_src>

<mosaic_0001>
module attributes {stable_mosaic.version = 11 : i64} {
  func.func @_fused_disc_kernel(%arg0: i32, %arg1: memref<1x16x16x4xf32, #tpu.memory_space<vmem>>, %arg2: memref<36x32xbf16, #tpu.memory_space<vmem>>, %arg3: memref<1x32xf32, #tpu.memory_space<vmem>>, %arg4: memref<288x32xbf16, #tpu.memory_space<vmem>>, %arg5: memref<1x32xf32, #tpu.memory_space<vmem>>, %arg6: memref<1x32xf32, #tpu.memory_space<vmem>>, %arg7: memref<1x1xf32, #tpu.memory_space<vmem>>, %arg8: memref<1x1x32xf32, #tpu.memory_space<vmem>>, %arg9: memref<1x1x1xf32, #tpu.memory_space<vmem>>, %arg10: memref<18x18x4xf32, #tpu.memory_space<vmem>>, %arg11: memref<10x10x32xf32, #tpu.memory_space<vmem>>) attributes {dimension_semantics = [#tpu.dimension_semantics<parallel>], iteration_bounds = array<i64: 2>, scalar_prefetch = 0 : i64, scratch_operands = 2 : i64, tpu.core_type = #tpu.core_type<tc>, window_params = [{transform_indices = @transform_0, window_bounds = array<i64: 1, 16, 16, 4>}, {pipeline_mode = #tpu.pipeline_mode<synchronous>, transform_indices = @transform_1, window_bounds = array<i64: 36, 32>}, {pipeline_mode = #tpu.pipeline_mode<synchronous>, transform_indices = @transform_2, window_bounds = array<i64: 1, 32>}, {pipeline_mode = #tpu.pipeline_mode<synchronous>, transform_indices = @transform_3, window_bounds = array<i64: 288, 32>}, {pipeline_mode = #tpu.pipeline_mode<synchronous>, transform_indices = @transform_4, window_bounds = array<i64: 1, 32>}, {pipeline_mode = #tpu.pipeline_mode<synchronous>, transform_indices = @transform_5, window_bounds = array<i64: 1, 32>}, {pipeline_mode = #tpu.pipeline_mode<synchronous>, transform_indices = @transform_6, window_bounds = array<i64: 1, 1>}, {transform_indices = @transform_7, window_bounds = array<i64: 1, 1, 32>}, {transform_indices = @transform_8, window_bounds = array<i64: 1, 1, 1>}]} {
    %cst = arith.constant 0.000000e+00 : f32
    %0 = vector.broadcast %cst : f32 to vector<18x18x4xf32>
    %c0 = arith.constant 0 : index
    %c0_0 = arith.constant 0 : index
    %c0_1 = arith.constant 0 : index
    %1 = vector.load %arg10[%c0, %c0_0, %c0_1] : memref<18x18x4xf32, #tpu.memory_space<vmem>>, vector<18x18x4xf32>
    tpu.vector_store %arg10[%c0, %c0_0, %c0_1], %0 {strides = array<i32>} : memref<18x18x4xf32, #tpu.memory_space<vmem>>, vector<18x18x4xf32>,
    %c0_2 = arith.constant 0 : index
    %c0_3 = arith.constant 0 : index
    %c0_4 = arith.constant 0 : index
    %c0_5 = arith.constant 0 : index
    %2 = vector.load %arg1[%c0_2, %c0_3, %c0_4, %c0_5] : memref<1x16x16x4xf32, #tpu.memory_space<vmem>>, vector<1x16x16x4xf32>
    %3 = vector.shape_cast %2 : vector<1x16x16x4xf32> to vector<16x16x4xf32>
    %c1 = arith.constant 1 : index
    %c1_6 = arith.constant 1 : index
    %c0_7 = arith.constant 0 : index
    %4 = vector.load %arg10[%c1, %c1_6, %c0_7] : memref<18x18x4xf32, #tpu.memory_space<vmem>>, vector<16x16x4xf32>
    tpu.vector_store %arg10[%c1, %c1_6, %c0_7], %3 {strides = array<i32>} : memref<18x18x4xf32, #tpu.memory_space<vmem>>, vector<16x16x4xf32>,
    %c0_8 = arith.constant 0 : index
    %c0_9 = arith.constant 0 : index
    %c0_10 = arith.constant 0 : index
    %5 = vector.load %arg10[%c0_8, %c0_9, %c0_10] : memref<18x18x4xf32, #tpu.memory_space<vmem>>, vector<16x16x4xf32>
    %6 = vector.shape_cast %5 : vector<16x16x4xf32> to vector<256x4xf32>
    %c0_11 = arith.constant 0 : index
    %c1_12 = arith.constant 1 : index
    %c0_13 = arith.constant 0 : index
    %7 = vector.load %arg10[%c0_11, %c1_12, %c0_13] : memref<18x18x4xf32, #tpu.memory_space<vmem>>, vector<16x16x4xf32>
    %8 = vector.shape_cast %7 : vector<16x16x4xf32> to vector<256x4xf32>
    %c0_14 = arith.constant 0 : index
    %c2 = arith.constant 2 : index
    %c0_15 = arith.constant 0 : index
    %9 = vector.load %arg10[%c0_14, %c2, %c0_15] : memref<18x18x4xf32, #tpu.memory_space<vmem>>, vector<16x16x4xf32>
    %10 = vector.shape_cast %9 : vector<16x16x4xf32> to vector<256x4xf32>
    %c1_16 = arith.constant 1 : index
    %c0_17 = arith.constant 0 : index
    %c0_18 = arith.constant 0 : index
    %11 = vector.load %arg10[%c1_16, %c0_17, %c0_18] : memref<18x18x4xf32, #tpu.memory_space<vmem>>, vector<16x16x4xf32>
    %12 = vector.shape_cast %11 : vector<16x16x4xf32> to vector<256x4xf32>
    %c1_19 = arith.constant 1 : index
    %c1_20 = arith.constant 1 : index
    %c0_21 = arith.constant 0 : index
    %13 = vector.load %arg10[%c1_19, %c1_20, %c0_21] : memref<18x18x4xf32, #tpu.memory_space<vmem>>, vector<16x16x4xf32>
    %14 = vector.shape_cast %13 : vector<16x16x4xf32> to vector<256x4xf32>
    %c1_22 = arith.constant 1 : index
    %c2_23 = arith.constant 2 : index
    %c0_24 = arith.constant 0 : index
    %15 = vector.load %arg10[%c1_22, %c2_23, %c0_24] : memref<18x18x4xf32, #tpu.memory_space<vmem>>, vector<16x16x4xf32>
    %16 = vector.shape_cast %15 : vector<16x16x4xf32> to vector<256x4xf32>
    %c2_25 = arith.constant 2 : index
    %c0_26 = arith.constant 0 : index
    %c0_27 = arith.constant 0 : index
    %17 = vector.load %arg10[%c2_25, %c0_26, %c0_27] : memref<18x18x4xf32, #tpu.memory_space<vmem>>, vector<16x16x4xf32>
    %18 = vector.shape_cast %17 : vector<16x16x4xf32> to vector<256x4xf32>
    %c2_28 = arith.constant 2 : index
    %c1_29 = arith.constant 1 : index
    %c0_30 = arith.constant 0 : index
    %19 = vector.load %arg10[%c2_28, %c1_29, %c0_30] : memref<18x18x4xf32, #tpu.memory_space<vmem>>, vector<16x16x4xf32>
    %20 = vector.shape_cast %19 : vector<16x16x4xf32> to vector<256x4xf32>
    %c2_31 = arith.constant 2 : index
    %c2_32 = arith.constant 2 : index
    %c0_33 = arith.constant 0 : index
    %21 = vector.load %arg10[%c2_31, %c2_32, %c0_33] : memref<18x18x4xf32, #tpu.memory_space<vmem>>, vector<16x16x4xf32>
    %22 = vector.shape_cast %21 : vector<16x16x4xf32> to vector<256x4xf32>
    %23 = tpu.concatenate %6, %8, %10, %12, %14, %16, %18, %20, %22 in 1 : vector<256x4xf32>, vector<256x4xf32>, vector<256x4xf32>, vector<256x4xf32>, vector<256x4xf32>, vector<256x4xf32>, vector<256x4xf32>, vector<256x4xf32>, vector<256x4xf32> -> vector<256x36xf32>
    %24 = arith.truncf %23 : vector<256x36xf32> to vector<256x36xbf16>
    %c0_34 = arith.constant 0 : index
    %c0_35 = arith.constant 0 : index
    %25 = vector.load %arg2[%c0_34, %c0_35] : memref<36x32xbf16, #tpu.memory_space<vmem>>, vector<36x32xbf16>
    %cst_36 = arith.constant dense<0.000000e+00> : vector<256x32xf32>
    %26 = tpu.matmul %24, %25, %cst_36 {dimension_numbers = #tpu.dot_dimension_numbers<[1], [0], [0], [1], [0, 0, 1, 1], [], []>} : vector<256x36xbf16>, vector<36x32xbf16>, vector<256x32xf32> -> vector<256x32xf32>
    %c0_37 = arith.constant 0 : index
    %c0_38 = arith.constant 0 : index
    %27 = vector.load %arg3[%c0_37, %c0_38] : memref<1x32xf32, #tpu.memory_space<vmem>>, vector<1x32xf32>
    %28 = vector.broadcast %27 : vector<1x32xf32> to vector<256x32xf32>
    %29 = arith.addf %26, %28 : vector<256x32xf32>
    %cst_39 = arith.constant 0.000000e+00 : f32
    %30 = vector.broadcast %cst_39 : f32 to vector<256x32xf32>
    %31 = arith.maximumf %29, %30 : vector<256x32xf32>
    %32 = vector.shape_cast %31 : vector<256x32xf32> to vector<8x2x16x32xf32>
    %33 = vector.extract_strided_slice %32 {offsets = [0, 0, 0, 0], sizes = [8, 1, 16, 32], strides = [1, 1, 1, 1]} : vector<8x2x16x32xf32> to vector<8x1x16x32xf32>
    %34 = vector.shape_cast %33 : vector<8x1x16x32xf32> to vector<8x16x32xf32>
    %35 = vector.extract_strided_slice %32 {offsets = [0, 1, 0, 0], sizes = [8, 1, 16, 32], strides = [1, 1, 1, 1]} : vector<8x2x16x32xf32> to vector<8x1x16x32xf32>
    %36 = vector.shape_cast %35 : vector<8x1x16x32xf32> to vector<8x16x32xf32>
    %37 = arith.addf %34, %36 : vector<8x16x32xf32>
    %38 = vector.shape_cast %37 : vector<8x16x32xf32> to vector<8x8x2x32xf32>
    %39 = vector.extract_strided_slice %38 {offsets = [0, 0, 0, 0], sizes = [8, 8, 1, 32], strides = [1, 1, 1, 1]} : vector<8x8x2x32xf32> to vector<8x8x1x32xf32>
    %40 = vector.shape_cast %39 : vector<8x8x1x32xf32> to vector<8x8x32xf32>
    %41 = vector.extract_strided_slice %38 {offsets = [0, 0, 1, 0], sizes = [8, 8, 1, 32], strides = [1, 1, 1, 1]} : vector<8x8x2x32xf32> to vector<8x8x1x32xf32>
    %42 = vector.shape_cast %41 : vector<8x8x1x32xf32> to vector<8x8x32xf32>
    %43 = arith.addf %40, %42 : vector<8x8x32xf32>
    %cst_40 = arith.constant 2.500000e-01 : f32
    %44 = vector.broadcast %cst_40 : f32 to vector<8x8x32xf32>
    %45 = arith.mulf %43, %44 : vector<8x8x32xf32>
    %cst_41 = arith.constant 0.000000e+00 : f32
    %46 = vector.broadcast %cst_41 : f32 to vector<10x10x32xf32>
    %c0_42 = arith.constant 0 : index
    %c0_43 = arith.constant 0 : index
    %c0_44 = arith.constant 0 : index
    %47 = vector.load %arg11[%c0_42, %c0_43, %c0_44] : memref<10x10x32xf32, #tpu.memory_space<vmem>>, vector<10x10x32xf32>
    tpu.vector_store %arg11[%c0_42, %c0_43, %c0_44], %46 {strides = array<i32>} : memref<10x10x32xf32, #tpu.memory_space<vmem>>, vector<10x10x32xf32>,
    %c1_45 = arith.constant 1 : index
    %c1_46 = arith.constant 1 : index
    %c0_47 = arith.constant 0 : index
    %48 = vector.load %arg11[%c1_45, %c1_46, %c0_47] : memref<10x10x32xf32, #tpu.memory_space<vmem>>, vector<8x8x32xf32>
    tpu.vector_store %arg11[%c1_45, %c1_46, %c0_47], %45 {strides = array<i32>} : memref<10x10x32xf32, #tpu.memory_space<vmem>>, vector<8x8x32xf32>,
    %c0_48 = arith.constant 0 : index
    %c0_49 = arith.constant 0 : index
    %c0_50 = arith.constant 0 : index
    %49 = vector.load %arg11[%c0_48, %c0_49, %c0_50] : memref<10x10x32xf32, #tpu.memory_space<vmem>>, vector<8x8x32xf32>
    %50 = vector.shape_cast %49 : vector<8x8x32xf32> to vector<64x32xf32>
    %c0_51 = arith.constant 0 : index
    %c1_52 = arith.constant 1 : index
    %c0_53 = arith.constant 0 : index
    %51 = vector.load %arg11[%c0_51, %c1_52, %c0_53] : memref<10x10x32xf32, #tpu.memory_space<vmem>>, vector<8x8x32xf32>
    %52 = vector.shape_cast %51 : vector<8x8x32xf32> to vector<64x32xf32>
    %c0_54 = arith.constant 0 : index
    %c2_55 = arith.constant 2 : index
    %c0_56 = arith.constant 0 : index
    %53 = vector.load %arg11[%c0_54, %c2_55, %c0_56] : memref<10x10x32xf32, #tpu.memory_space<vmem>>, vector<8x8x32xf32>
    %54 = vector.shape_cast %53 : vector<8x8x32xf32> to vector<64x32xf32>
    %c1_57 = arith.constant 1 : index
    %c0_58 = arith.constant 0 : index
    %c0_59 = arith.constant 0 : index
    %55 = vector.load %arg11[%c1_57, %c0_58, %c0_59] : memref<10x10x32xf32, #tpu.memory_space<vmem>>, vector<8x8x32xf32>
    %56 = vector.shape_cast %55 : vector<8x8x32xf32> to vector<64x32xf32>
    %c1_60 = arith.constant 1 : index
    %c1_61 = arith.constant 1 : index
    %c0_62 = arith.constant 0 : index
    %57 = vector.load %arg11[%c1_60, %c1_61, %c0_62] : memref<10x10x32xf32, #tpu.memory_space<vmem>>, vector<8x8x32xf32>
    %58 = vector.shape_cast %57 : vector<8x8x32xf32> to vector<64x32xf32>
    %c1_63 = arith.constant 1 : index
    %c2_64 = arith.constant 2 : index
    %c0_65 = arith.constant 0 : index
    %59 = vector.load %arg11[%c1_63, %c2_64, %c0_65] : memref<10x10x32xf32, #tpu.memory_space<vmem>>, vector<8x8x32xf32>
    %60 = vector.shape_cast %59 : vector<8x8x32xf32> to vector<64x32xf32>
    %c2_66 = arith.constant 2 : index
    %c0_67 = arith.constant 0 : index
    %c0_68 = arith.constant 0 : index
    %61 = vector.load %arg11[%c2_66, %c0_67, %c0_68] : memref<10x10x32xf32, #tpu.memory_space<vmem>>, vector<8x8x32xf32>
    %62 = vector.shape_cast %61 : vector<8x8x32xf32> to vector<64x32xf32>
    %c2_69 = arith.constant 2 : index
    %c1_70 = arith.constant 1 : index
    %c0_71 = arith.constant 0 : index
    %63 = vector.load %arg11[%c2_69, %c1_70, %c0_71] : memref<10x10x32xf32, #tpu.memory_space<vmem>>, vector<8x8x32xf32>
    %64 = vector.shape_cast %63 : vector<8x8x32xf32> to vector<64x32xf32>
    %c2_72 = arith.constant 2 : index
    %c2_73 = arith.constant 2 : index
    %c0_74 = arith.constant 0 : index
    %65 = vector.load %arg11[%c2_72, %c2_73, %c0_74] : memref<10x10x32xf32, #tpu.memory_space<vmem>>, vector<8x8x32xf32>
    %66 = vector.shape_cast %65 : vector<8x8x32xf32> to vector<64x32xf32>
    %67 = tpu.concatenate %50, %52, %54, %56, %58, %60, %62, %64, %66 in 1 : vector<64x32xf32>, vector<64x32xf32>, vector<64x32xf32>, vector<64x32xf32>, vector<64x32xf32>, vector<64x32xf32>, vector<64x32xf32>, vector<64x32xf32>, vector<64x32xf32> -> vector<64x288xf32>
    %68 = arith.truncf %67 : vector<64x288xf32> to vector<64x288xbf16>
    %c0_75 = arith.constant 0 : index
    %c0_76 = arith.constant 0 : index
    %69 = vector.load %arg4[%c0_75, %c0_76] : memref<288x32xbf16, #tpu.memory_space<vmem>>, vector<288x32xbf16>
    %cst_77 = arith.constant dense<0.000000e+00> : vector<64x32xf32>
    %70 = tpu.matmul %68, %69, %cst_77 {dimension_numbers = #tpu.dot_dimension_numbers<[1], [0], [0], [1], [0, 0, 1, 1], [], []>} : vector<64x288xbf16>, vector<288x32xbf16>, vector<64x32xf32> -> vector<64x32xf32>
    %c0_78 = arith.constant 0 : index
    %c0_79 = arith.constant 0 : index
    %71 = vector.load %arg5[%c0_78, %c0_79] : memref<1x32xf32, #tpu.memory_space<vmem>>, vector<1x32xf32>
    %72 = vector.broadcast %71 : vector<1x32xf32> to vector<64x32xf32>
    %73 = arith.addf %70, %72 : vector<64x32xf32>
    %cst_80 = arith.constant 0.000000e+00 : f32
    %74 = vector.broadcast %cst_80 : f32 to vector<64x32xf32>
    %75 = arith.maximumf %73, %74 : vector<64x32xf32>
    %76 = vector.shape_cast %75 : vector<64x32xf32> to vector<4x2x8x32xf32>
    %77 = vector.extract_strided_slice %76 {offsets = [0, 0, 0, 0], sizes = [4, 1, 8, 32], strides = [1, 1, 1, 1]} : vector<4x2x8x32xf32> to vector<4x1x8x32xf32>
    %78 = vector.shape_cast %77 : vector<4x1x8x32xf32> to vector<4x8x32xf32>
    %79 = vector.extract_strided_slice %76 {offsets = [0, 1, 0, 0], sizes = [4, 1, 8, 32], strides = [1, 1, 1, 1]} : vector<4x2x8x32xf32> to vector<4x1x8x32xf32>
    %80 = vector.shape_cast %79 : vector<4x1x8x32xf32> to vector<4x8x32xf32>
    %81 = arith.addf %78, %80 : vector<4x8x32xf32>
    %82 = vector.shape_cast %81 : vector<4x8x32xf32> to vector<4x4x2x32xf32>
    %83 = vector.extract_strided_slice %82 {offsets = [0, 0, 0, 0], sizes = [4, 4, 1, 32], strides = [1, 1, 1, 1]} : vector<4x4x2x32xf32> to vector<4x4x1x32xf32>
    %84 = vector.shape_cast %83 : vector<4x4x1x32xf32> to vector<4x4x32xf32>
    %85 = vector.extract_strided_slice %82 {offsets = [0, 0, 1, 0], sizes = [4, 4, 1, 32], strides = [1, 1, 1, 1]} : vector<4x4x2x32xf32> to vector<4x4x1x32xf32>
    %86 = vector.shape_cast %85 : vector<4x4x1x32xf32> to vector<4x4x32xf32>
    %87 = arith.addf %84, %86 : vector<4x4x32xf32>
    %cst_81 = arith.constant 2.500000e-01 : f32
    %88 = vector.broadcast %cst_81 : f32 to vector<4x4x32xf32>
    %89 = arith.mulf %87, %88 : vector<4x4x32xf32>
    %90 = vector.shape_cast %89 : vector<4x4x32xf32> to vector<16x32xf32>
    %cst_82 = arith.constant dense<0.000000e+00> : vector<32xf32>
    %91 = vector.multi_reduction <add>, %90, %cst_82 [0] : vector<16x32xf32> to vector<32xf32>
    %92 = vector.shape_cast %91 : vector<32xf32> to vector<1x32xf32>
    %c0_83 = arith.constant 0 : index
    %c0_84 = arith.constant 0 : index
    %93 = vector.load %arg6[%c0_83, %c0_84] : memref<1x32xf32, #tpu.memory_space<vmem>>, vector<1x32xf32>
    %94 = arith.mulf %92, %93 : vector<1x32xf32>
    %cst_85 = arith.constant dense<0.000000e+00> : vector<1xf32>
    %95 = vector.multi_reduction <add>, %94, %cst_85 [1] : vector<1x32xf32> to vector<1xf32>
    %96 = vector.shape_cast %95 : vector<1xf32> to vector<1x1xf32>
    %c0_86 = arith.constant 0 : index
    %c0_87 = arith.constant 0 : index
    %97 = vector.load %arg7[%c0_86, %c0_87] : memref<1x1xf32, #tpu.memory_space<vmem>>, vector<1x1xf32>
    %98 = arith.addf %96, %97 : vector<1x1xf32>
    %c0_88 = arith.constant 0 : index
    %c0_89 = arith.constant 0 : index
    %c0_90 = arith.constant 0 : index
    %99 = vector.load %arg8[%c0_88, %c0_89, %c0_90] : memref<1x1x32xf32, #tpu.memory_space<vmem>>, vector<1x1x32xf32>
    %100 = vector.shape_cast %99 : vector<1x1x32xf32> to vector<1x32xf32>
    %101 = arith.mulf %92, %100 : vector<1x32xf32>
    %cst_91 = arith.constant dense<0.000000e+00> : vector<1xf32>
    %102 = vector.multi_reduction <add>, %101, %cst_91 [1] : vector<1x32xf32> to vector<1xf32>
    %103 = vector.shape_cast %102 : vector<1xf32> to vector<1x1xf32>
    %104 = arith.addf %98, %103 : vector<1x1xf32>
    %c0_92 = arith.constant 0 : index
    %c0_93 = arith.constant 0 : index
    %c0_94 = arith.constant 0 : index
    %105 = vector.load %arg9[%c0_92, %c0_93, %c0_94] : memref<1x1x1xf32, #tpu.memory_space<vmem>>, vector<1x1x1xf32>
    %106 = vector.shape_cast %105 : vector<1x1x1xf32> to vector<1x1xf32>
    %107 = vector.shape_cast %104 : vector<1x1xf32> to vector<1x1x1xf32>
    tpu.vector_store %arg9[%c0_92, %c0_93, %c0_94], %107 {strides = array<i32>} : memref<1x1x1xf32, #tpu.memory_space<vmem>>, vector<1x1x1xf32>,
    return
  }
  func.func @transform_0(%arg0: i32) -> (i32, i32, i32, i32) {
    %c0_i32 = arith.constant 0 : i32
    %c0_i32_0 = arith.constant 0 : i32
    %c0_i32_1 = arith.constant 0 : i32
    %c0_i32_2 = arith.constant 0 : i32
    return %arg0, %c0_i32, %c0_i32_0, %c0_i32_1 : i32, i32, i32, i32
  }
  func.func @transform_1(%arg0: i32) -> (i32, i32) {
    %c0_i32 = arith.constant 0 : i32
    %c0_i32_0 = arith.constant 0 : i32
    %c0_i32_1 = arith.constant 0 : i32
    return %c0_i32, %c0_i32_0 : i32, i32
  }
  func.func @transform_2(%arg0: i32) -> (i32, i32) {
    %c0_i32 = arith.constant 0 : i32
    %c0_i32_0 = arith.constant 0 : i32
    %c0_i32_1 = arith.constant 0 : i32
    return %c0_i32, %c0_i32_0 : i32, i32
  }
  func.func @transform_3(%arg0: i32) -> (i32, i32) {
    %c0_i32 = arith.constant 0 : i32
    %c0_i32_0 = arith.constant 0 : i32
    %c0_i32_1 = arith.constant 0 : i32
    return %c0_i32, %c0_i32_0 : i32, i32
  }
  func.func @transform_4(%arg0: i32) -> (i32, i32) {
    %c0_i32 = arith.constant 0 : i32
    %c0_i32_0 = arith.constant 0 : i32
    %c0_i32_1 = arith.constant 0 : i32
    return %c0_i32, %c0_i32_0 : i32, i32
  }
  func.func @transform_5(%arg0: i32) -> (i32, i32) {
    %c0_i32 = arith.constant 0 : i32
    %c0_i32_0 = arith.constant 0 : i32
    %c0_i32_1 = arith.constant 0 : i32
    return %c0_i32, %c0_i32_0 : i32, i32
  }
  func.func @transform_6(%arg0: i32) -> (i32, i32) {
    %c0_i32 = arith.constant 0 : i32
    %c0_i32_0 = arith.constant 0 : i32
    %c0_i32_1 = arith.constant 0 : i32
    return %c0_i32, %c0_i32_0 : i32, i32
  }
  func.func @transform_7(%arg0: i32) -> (i32, i32, i32) {
    %c0_i32 = arith.constant 0 : i32
    %c0_i32_0 = arith.constant 0 : i32
    %c0_i32_1 = arith.constant 0 : i32
    return %arg0, %c0_i32, %c0_i32_0 : i32, i32, i32
  }
  func.func @transform_8(%arg0: i32) -> (i32, i32, i32) {
    %c0_i32 = arith.constant 0 : i32
    %c0_i32_0 = arith.constant 0 : i32
    %c0_i32_1 = arith.constant 0 : i32
    return %arg0, %c0_i32, %c0_i32_0 : i32, i32, i32
  }
}

</mosaic_0001>

<bundles_post_ra>
// kernel: discriminator_forward.1
= control target key start
LH: loop header
LB: loop body
LE: loop exit
PB: predicated region body
PF: predicated region fallthrough
CT: control target
= control target key end

     0   :  { %s5517_s29 = smov 0   ;;  %s6990_s0 = inlined_call_operand.vmem [shape: f32[2,16,16,4], index: 0, kind: input, shape index: {}]   ;;  %s6991_s1 = inlined_call_operand.vmem [shape: bf16[36,32], index: 1, kind: input, shape index: {}]   ;;  %s6992_s2 = inlined_call_operand.vmem [shape: f32[1,32], index: 2, kind: input, shape index: {}]   ;;  %s6993_s3 = inlined_call_operand.vmem [shape: bf16[288,32], index: 3, kind: input, shape index: {}]   ;;  %s6994_s4 = inlined_call_operand.vmem [shape: f32[1,32], index: 4, kind: input, shape index: {}]   ;;  %s6995_s5 = inlined_call_operand.vmem [shape: f32[1,32], index: 5, kind: input, shape index: {}]   ;;  %s6996_s6 = inlined_call_operand.<no memory space> [shape: f32[1,1], index: 6, kind: input, shape index: {}]   ;;  %s6997_s7 = inlined_call_operand.vmem [shape: f32[2,1,32], index: 7, kind: input, shape index: {}]   ;;  %s6998_s8 = inlined_call_operand.vmem [shape: f32[2,1,1], index: 8, kind: output, shape index: {}]  }
   0x1   :  { %v13_v0 = vstv %s6996_s6 }
   0x2   :  { %14 = vst [vmem:[#allocation4] sm:$0x1] %v13_v0 }
   0x3 LB: > { %s4391_s30 = sadd.s32 4294967295, %s5455_s29   ;;  %p4395_p0 = scmp.ge.s32.totalorder %s5455_s29, 1  ;;  %s5455_s29 = sphi %s5517_s29, %s20_s29  }
   0x4   : > { %p272_p1 = scmp.lt.s32.totalorder %s5455_s29, 3 }
   0x6   : > { %p273_p2 = pnand %p4395_p0, %p272_p1 }
   0x7   : > { %p307_p3 = scmp.lt.s32.totalorder (!%p273_p2), %s4391_s30, 1  ;;  %s5458_s12 = smov (!%p273_p2), 8  }
   0x8   : > { %276 = sbr.rel (%p273_p2) target bundleno = 1191 (0x4a7), region = 52  ;;  %s5459_s13 = smov (!%p273_p2), 4  }
   0x9   : > { %s5460_s14 = smov (!%p273_p2), 12   ;;  %s5461_s15 = smov (!%p273_p2), 16  }
   0xa   : > { %s5462_s16 = smov (!%p273_p2), 20   ;;  %s5463_s19 = smov (!%p273_p2), 24  }
   0xb   : > { %s5464_s24 = smov (!%p273_p2), 28   ;;  %s5465_s25 = smov (!%p273_p2), 32  }
   0xc   : > { %s5467_s28 = smov (!%p273_p2), 64  }
   0xd   : > { %vm319_vm0 = vcmask 31744   ;;  %vm322_vm1 = vcmask 25600   ;;  %v5457_v1 = vmov 0.0   ;;  %s7000_s30 = smov (!%p307_p3, %s4391_s30), 1  ;;  %vm1983_vm2 = vcmask 261120   ;;  %v5421_v53 = vld [vmem:[%s6991_s1 + $0x8] sm:$0xff]  }
   0xe   : > { %320 = vst.msk [vmem:[#allocation2] sm:$0xff] %vm319_vm0, %v5457_v1  ;;  %321 = vst.msk [vmem:[#allocation2 + $0x8] sm:$0xff] %vm319_vm0, %v5457_v1  ;;  %s4523_s6 = sshll.u32 %s7000_s30, 8  ;;  %vm2108_vm3 = vcmask 1041408   ;;  %v5422_v56 = vld [vmem:[%s6991_s1] sm:$0xff]   ;;  %vm1785_vm4 = vcmask 64512   ;;  %s317_s17 = scalar_lea.vmem %s6998_s8, %s7000_s30 }
   0xf   : > { %323 = vst.msk [vmem:[#allocation2 + $0x10] sm:$0x3] %vm322_vm1, %v5457_v1  ;;  %326 = vst.msk [vmem:[#allocation2 + $0x28] sm:$0x3] %vm322_vm1, %v5457_v1  ;;  %s5643_s11 = scalar_lea.vmem %s6990_s0, %s4523_s6  ;;  %vm1818_vm5 = vcmask 97280   ;;  %vm1851_vm6 = vcmask 130048  }
  0x10   : > { %324 = vst.msk [vmem:[#allocation2 + $0x18] sm:$0xff] %vm319_vm0, %v5457_v1  ;;  %325 = vst.msk [vmem:[#allocation2 + $0x20] sm:$0xff] %vm319_vm0, %v5457_v1  ;;  %v375_v2 = vld [vmem:[%s5643_s11] sm:$0xff]  ;;  %v376_v3 = vld [vmem:[%s5643_s11 + $0x8] sm:$0xff]  ;;  %vm1884_vm7 = vcmask 162816   ;;  %vm1917_vm8 = vcmask 195584  }
  0x11   : > { %327 = vst.msk [vmem:[#allocation2 + $0x30] sm:$0xff] %vm319_vm0, %v5457_v1  ;;  %328 = vst.msk [vmem:[#allocation2 + $0x38] sm:$0xff] %vm319_vm0, %v5457_v1  ;;  %v377_v4 = vld [vmem:[%s5643_s11 + $0x10] sm:$0xff]  ;;  %v378_v10 = vld [vmem:[%s5643_s11 + $0x18] sm:$0xff]  ;;  %vm1950_vm9 = vcmask 228352   ;;  %vm2059_vm10 = vcmask 293888  }
  0x12   : > { %329 = vst.msk [vmem:[#allocation2 + $0x40] sm:$0x3] %vm322_vm1, %v5457_v1  ;;  %332 = vst.msk [vmem:[#allocation2 + $0x58] sm:$0x3] %vm322_vm1, %v5457_v1  ;;  %v379_v11 = vld [vmem:[%s5643_s11 + $0x20] sm:$0xff]  ;;  %v380_v13 = vld [vmem:[%s5643_s11 + $0x28] sm:$0xff] }
  0x13   : > { %330 = vst.msk [vmem:[#allocation2 + $0x48] sm:$0xff] %vm319_vm0, %v5457_v1  ;;  %331 = vst.msk [vmem:[#allocation2 + $0x50] sm:$0xff] %vm319_vm0, %v5457_v1  ;;  %v381_v14 = vld [vmem:[%s5643_s11 + $0x30] sm:$0xff]  ;;  %v382_v15 = vld [vmem:[%s5643_s11 + $0x38] sm:$0xff]  ;;  %vm2994_vm11 = vcmask 254976   ;;  %vm3334_vm12 = vcmask 1041409  }
  0x14   : > { %333 = vst.msk [vmem:[#allocation2 + $0x60] sm:$0xff] %vm319_vm0, %v5457_v1  ;;  %334 = vst.msk [vmem:[#allocation2 + $0x68] sm:$0xff] %vm319_vm0, %v5457_v1  ;;  %v383_v16 = vld [vmem:[%s5643_s11 + $0x40] sm:$0xff]  ;;  %v384_v17 = vld [vmem:[%s5643_s11 + $0x48] sm:$0xff]  ;;  %vm3336_vm13 = vcmask 1042434   ;;  %vm3338_vm14 = vcmask 1043459  }
  0x15   : > { %335 = vst.msk [vmem:[#allocation2 + $0x70] sm:$0x3] %vm322_vm1, %v5457_v1  ;;  %338 = vst.msk [vmem:[#allocation2 + $0x88] sm:$0x3] %vm322_vm1, %v5457_v1  ;;  %v504_v5 = vld [vmem:[#allocation2 + $0x2] sm:$0xff]  ;;  %v385_v18 = vld [vmem:[%s5643_s11 + $0x50] sm:$0xff] }
  0x16   : > { %336 = vst.msk [vmem:[#allocation2 + $0x78] sm:$0xff] %vm319_vm0, %v5457_v1  ;;  %337 = vst.msk [vmem:[#allocation2 + $0x80] sm:$0xff] %vm319_vm0, %v5457_v1  ;;  %v505_v6 = vld [vmem:[#allocation2 + $0xa] sm:$0xff]  ;;  %v472_v7 = vld [vmem:[#allocation2 + $0x1] sm:$0xff]  ;;  %vm3340_vm15 = vcmask 1044484   ;;  %s5468_s6 = smov 96  }
  0x17   : > { %339 = vst.msk [vmem:[#allocation2 + $0x90] sm:$0xff] %vm319_vm0, %v5457_v1  ;;  %340 = vst.msk [vmem:[#allocation2 + $0x98] sm:$0xff] %vm319_vm0, %v5457_v1  ;;  %v4665_v8 = vpack.i.bf16 %v505_v6, %v504_v5  ;;  %v473_v9 = vld [vmem:[#allocation2 + $0x9] sm:$0xff]  ;;  %v386_v19 = vld [vmem:[%s5643_s11 + $0x58] sm:$0xff] }
  0x18   : > { %341 = vst.msk [vmem:[#allocation2 + $0xa0] sm:$0x3] %vm322_vm1, %v5457_v1  ;;  %344 = vst.msk [vmem:[#allocation2 + $0xb8] sm:$0x3] %vm322_vm1, %v5457_v1  ;;  %v4660_v12 = vpack.i.bf16 %v473_v9, %v472_v7  ;;  %v387_v20 = vld [vmem:[%s5643_s11 + $0x60] sm:$0xff]  ;;  %v388_v21 = vld [vmem:[%s5643_s11 + $0x68] sm:$0xff] }
  0x19   : > { %342 = vst.msk [vmem:[#allocation2 + $0xa8] sm:$0xff] %vm319_vm0, %v5457_v1  ;;  %343 = vst.msk [vmem:[#allocation2 + $0xb0] sm:$0xff] %vm319_vm0, %v5457_v1  ;;  %4666 = vrot.lane.b32.xlu1 %v4665_v8, %s5458_s12  ;;  %v389_v22 = vld [vmem:[%s5643_s11 + $0x70] sm:$0xff]  ;;  %v390_v23 = vld [vmem:[%s5643_s11 + $0x78] sm:$0xff] }
  0x1a   : > { %345 = vst.msk [vmem:[#allocation2 + $0xc0] sm:$0xff] %vm319_vm0, %v5457_v1  ;;  %346 = vst.msk [vmem:[#allocation2 + $0xc8] sm:$0xff] %vm319_vm0, %v5457_v1  ;;  %4661 = vrot.lane.b32.xlu0 %v4660_v12, %s5459_s13  ;;  %v391_v24 = vld [vmem:[%s5643_s11 + $0x80] sm:$0xff]  ;;  %v392_v25 = vld [vmem:[%s5643_s11 + $0x88] sm:$0xff] }
  0x1b   : > { %347 = vst.msk [vmem:[#allocation2 + $0xd0] sm:$0x3] %vm322_vm1, %v5457_v1  ;;  %350 = vst.msk [vmem:[#allocation2 + $0xe8] sm:$0x3] %vm322_vm1, %v5457_v1  ;;  %v393_v49 = vld [vmem:[%s5643_s11 + $0x90] sm:$0xff]  ;;  %v394_v50 = vld [vmem:[%s5643_s11 + $0x98] sm:$0xff] }
  0x1c   : > { %348 = vst.msk [vmem:[#allocation2 + $0xd8] sm:$0xff] %vm319_vm0, %v5457_v1  ;;  %349 = vst.msk [vmem:[#allocation2 + $0xe0] sm:$0xff] %vm319_vm0, %v5457_v1  ;;  %v5420_v51 = vld [vmem:[%s6991_s1 + $0x10] ss:$0 sps:$4 sm:$0x33]   ;;  %v395_v54 = vld [vmem:[%s5643_s11 + $0xa0] sm:$0xff] }
  0x1d   : > { %351 = vst.msk [vmem:[#allocation2 + $0xf0] sm:$0xff] %vm319_vm0, %v5457_v1  ;;  %352 = vst.msk [vmem:[#allocation2 + $0xf8] sm:$0xff] %vm319_vm0, %v5457_v1  ;;  %4639 = vmatprep.subr.msk.bf16.mxu0 %vm2108_vm3, %v5420_v51  ;;  %v2110_v55 = vsel %vm2108_vm3, %v5420_v51, 0  ;;  %v396_v57 = vld [vmem:[%s5643_s11 + $0xa8] sm:$0xff]  ;;  %v397_v63 = vld [vmem:[%s5643_s11 + $0xb0] sm:$0xff]  ;;  %vm3346_vm3 = vcmask 1047559  }
  0x1e   : > { %353 = vst.msk [vmem:[#allocation2 + $0x100] sm:$0x3] %vm322_vm1, %v5457_v1  ;;  %356 = vst.msk [vmem:[#allocation2 + $0x118] sm:$0x3] %vm322_vm1, %v5457_v1  ;;  %4590 = vmatpush3.bf16.msra.mxu0 %v2110_v55  ;;  %v398_v0 = vld [vmem:[%s5643_s11 + $0xb8] sm:$0xff]  ;;  %v399_v8 = vld [vmem:[%s5643_s11 + $0xc0] sm:$0xff] }
  0x1f   : > { %354 = vst.msk [vmem:[#allocation2 + $0x108] sm:$0xff] %vm319_vm0, %v5457_v1  ;;  %355 = vst.msk [vmem:[#allocation2 + $0x110] sm:$0xff] %vm319_vm0, %v5457_v1  ;;  %4591 = vmatprep.subr.bf16.mxu0 %v5421_v53  ;;  %v400_v9 = vld [vmem:[%s5643_s11 + $0xc8] sm:$0xff] }
  0x20   : > { %357 = vst.msk [vmem:[#allocation2 + $0x120] sm:$0xff] %vm319_vm0, %v5457_v1  ;;  %358 = vst.msk [vmem:[#allocation2 + $0x128] sm:$0xff] %vm319_vm0, %v5457_v1 }
  0x21   : > { %359 = vst.msk [vmem:[#allocation2 + $0x130] sm:$0x3] %vm322_vm1, %v5457_v1  ;;  %362 = vst.msk [vmem:[#allocation2 + $0x148] sm:$0x3] %vm322_vm1, %v5457_v1 }
  0x22   : > { %360 = vst.msk [vmem:[#allocation2 + $0x138] sm:$0xff] %vm319_vm0, %v5457_v1  ;;  %361 = vst.msk [vmem:[#allocation2 + $0x140] sm:$0xff] %vm319_vm0, %v5457_v1  ;;  %4592 = vmatpush3.bf16.msra.mxu0 %v5421_v53 }
  0x23   : > { %363 = vst.msk [vmem:[#allocation2 + $0x150] sm:$0xff] %vm319_vm0, %v5457_v1  ;;  %364 = vst.msk [vmem:[#allocation2 + $0x158] sm:$0xff] %vm319_vm0, %v5457_v1  ;;  %4593 = vmatprep.subr.bf16.mxu0 %v5422_v56 }
  0x24   : > { %365 = vst.msk [vmem:[#allocation2 + $0x160] sm:$0x3] %vm322_vm1, %v5457_v1  ;;  %368 = vst.msk [vmem:[#allocation2 + $0x178] sm:$0x3] %vm322_vm1, %v5457_v1 }
  0x25   : > { %366 = vst.msk [vmem:[#allocation2 + $0x168] sm:$0xff] %vm319_vm0, %v5457_v1  ;;  %367 = vst.msk [vmem:[#allocation2 + $0x170] sm:$0xff] %vm319_vm0, %v5457_v1 }
  0x26   : > { %369 = vst.msk [vmem:[#allocation2 + $0x180] sm:$0xff] %vm319_vm0, %v5457_v1  ;;  %370 = vst.msk [vmem:[#allocation2 + $0x188] sm:$0xff] %vm319_vm0, %v5457_v1  ;;  %4594 = vmatpush3.bf16.msra.mxu0 %v5422_v56 }
  0x27   : > { %371 = vst.msk [vmem:[#allocation2 + $0x190] sm:$0x3] %vm322_vm1, %v5457_v1  ;;  %374 = vst.msk [vmem:[#allocation2 + $0x1a8] sm:$0x3] %vm322_vm1, %v5457_v1  ;;  %vm3344_vm1 = vcmask 1046534  }
  0x28   : > { %372 = vst.msk [vmem:[#allocation2 + $0x198] sm:$0xff] %vm319_vm0, %v5457_v1  ;;  %373 = vst.msk [vmem:[#allocation2 + $0x1a0] sm:$0xff] %vm319_vm0, %v5457_v1 }
  0x29   : > { %408 = vst.msk [vmem:[#allocation2 + $0x19] sm:$0xff] %vm319_vm0, %v375_v2  ;;  %409 = vst.msk [vmem:[#allocation2 + $0x21] sm:$0xff] %vm319_vm0, %v376_v3 }
  0x2a   : > { %410 = vst.msk [vmem:[#allocation2 + $0x31] sm:$0xff] %vm319_vm0, %v377_v4  ;;  %411 = vst.msk [vmem:[#allocation2 + $0x39] sm:$0xff] %vm319_vm0, %v378_v10 }
  0x2b   : > { %412 = vst.msk [vmem:[#allocation2 + $0x49] sm:$0xff] %vm319_vm0, %v379_v11  ;;  %413 = vst.msk [vmem:[#allocation2 + $0x51] sm:$0xff] %vm319_vm0, %v380_v13 }
  0x2c   : > { %414 = vst.msk [vmem:[#allocation2 + $0x61] sm:$0xff] %vm319_vm0, %v381_v14  ;;  %415 = vst.msk [vmem:[#allocation2 + $0x69] sm:$0xff] %vm319_vm0, %v382_v15 }
  0x2d   : > { %416 = vst.msk [vmem:[#allocation2 + $0x79] sm:$0xff] %vm319_vm0, %v383_v16  ;;  %417 = vst.msk [vmem:[#allocation2 + $0x81] sm:$0xff] %vm319_vm0, %v384_v17 }
  0x2e   : > { %418 = vst.msk [vmem:[#allocation2 + $0x91] sm:$0xff] %vm319_vm0, %v385_v18  ;;  %419 = vst.msk [vmem:[#allocation2 + $0x99] sm:$0xff] %vm319_vm0, %v386_v19 }
  0x2f   : > { %420 = vst.msk [vmem:[#allocation2 + $0xa9] sm:$0xff] %vm319_vm0, %v387_v20  ;;  %421 = vst.msk [vmem:[#allocation2 + $0xb1] sm:$0xff] %vm319_vm0, %v388_v21  ;;  %v401_v20 = vld [vmem:[%s5643_s11 + $0xd0] sm:$0xff]  ;;  %v402_v21 = vld [vmem:[%s5643_s11 + $0xd8] sm:$0xff] }
  0x30   : > { %422 = vst.msk [vmem:[#allocation2 + $0xc1] sm:$0xff] %vm319_vm0, %v389_v22  ;;  %423 = vst.msk [vmem:[#allocation2 + $0xc9] sm:$0xff] %vm319_vm0, %v390_v23  ;;  %v506_v26 = vld [vmem:[#allocation2 + $0x1a] sm:$0xff]  ;;  %v507_v27 = vld [vmem:[#allocation2 + $0x22] sm:$0xff] }
  0x31   : > { %v474_v28 = vld [vmem:[#allocation2 + $0x19] sm:$0xff]  ;;  %424 = vst.msk [vmem:[#allocation2 + $0xd9] sm:$0xff] %vm319_vm0, %v391_v24  ;;  %425 = vst.msk [vmem:[#allocation2 + $0xe1] sm:$0xff] %vm319_vm0, %v392_v25  ;;  %v4675_v29 = vpack.i.bf16 %v507_v27, %v506_v26  ;;  %v475_v30 = vld [vmem:[#allocation2 + $0x21] sm:$0xff] }
  0x32   : > { %v5683_v31 = vld [vmem:[#allocation2 + $0x30] sm:$0xff]  ;;  %v5685_v32 = vld [vmem:[#allocation2 + $0x18] sm:$0xff]  ;;  %v4670_v33 = vpack.i.bf16 %v475_v30, %v474_v28  ;;  %v5689_v35 = vld [vmem:[#allocation2 + $0x20] sm:$0xff]  ;;  %2993 = vst.msk [vmem:[#allocation3] sm:$0xff] %vm1983_vm2, %v5457_v1 }
  0x33   : > { %v5687_v34 = vld [vmem:[#allocation2 + $0x38] sm:$0xff]  ;;  %4676 = vrot.lane.b32.xlu1 %v4675_v29, %s5458_s12  ;;  %v4680_v37 = vpack.i.bf16 %v5689_v35, %v5685_v32  ;;  %v5703_v44 = vld [vmem:[#allocation2 + $0x48] sm:$0xff]  ;;  %v5705_v45 = vld [vmem:[#allocation2 + $0x50] sm:$0xff]  ;;  %2996 = vst.msk [vmem:[#allocation3 + $0x10] sm:$0xff] %vm1983_vm2, %v5457_v1 }
  0x34   : > { %v4685_v36 = vpack.i.bf16 %v5687_v34, %v5683_v31  ;;  %4671 = vrot.lane.b32.xlu0 %v4670_v33, %s5459_s13  ;;  %v570_v38 = vld [vmem:[#allocation2 + $0x31] sm:$0xff]  ;;  %v571_v39 = vld [vmem:[#allocation2 + $0x39] sm:$0xff]  ;;  %v4715_v46 = vpack.i.bf16 %v5705_v45, %v5703_v44  ;;  %v667_v47 = vld [vmem:[#allocation2 + $0x49] sm:$0xff]  ;;  %2998 = vst.msk [vmem:[#allocation3 + $0x20] sm:$0xff] %vm1983_vm2, %v5457_v1 }
  0x35   : > { %v4695_v40 = vpack.i.bf16 %v571_v39, %v570_v38  ;;  %v602_v41 = vld [vmem:[#allocation2 + $0x32] sm:$0xff]  ;;  %v603_v42 = vld [vmem:[#allocation2 + $0x3a] sm:$0xff]  ;;  %3000 = vst.msk [vmem:[#allocation3 + $0x30] sm:$0xff] %vm1983_vm2, %v5457_v1  ;;  %3002 = vst.msk [vmem:[#allocation3 + $0x40] sm:$0xff] %vm1983_vm2, %v5457_v1 }
  0x36   : > { %v5700_v43 = vpack.i.bf16 %v603_v42, %v602_v41  ;;  %v668_v48 = vld [vmem:[#allocation2 + $0x51] sm:$0xff]  ;;  %3004 = vst.msk [vmem:[#allocation3 + $0x50] sm:$0xff] %vm1983_vm2, %v5457_v1  ;;  %3006 = vst.msk [vmem:[#allocation3 + $0x60] sm:$0xff] %vm1983_vm2, %v5457_v1  ;;  %v5758_v61 = vld [vmem:[#allocation2 + $0x60] sm:$0xff] }
  0x37   : > { %4686 = vrot.lane.b32.xlu1 %v4685_v36, %s5460_s14  ;;  %3008 = vst.msk [vmem:[#allocation3 + $0x70] sm:$0xff] %vm1983_vm2, %v5457_v1  ;;  %3010 = vst.msk [vmem:[#allocation3 + $0x80] sm:$0xff] %vm1983_vm2, %v5457_v1  ;;  %v4725_v52 = vpack.i.bf16 %v668_v48, %v667_v47  ;;  %v699_v58 = vld [vmem:[#allocation2 + $0x4a] sm:$0xff]  ;;  %v700_v59 = vld [vmem:[#allocation2 + $0x52] sm:$0xff] }
  0x38   : > { %4681 = vrot.lane.b32.xlu0 %v4680_v37, %s5460_s14  ;;  %3012 = vst.msk [vmem:[#allocation3 + $0x90] sm:$0xff] %vm1983_vm2, %v5457_v1  ;;  %v4740_v60 = vpack.i.bf16 %v700_v59, %v699_v58  ;;  %v5760_v62 = vld [vmem:[#allocation2 + $0x68] sm:$0xff]  ;;  %v5781_v11 = vld [vmem:[#allocation2 + $0x78] sm:$0xff]  ;;  %v5783_v12 = vld [vmem:[#allocation2 + $0x80] sm:$0xff] }
  0x39   : > { %426 = vst.msk [vmem:[#allocation2 + $0xf1] sm:$0xff] %vm319_vm0, %v393_v49  ;;  %427 = vst.msk [vmem:[#allocation2 + $0xf9] sm:$0xff] %vm319_vm0, %v394_v50  ;;  %v4765_v2 = vpack.i.bf16 %v5760_v62, %v5758_v61  ;;  %v574_v3 = vld [vmem:[#allocation2 + $0x61] sm:$0xff]  ;;  %v575_v4 = vld [vmem:[#allocation2 + $0x69] sm:$0xff]  ;;  %v4795_v13 = vpack.i.bf16 %v5783_v12, %v5781_v11 }
  0x3a   : > { %428 = vst.msk [vmem:[#allocation2 + $0x109] sm:$0xff] %vm319_vm0, %v395_v54  ;;  %429 = vst.msk [vmem:[#allocation2 + $0x111] sm:$0xff] %vm319_vm0, %v396_v57  ;;  %v4775_v5 = vpack.i.bf16 %v575_v4, %v574_v3  ;;  %v606_v6 = vld [vmem:[#allocation2 + $0x62] sm:$0xff]  ;;  %v607_v7 = vld [vmem:[#allocation2 + $0x6a] sm:$0xff] }
  0x3b   : > { %4696 = vrot.lane.b32.xlu1 %v4695_v40, %s5461_s15  ;;  %430 = vst.msk [vmem:[#allocation2 + $0x121] sm:$0xff] %vm319_vm0, %v397_v63  ;;  %431 = vst.msk [vmem:[#allocation2 + $0x129] sm:$0xff] %vm319_vm0, %v398_v0  ;;  %v4785_v10 = vpack.i.bf16 %v607_v7, %v606_v6  ;;  %v671_v14 = vld [vmem:[#allocation2 + $0x79] sm:$0xff]  ;;  %v672_v15 = vld [vmem:[#allocation2 + $0x81] sm:$0xff] }
  0x3c   : > { %4691 = vrot.lane.b32.xlu0 %v4670_v33, %s5461_s15  ;;  %432 = vst.msk [vmem:[#allocation2 + $0x139] sm:$0xff] %vm319_vm0, %v399_v8  ;;  %433 = vst.msk [vmem:[#allocation2 + $0x141] sm:$0xff] %vm319_vm0, %v400_v9  ;;  %v4805_v16 = vpack.i.bf16 %v672_v15, %v671_v14  ;;  %v703_v17 = vld [vmem:[#allocation2 + $0x7a] sm:$0xff]  ;;  %v704_v18 = vld [vmem:[#allocation2 + $0x82] sm:$0xff] }
  0x3d   : > { %v4820_v19 = vpack.i.bf16 %v704_v18, %v703_v17  ;;  %434 = vst.msk [vmem:[#allocation2 + $0x151] sm:$0xff] %vm319_vm0, %v401_v20  ;;  %435 = vst.msk [vmem:[#allocation2 + $0x159] sm:$0xff] %vm319_vm0, %v402_v21  ;;  %v546_v22 = vld [vmem:[#allocation2 + $0x90] sm:$0xff]  ;;  %v547_v23 = vld [vmem:[#allocation2 + $0x98] sm:$0xff] }
  0x3e   : > { %v4845_v24 = vpack.i.bf16 %v547_v23, %v546_v22  ;;  %v578_v25 = vld [vmem:[#allocation2 + $0x91] sm:$0xff]  ;;  %v579_v26 = vld [vmem:[#allocation2 + $0x99] sm:$0xff]  ;;  %v404_v33 = vld [vmem:[%s5643_s11 + $0xe8] sm:$0xff]  ;;  %2997 = vst.msk [vmem:[#allocation3 + $0x18] sm:$0x3] %vm2994_vm11, %v5457_v1 }
  0x3f   : > { %4706 = vrot.lane.b32.xlu1 %v5700_v43, %s5462_s16  ;;  %v4855_v27 = vpack.i.bf16 %v579_v26, %v578_v25  ;;  %v610_v28 = vld [vmem:[#allocation2 + $0x92] sm:$0xff]  ;;  %v403_v30 = vld [vmem:[%s5643_s11 + $0xe0] sm:$0xff]  ;;  %437 = vst.msk [vmem:[#allocation2 + $0x171] sm:$0xff] %vm319_vm0, %v404_v33  ;;  %v643_v37 = vld [vmem:[#allocation2 + $0xa8] sm:$0xff] }
  0x40   : > { %4701 = vrot.lane.b32.xlu0 %v4675_v29, %s5462_s16  ;;  %v611_v29 = vld [vmem:[#allocation2 + $0x9a] sm:$0xff]  ;;  %436 = vst.msk [vmem:[#allocation2 + $0x169] sm:$0xff] %vm319_vm0, %v403_v30  ;;  %v644_v38 = vld [vmem:[#allocation2 + $0xb0] sm:$0xff]  ;;  %v551_v51 = vld [vmem:[#allocation2 + $0xc8] sm:$0xff] }
  0x41   : > { %v4875_v39 = vpack.i.bf16 %v644_v38, %v643_v37  ;;  %v676_v41 = vld [vmem:[#allocation2 + $0xb1] sm:$0xff]  ;;  %v550_v50 = vld [vmem:[#allocation2 + $0xc0] sm:$0xff]  ;;  %v583_v54 = vld [vmem:[#allocation2 + $0xc9] sm:$0xff]  ;;  %2995 = vst.msk [vmem:[#allocation3 + $0x8] sm:$0x3] %vm2994_vm11, %v5457_v1 }
  0x42   : > { %v405_v48 = vld [vmem:[%s5643_s11 + $0xf0] sm:$0xff]  ;;  %v406_v49 = vld [vmem:[%s5643_s11 + $0xf8] sm:$0xff]  ;;  %v582_v53 = vld [vmem:[#allocation2 + $0xc1] sm:$0xff]  ;;  %2999 = vst.msk [vmem:[#allocation3 + $0x28] sm:$0x3] %vm2994_vm11, %v5457_v1 }
  0x43   : > { %4716 = vrot.lane.b32.xlu1 %v4715_v46, %s5463_s19  ;;  %438 = vst.msk [vmem:[#allocation2 + $0x181] sm:$0xff] %vm319_vm0, %v405_v48  ;;  %439 = vst.msk [vmem:[#allocation2 + $0x189] sm:$0xff] %vm319_vm0, %v406_v49  ;;  %v4935_v55 = vpack.i.bf16 %v583_v54, %v582_v53  ;;  %v614_v56 = vld [vmem:[#allocation2 + $0xc2] sm:$0xff]  ;;  %v615_v57 = vld [vmem:[#allocation2 + $0xca] sm:$0xff] }
  0x44   : > { %4711 = vrot.lane.b32.xlu0 %v4685_v36, %s5463_s19  ;;  %v4865_v36 = vpack.i.bf16 %v611_v29, %v610_v28  ;;  %v4945_v58 = vpack.i.bf16 %v615_v57, %v614_v56  ;;  %v647_v59 = vld [vmem:[#allocation2 + $0xd8] sm:$0xff]  ;;  %v680_v4 = vld [vmem:[#allocation2 + $0xe1] sm:$0xff]  ;;  %v554_v17 = vld [vmem:[#allocation2 + $0xf0] sm:$0xff]  ;;  %3001 = vst.msk [vmem:[#allocation3 + $0x38] sm:$0x3] %vm2994_vm11, %v5457_v1 }
  0x45   : > { %v679_v3 = vld [vmem:[#allocation2 + $0xd9] sm:$0xff]  ;;  %v441_v22 = vld [vmem:[#allocation2 + $0x8] sm:$0xff]  ;;  %v586_v30 = vld [vmem:[#allocation2 + $0xf1] sm:$0xff]  ;;  %3003 = vst.msk [vmem:[#allocation3 + $0x48] sm:$0x3] %vm2994_vm11, %v5457_v1 }
  0x46   : > { %v711_v9 = vld [vmem:[#allocation2 + $0xda] sm:$0xff]  ;;  %3005 = vst.msk [vmem:[#allocation3 + $0x58] sm:$0x3] %vm2994_vm11, %v5457_v1  ;;  %3007 = vst.msk [vmem:[#allocation3 + $0x68] sm:$0x3] %vm2994_vm11, %v5457_v1 }
  0x47   : > { %4726 = vrot.lane.b32.xlu1 %v4725_v52, %s5464_s24  ;;  %v555_v18 = vld [vmem:[#allocation2 + $0xf8] sm:$0xff]  ;;  %v440_v23 = vld [vmem:[#allocation2] sm:$0xff]  ;;  %3009 = vst.msk [vmem:[#allocation3 + $0x78] sm:$0x3] %vm2994_vm11, %v5457_v1  ;;  %3011 = vst.msk [vmem:[#allocation3 + $0x88] sm:$0x3] %vm2994_vm11, %v5457_v1 }
  0x48   : > { %4721 = vrot.lane.b32.xlu0 %v4695_v40, %s5464_s24  ;;  %v587_v33 = vld [vmem:[#allocation2 + $0xf9] sm:$0xff]  ;;  %3013 = vst.msk [vmem:[#allocation3 + $0x98] sm:$0x3] %vm2994_vm11, %v5457_v1 }
  0x49   : > { %v5890_v54 = vpack.i.bf16 %v587_v33, %v586_v30 }
  0x4b   : > { %4736 = vrot.lane.b32.xlu1 %v4695_v40, %s5459_s13  ;;  %v675_v40 = vld [vmem:[#allocation2 + $0xa9] sm:$0xff] }
  0x4c   : > { %4731 = vrot.lane.b32.xlu0 %v5700_v43, %s5465_s25  ;;  %v4885_v42 = vpack.i.bf16 %v676_v41, %v675_v40 }
  0x4f   : > { %4746 = vrot.lane.b32.xlu1 %v4725_v52, %s5459_s13 }
  0x50   : > { %4741 = vrot.lane.b32.xlu0 %v4740_v60, %s5465_s25 }
  0x53   : > { %4756 = vrot.lane.b32.xlu1 %v4740_v60, %s5458_s12 }
  0x54   : > { %4751 = vrot.lane.b32.xlu0 %v5700_v43, %s5458_s12  ;;  %v707_v43 = vld [vmem:[#allocation2 + $0xaa] sm:$0xff] }
  0x57   : > { %4766 = vrot.lane.b32.xlu1 %v4765_v2, %s5460_s14 }
  0x58   : > { %4761 = vrot.lane.b32.xlu0 %v4715_v46, %s5460_s14  ;;  %v708_v46 = vld [vmem:[#allocation2 + $0xb2] sm:$0xff] }
  0x59   : > { %v4900_v47 = vpack.i.bf16 %v708_v46, %v707_v43  ;;  %v651_v43 = vld [vmem:[#allocation2 + $0x108] sm:$0xff]  ;;  %v652_v46 = vld [vmem:[#allocation2 + $0x110] sm:$0xff] }
  0x5a   : > { %v5898_v56 = vpack.i.bf16 %v652_v46, %v651_v43 }
  0x5b   : > { %4776 = vrot.lane.b32.xlu1 %v4775_v5, %s5461_s15 }
  0x5c   : > { %4771 = vrot.lane.b32.xlu0 %v4725_v52, %s5461_s15  ;;  %v4925_v52 = vpack.i.bf16 %v551_v51, %v550_v50 }
  0x5f   : > { %4786 = vrot.lane.b32.xlu1 %v4785_v10, %s5462_s16 }
  0x60   : > { %4781 = vrot.lane.b32.xlu0 %v4740_v60, %s5462_s16  ;;  %v648_v60 = vld [vmem:[#allocation2 + $0xe0] sm:$0xff] }
  0x61   : > { %v5834_v0 = vpack.i.bf16 %v648_v60, %v647_v59 }
  0x63   : > { %4796 = vrot.lane.b32.xlu1 %v4795_v13, %s5463_s19 }
  0x64   : > { %4791 = vrot.lane.b32.xlu0 %v4765_v2, %s5463_s19 }
  0x67   : > { %4806 = vrot.lane.b32.xlu1 %v4805_v16, %s5464_s24 }
  0x68   : > { %4801 = vrot.lane.b32.xlu0 %v4775_v5, %s5464_s24 }
  0x6b   : > { %4816 = vrot.lane.b32.xlu1 %v4775_v5, %s5459_s13  ;;  %v5839_v5 = vpack.i.bf16 %v680_v4, %v679_v3 }
  0x6c   : > { %4811 = vrot.lane.b32.xlu0 %v4785_v10, %s5465_s25 }
  0x6f   : > { %4826 = vrot.lane.b32.xlu1 %v4805_v16, %s5459_s13 }
  0x70   : > { %4821 = vrot.lane.b32.xlu0 %v4820_v19, %s5465_s25 }
  0x73   : > { %4836 = vrot.lane.b32.xlu1 %v4820_v19, %s5458_s12 }
  0x74   : > { %4831 = vrot.lane.b32.xlu0 %v4785_v10, %s5458_s12  ;;  %v712_v10 = vld [vmem:[#allocation2 + $0xe2] sm:$0xff] }
  0x75   : > { %v5853_v14 = vpack.i.bf16 %v712_v10, %v711_v9 }
  0x77   : > { %4846 = vrot.lane.b32.xlu1 %v4845_v24, %s5460_s14 }
  0x78   : > { %4841 = vrot.lane.b32.xlu0 %v4795_v13, %s5460_s14 }
  0x7b   : > { %4856 = vrot.lane.b32.xlu1 %v4855_v27, %s5461_s15 }
  0x7c   : > { %4851 = vrot.lane.b32.xlu0 %v4805_v16, %s5461_s15 }
  0x7f   : > { %4866 = vrot.lane.b32.xlu1 %v4865_v36, %s5462_s16 }
  0x80   : > { %4861 = vrot.lane.b32.xlu0 %v4820_v19, %s5462_s16 }
  0x83   : > { %4876 = vrot.lane.b32.xlu1 %v4875_v39, %s5463_s19 }
  0x84   : > { %4871 = vrot.lane.b32.xlu0 %v4845_v24, %s5463_s19 }
  0x87   : > { %4886 = vrot.lane.b32.xlu1 %v4885_v42, %s5464_s24 }
  0x88   : > { %4881 = vrot.lane.b32.xlu0 %v4855_v27, %s5464_s24 }
  0x8b   : > { %4896 = vrot.lane.b32.xlu1 %v4855_v27, %s5459_s13  ;;  %v5832_v63 = vpop.permute.xlu1 %4666  ;;  %v5869_v27 = vpack.i.bf16 %v555_v18, %v554_v17 }
  0x8c   : > { %4891 = vrot.lane.b32.xlu0 %v4865_v36, %s5465_s25  ;;  %v4662_v2 = vpop.permute.xlu0 %4661  ;;  %v4669_v28 = vunpack.i.h.bf16 %v5832_v63  ;;  %v4668_v29 = vunpack.i.l.bf16 %v5832_v63 }
  0x8d   : > { %v4664_v19 = vunpack.i.h.bf16 %v4662_v2  ;;  %v4663_v20 = vunpack.i.l.bf16 %v4662_v2 }
  0x8f   : > { %4906 = vrot.lane.b32.xlu1 %v4885_v42, %s5459_s13  ;;  %v1754_v37 = vsel %vm319_vm0, %v441_v22, %v4664_v19  ;;  %v1753_v38 = vsel %vm319_vm0, %v440_v23, %v4663_v20 }
  0x90   : > { %4901 = vrot.lane.b32.xlu0 %v4900_v47, %s5465_s25 }
  0x93   : > { %4916 = vrot.lane.b32.xlu1 %v4900_v47, %s5458_s12 }
  0x94   : > { %4911 = vrot.lane.b32.xlu0 %v4865_v36, %s5458_s12  ;;  %v618_v36 = vld [vmem:[#allocation2 + $0xf2] sm:$0xff] }
  0x97   : > { %4926 = vrot.lane.b32.xlu1 %v4925_v52, %s5460_s14 }
  0x98   : > { %4921 = vrot.lane.b32.xlu0 %v4875_v39, %s5460_s14 }
  0x9b   : > { %4936 = vrot.lane.b32.xlu1 %v4935_v55, %s5461_s15 }
  0x9c   : > { %4931 = vrot.lane.b32.xlu0 %v4885_v42, %s5461_s15  ;;  %v619_v42 = vld [vmem:[#allocation2 + $0xfa] sm:$0xff] }
  0x9f   : > { %4946 = vrot.lane.b32.xlu1 %v4945_v58, %s5462_s16 }
  0xa0   : > { %4941 = vrot.lane.b32.xlu0 %v4900_v47, %s5462_s16 }
  0xa3   : > { %4956 = vrot.lane.b32.xlu1 %v5834_v0, %s5463_s19 }
  0xa4   : > { %4951 = vrot.lane.b32.xlu0 %v4925_v52, %s5463_s19 }
  0xa5   : > { %v5842_v6 = vpop.permute.xlu1 %4676 }
  0xa6   : > { %v4672_v7 = vpop.permute.xlu0 %4671  ;;  %v4679_v39 = vunpack.i.h.bf16 %v5842_v6  ;;  %v4678_v40 = vunpack.i.l.bf16 %v5842_v6 }
  0xa7   : > { %4966 = vrot.lane.b32.xlu1 %v5839_v5, %s5464_s24  ;;  %v4674_v24 = vunpack.i.h.bf16 %v4672_v7  ;;  %v4673_v25 = vunpack.i.l.bf16 %v4672_v7 }
  0xa8   : > { %4961 = vrot.lane.b32.xlu0 %v4935_v55, %s5464_s24 }
  0xa9   : > { %v5847_v8 = vpop.permute.xlu1 %4686  ;;  %v1755_v47 = vsel %vm319_vm0, %v5685_v32, %v4673_v25  ;;  %v1756_v48 = vsel %vm319_vm0, %v5689_v35, %v4674_v24  ;;  %v1786_v32 = vsel %vm1785_vm4, %v1753_v38, %v4668_v29  ;;  %v5896_v35 = vpack.i.bf16 %v619_v42, %v618_v36  ;;  %v683_v36 = vld [vmem:[#allocation2 + $0x109] sm:$0xff] }
  0xaa   : > { %v5849_v13 = vpop.permute.xlu0 %4681  ;;  %v4689_v49 = vunpack.i.h.bf16 %v5847_v8  ;;  %v4688_v50 = vunpack.i.l.bf16 %v5847_v8  ;;  %v1788_v57 = vsel %vm1785_vm4, %v1755_v47, %v4678_v40 }
  0xab   : > { %4976 = vrot.lane.b32.xlu1 %v4935_v55, %s5459_s13  ;;  %v4684_v52 = vunpack.i.h.bf16 %v5849_v13  ;;  %v4683_v53 = vunpack.i.l.bf16 %v5849_v13  ;;  %v1787_v55 = vsel %vm1785_vm4, %v1754_v37, %v4669_v28  ;;  %v684_v37 = vld [vmem:[#allocation2 + $0x111] sm:$0xff] }
  0xac   : > { %4971 = vrot.lane.b32.xlu0 %v4945_v58, %s5465_s25  ;;  %v1821_v2 = vsel %vm1818_vm5, %v1788_v57, %v4688_v50 }
  0xad   : > { %v5855_v15 = vpop.permute.xlu1 %4696  ;;  %v1820_v7 = vsel %vm1818_vm5, %v1787_v55, %v4684_v52  ;;  %v1819_v8 = vsel %vm1818_vm5, %v1786_v32, %v4683_v53  ;;  %v5942_v52 = vpack.i.bf16 %v684_v37, %v683_v36 }
  0xae   : > { %v5857_v16 = vpop.permute.xlu0 %4691  ;;  %v4699_v13 = vunpack.i.h.bf16 %v5855_v15 }
  0xaf   : > { %4986 = vrot.lane.b32.xlu1 %v5839_v5, %s5459_s13  ;;  %v4694_v59 = vunpack.i.h.bf16 %v5857_v16  ;;  %v4693_v60 = vunpack.i.l.bf16 %v5857_v16  ;;  %v4698_v16 = vunpack.i.l.bf16 %v5855_v15 }
  0xb0   : > { %4981 = vrot.lane.b32.xlu0 %v5853_v14, %s5465_s25 }
  0xb1   : > { %v5863_v21 = vpop.permute.xlu1 %4706  ;;  %v1852_v19 = vsel %vm1851_vm6, %v1819_v8, %v4693_v60  ;;  %v1853_v20 = vsel %vm1851_vm6, %v1820_v7, %v4694_v59  ;;  %v1854_v42 = vsel %vm1851_vm6, %v1821_v2, %v4698_v16  ;;  %v559_v16 = vld [vmem:[#allocation2 + $0x128] sm:$0xff] }
  0xb2   : > { %v5865_v26 = vpop.permute.xlu0 %4701  ;;  %v4709_v22 = vunpack.i.h.bf16 %v5863_v21  ;;  %v4708_v23 = vunpack.i.l.bf16 %v5863_v21 }
  0xb3   : > { %4996 = vrot.lane.b32.xlu1 %v5853_v14, %s5458_s12  ;;  %v4703_v4 = vunpack.i.l.bf16 %v5865_v26 }
  0xb4   : > { %4991 = vrot.lane.b32.xlu0 %v4945_v58, %s5458_s12  ;;  %v1789_v58 = vsel %vm1785_vm4, %v1756_v48, %v4679_v39 }
  0xb5   : > { %v5878_v41 = vpop.permute.xlu1 %4716  ;;  %v1822_v3 = vsel %vm1818_vm5, %v1789_v58, %v4689_v49  ;;  %v1885_v25 = vsel %vm1884_vm7, %v1852_v19, %v4703_v4  ;;  %v1887_v49 = vsel %vm1884_vm7, %v1854_v42, %v4708_v23  ;;  %v591_v19 = vld [vmem:[#allocation2 + $0x129] sm:$0xff] }
  0xb6   : > { %v4712_v51 = vpop.permute.xlu0 %4711  ;;  %v4719_v15 = vunpack.i.h.bf16 %v5878_v41  ;;  %v4718_v28 = vunpack.i.l.bf16 %v5878_v41  ;;  %v1855_v43 = vsel %vm1851_vm6, %v1822_v3, %v4699_v13  ;;  %v558_v13 = vld [vmem:[#allocation2 + $0x120] sm:$0xff] }
  0xb7   : > { %5006 = vrot.lane.b32.xlu1 %v5869_v27, %s5460_s14  ;;  %v4714_v9 = vunpack.i.h.bf16 %v4712_v51  ;;  %v4713_v10 = vunpack.i.l.bf16 %v4712_v51  ;;  %v1888_v50 = vsel %vm1884_vm7, %v1855_v43, %v4709_v22 }
  0xb8   : > { %5001 = vrot.lane.b32.xlu0 %v5834_v0, %s5460_s14  ;;  %v4704_v0 = vunpack.i.h.bf16 %v5865_v26  ;;  %v1920_v53 = vsel %vm1917_vm8, %v1887_v49, %v4718_v28  ;;  %v1921_v32 = vsel %vm1917_vm8, %v1888_v50, %v4719_v15  ;;  %v655_v15 = vld [vmem:[#allocation2 + $0x138] sm:$0xff]  ;;  %v656_v28 = vld [vmem:[#allocation2 + $0x140] sm:$0xff] }
  0xb9   : > { %v4727_v63 = vpop.permute.xlu1 %4726  ;;  %v1918_v33 = vsel %vm1917_vm8, %v1885_v25, %v4713_v10  ;;  %v5982_v25 = vpack.i.bf16 %v559_v16, %v558_v13  ;;  %v5994_v43 = vpack.i.bf16 %v656_v28, %v655_v15 }
  0xba   : > { %v4722_v6 = vpop.permute.xlu0 %4721  ;;  %v1886_v26 = vsel %vm1884_vm7, %v1853_v20, %v4704_v0  ;;  %v4729_v38 = vunpack.i.h.bf16 %v4727_v63  ;;  %v4728_v39 = vunpack.i.l.bf16 %v4727_v63  ;;  %v622_v20 = vld [vmem:[#allocation2 + $0x122] sm:$0xff] }
  0xbb   : > { %5016 = vrot.lane.b32.xlu1 %v5890_v54, %s5461_s15  ;;  %v4724_v17 = vunpack.i.h.bf16 %v4722_v6  ;;  %v4723_v18 = vunpack.i.l.bf16 %v4722_v6  ;;  %v1919_v21 = vsel %vm1917_vm8, %v1886_v26, %v4714_v9  ;;  %v715_v6 = vld [vmem:[#allocation2 + $0x10a] sm:$0xff] }
  0xbc   : > { %5011 = vrot.lane.b32.xlu0 %v5839_v5, %s5461_s15  ;;  %v1953_v58 = vsel %vm1950_vm9, %v1920_v53, %v4728_v39  ;;  %v1954_v59 = vsel %vm1950_vm9, %v1921_v32, %v4729_v38  ;;  %v623_v26 = vld [vmem:[#allocation2 + $0x12a] sm:$0xff] }
  0xbd   : > { %v5920_v24 = vpop.permute.xlu1 %4736  ;;  %v1951_v40 = vsel %vm1950_vm9, %v1918_v33, %v4723_v18  ;;  %v1952_v41 = vsel %vm1950_vm9, %v1919_v21, %v4724_v17  ;;  %v590_v18 = vld [vmem:[#allocation2 + $0x121] sm:$0xff]  ;;  %v5992_v42 = vpack.i.bf16 %v623_v26, %v622_v20 }
  0xbe   : > { %v4732_v29 = vpop.permute.xlu0 %4731  ;;  %v5990_v38 = vpack.i.bf16 %v591_v19, %v590_v18  ;;  %v688_v26 = vld [vmem:[#allocation2 + $0x141] sm:$0xff] }
  0xbf   : > { %v4734_v5 = vunpack.i.h.bf16 %v4732_v29  ;;  %v4733_v30 = vunpack.i.l.bf16 %v4732_v29  ;;  %5026 = vrot.lane.b32.xlu1 %v5896_v35, %s5462_s16  ;;  %v4739_v29 = vunpack.i.h.bf16 %v5920_v24 }
  0xc0   : > { %5021 = vrot.lane.b32.xlu0 %v5853_v14, %s5462_s16 }
  0xc1   : > { %v5936_v46 = vpop.permute.xlu1 %4746  ;;  %v1984_v47 = vsel %vm1983_vm2, %v1951_v40, %v4733_v30  ;;  %v1985_v48 = vsel %vm1983_vm2, %v1952_v41, %v4734_v5  ;;  %v4738_v5 = vunpack.i.l.bf16 %v5920_v24 }
  0xc2   : > { %v4742_v51 = vpop.permute.xlu0 %4741  ;;  %v2016_v14 = vpack.c.bf16 %v1985_v48, %v1984_v47  ;;  %v4749_v22 = vunpack.i.h.bf16 %v5936_v46  ;;  %v4748_v23 = vunpack.i.l.bf16 %v5936_v46  ;;  %v1758_v48 = vsel %vm319_vm0, %v5687_v34, %v4739_v29 }
  0xc3   : > { %v4744_v55 = vunpack.i.h.bf16 %v4742_v51  ;;  %v4743_v57 = vunpack.i.l.bf16 %v4742_v51  ;;  %5036 = vrot.lane.b32.xlu1 %v5898_v56, %s5463_s19  ;;  %v1757_v49 = vsel %vm319_vm0, %v5683_v31, %v4738_v5 }
  0xc4   : > { %5031 = vrot.lane.b32.xlu0 %v5869_v27, %s5463_s19  ;;  %4595 = vmatprep.mubr.msk.bf16.mxu0 %vm2059_vm10, %v2016_v14  ;;  %v716_v27 = vld [vmem:[#allocation2 + $0x112] sm:$0xff]  ;;  %v1760_v24 = vsel %vm319_vm0, %v5705_v45, %v4749_v22  ;;  %v1759_v46 = vsel %vm319_vm0, %v5703_v44, %v4748_v23 }
  0xc5   : > { %v1986_v60 = vsel %vm1983_vm2, %v1953_v58, %v4743_v57  ;;  %v1987_v63 = vsel %vm1983_vm2, %v1954_v59, %v4744_v55  ;;  %v4757_v2 = vpop.permute.xlu1 %4756  ;;  %v5964_v8 = vpack.i.bf16 %v716_v27, %v715_v6 }
  0xc6   : > { %v4752_v3 = vpop.permute.xlu0 %4751  ;;  %v2017_v0 = vpack.c.bf16 %v1987_v63, %v1986_v60  ;;  %v4759_v30 = vunpack.i.h.bf16 %v4757_v2  ;;  %v4758_v33 = vunpack.i.l.bf16 %v4757_v2 }
  0xc7   : > { %5046 = vrot.lane.b32.xlu1 %v5942_v52, %s5464_s24  ;;  %v4754_v21 = vunpack.i.h.bf16 %v4752_v3  ;;  %v4753_v36 = vunpack.i.l.bf16 %v4752_v3 }
  0xc8   : > { %5041 = vrot.lane.b32.xlu0 %v5890_v54, %s5464_s24  ;;  %4596 = vmatmul.mubr.msk.bf16.vlgmr.msra.gmra.mxu0 %vm2059_vm10, %v2017_v0  ;;  %v1792_v50 = vsel %vm1785_vm4, %v1759_v46, %v4758_v33  ;;  %v1793_v51 = vsel %vm1785_vm4, %v1760_v24, %v4759_v30 }
  0xc9   : > { %v4767_v4 = vpop.permute.xlu1 %4766  ;;  %v1791_v44 = vsel %vm1785_vm4, %v1758_v48, %v4754_v21  ;;  %v1790_v45 = vsel %vm1785_vm4, %v1757_v49, %v4753_v36 }
  0xca   : > { %v4762_v7 = vpop.permute.xlu0 %4761  ;;  %v4769_v39 = vunpack.i.h.bf16 %v4767_v4  ;;  %v4768_v40 = vunpack.i.l.bf16 %v4767_v4 }
  0xcb   : > { %5056 = vrot.lane.b32.xlu1 %v5890_v54, %s5459_s13  ;;  %v4763_v47 = vunpack.i.l.bf16 %v4762_v7 }
  0xcc   : > { %5051 = vrot.lane.b32.xlu0 %v5896_v35, %s5465_s25  ;;  %v1825_v34 = vsel %vm1818_vm5, %v1792_v50, %v4768_v40  ;;  %v1826_v31 = vsel %vm1818_vm5, %v1793_v51, %v4769_v39 }
  0xcd   : > { %v5966_v9 = vpop.permute.xlu1 %4776 }
  0xce   : > { %v5968_v10 = vpop.permute.xlu0 %4771  ;;  %v4779_v2 = vunpack.i.h.bf16 %v5966_v9  ;;  %v4778_v3 = vunpack.i.l.bf16 %v5966_v9 }
  0xcf   : > { %5066 = vrot.lane.b32.xlu1 %v5942_v52, %s5459_s13  ;;  %v4774_v14 = vunpack.i.h.bf16 %v5968_v10  ;;  %v4773_v53 = vunpack.i.l.bf16 %v5968_v10 }
  0xd0   : > { %5061 = vrot.lane.b32.xlu0 %v5964_v8, %s5465_s25  ;;  %v1858_v30 = vsel %vm1851_vm6, %v1825_v34, %v4778_v3  ;;  %v1859_v33 = vsel %vm1851_vm6, %v1826_v31, %v4779_v2  ;;  %v719_v34 = vld [vmem:[#allocation2 + $0x13a] sm:$0xff]  ;;  %v626_v3 = vld [vmem:[#allocation2 + $0x152] sm:$0xff] }
  0xd1   : > { %v5974_v17 = vpop.permute.xlu1 %4786  ;;  %v595_v2 = vld [vmem:[#allocation2 + $0x159] sm:$0xff] }
  0xd2   : > { %v5976_v54 = vpop.permute.xlu0 %4781  ;;  %v4788_v10 = vunpack.i.l.bf16 %v5974_v17 }
  0xd3   : > { %5076 = vrot.lane.b32.xlu1 %v5964_v8, %s5458_s12  ;;  %v4784_v55 = vunpack.i.h.bf16 %v5976_v54  ;;  %v4783_v57 = vunpack.i.l.bf16 %v5976_v54 }
  0xd4   : > { %5071 = vrot.lane.b32.xlu0 %v5896_v35, %s5458_s12  ;;  %v4764_v35 = vunpack.i.h.bf16 %v4762_v7  ;;  %v4789_v7 = vunpack.i.h.bf16 %v5974_v17  ;;  %v687_v17 = vld [vmem:[#allocation2 + $0x139] sm:$0xff]  ;;  %v1891_v39 = vsel %vm1884_vm7, %v1858_v30, %v4788_v10  ;;  %v660_v10 = vld [vmem:[#allocation2 + $0x170] sm:$0xff] }
  0xd5   : > { %v5988_v37 = vpop.permute.xlu1 %4796  ;;  %v6052_v46 = vpack.i.bf16 %v688_v26, %v687_v17 }
  0xd6   : > { %v4792_v41 = vpop.permute.xlu0 %4791  ;;  %v1824_v59 = vsel %vm1818_vm5, %v1791_v44, %v4764_v35  ;;  %v4799_v9 = vunpack.i.h.bf16 %v5988_v37  ;;  %v4798_v18 = vunpack.i.l.bf16 %v5988_v37  ;;  %v1892_v40 = vsel %vm1884_vm7, %v1859_v33, %v4789_v7  ;;  %v659_v7 = vld [vmem:[#allocation2 + $0x168] sm:$0xff] }
  0xd7   : > { %5086 = vrot.lane.b32.xlu1 %v5982_v25, %s5460_s14  ;;  %v4794_v60 = vunpack.i.h.bf16 %v4792_v41  ;;  %v4793_v63 = vunpack.i.l.bf16 %v4792_v41  ;;  %v1857_v27 = vsel %vm1851_vm6, %v1824_v59, %v4774_v14  ;;  %v563_v59 = vld [vmem:[#allocation2 + $0x158] sm:$0xff] }
  0xd8   : > { %5081 = vrot.lane.b32.xlu0 %v5898_v56, %s5460_s14  ;;  %v1823_v56 = vsel %vm1818_vm5, %v1790_v45, %v4763_v47  ;;  %v1890_v54 = vsel %vm1884_vm7, %v1857_v27, %v4784_v55  ;;  %v1925_v35 = vsel %vm1917_vm8, %v1892_v40, %v4799_v9  ;;  %v627_v27 = vld [vmem:[#allocation2 + $0x15a] sm:$0xff] }
  0xd9   : > { %v4807_v32 = vpop.permute.xlu1 %4806  ;;  %v1856_v6 = vsel %vm1851_vm6, %v1823_v56, %v4773_v53  ;;  %v1923_v20 = vsel %vm1917_vm8, %v1890_v54, %v4794_v60  ;;  %v562_v56 = vld [vmem:[#allocation2 + $0x150] sm:$0xff] }
  0xda   : > { %v4802_v58 = vpop.permute.xlu0 %4801  ;;  %v1889_v16 = vsel %vm1884_vm7, %v1856_v6, %v4783_v57  ;;  %v4809_v15 = vunpack.i.h.bf16 %v4807_v32  ;;  %v4808_v28 = vunpack.i.l.bf16 %v4807_v32  ;;  %v6092_v6 = vpack.i.bf16 %v563_v59, %v562_v56 }
  0xdb   : > { %5096 = vrot.lane.b32.xlu1 %v5990_v38, %s5461_s15  ;;  %v4804_v0 = vunpack.i.h.bf16 %v4802_v58  ;;  %v4803_v4 = vunpack.i.l.bf16 %v4802_v58 }
  0xdc   : > { %5091 = vrot.lane.b32.xlu0 %v5942_v52, %s5461_s15  ;;  %v1922_v52 = vsel %vm1917_vm8, %v1889_v16, %v4793_v63  ;;  %v1958_v50 = vsel %vm1950_vm9, %v1925_v35, %v4809_v15  ;;  %v594_v63 = vld [vmem:[#allocation2 + $0x151] sm:$0xff]  ;;  %v6102_v15 = vpack.i.bf16 %v627_v27, %v626_v3 }
  0xdd   : > { %v6030_v13 = vpop.permute.xlu1 %4816  ;;  %v1955_v29 = vsel %vm1950_vm9, %v1922_v52, %v4803_v4  ;;  %v1956_v5 = vsel %vm1950_vm9, %v1923_v20, %v4804_v0 }
  0xde   : > { %v4812_v19 = vpop.permute.xlu0 %4811  ;;  %v4819_v16 = vunpack.i.h.bf16 %v6030_v13  ;;  %v4818_v54 = vunpack.i.l.bf16 %v6030_v13 }
  0xdf   : > { %v4814_v22 = vunpack.i.h.bf16 %v4812_v19  ;;  %v4813_v23 = vunpack.i.l.bf16 %v4812_v19  ;;  %5106 = vrot.lane.b32.xlu1 %v5992_v42, %s5462_s16 }
  0xe0   : > { %5101 = vrot.lane.b32.xlu0 %v5964_v8, %s5462_s16  ;;  %v1924_v8 = vsel %vm1917_vm8, %v1891_v39, %v4798_v18  ;;  %v1762_v30 = vsel %vm319_vm0, %v5760_v62, %v4819_v16  ;;  %v1761_v33 = vsel %vm319_vm0, %v5758_v61, %v4818_v54 }
  0xe1   : > { %v1988_v21 = vsel %vm1983_vm2, %v1955_v29, %v4813_v23  ;;  %v1989_v36 = vsel %vm1983_vm2, %v1956_v5, %v4814_v22  ;;  %v6048_v37 = vpop.permute.xlu1 %4826  ;;  %v1957_v49 = vsel %vm1950_vm9, %v1924_v8, %v4808_v28  ;;  %v6100_v22 = vpack.i.bf16 %v595_v2, %v594_v63  ;;  %v692_v2 = vld [vmem:[#allocation2 + $0x171] sm:$0xff] }
  0xe2   : > { %v4822_v41 = vpop.permute.xlu0 %4821  ;;  %v2018_v24 = vpack.c.bf16 %v1989_v36, %v1988_v21  ;;  %v4829_v0 = vunpack.i.h.bf16 %v6048_v37  ;;  %v4828_v4 = vunpack.i.l.bf16 %v6048_v37  ;;  %v6104_v28 = vpack.i.bf16 %v660_v10, %v659_v7 }
  0xe3   : > { %v4824_v47 = vunpack.i.h.bf16 %v4822_v41  ;;  %v4823_v48 = vunpack.i.l.bf16 %v4822_v41  ;;  %5116 = vrot.lane.b32.xlu1 %v5994_v43, %s5463_s19 }
  0xe4   : > { %5111 = vrot.lane.b32.xlu0 %v5982_v25, %s5463_s19  ;;  %4599 = vmatprep.mubr.msk.bf16.mxu0 %vm2059_vm10, %v2018_v24  ;;  %v720_v25 = vld [vmem:[#allocation2 + $0x142] sm:$0xff]  ;;  %v1764_v13 = vsel %vm319_vm0, %v5783_v12, %v4829_v0  ;;  %v1763_v29 = vsel %vm319_vm0, %v5781_v11, %v4828_v4 }
  0xe5   : > { %v1991_v51 = vsel %vm1983_vm2, %v1958_v50, %v4824_v47  ;;  %v1990_v44 = vsel %vm1983_vm2, %v1957_v49, %v4823_v48  ;;  %v4837_v45 = vpop.permute.xlu1 %4836  ;;  %v6074_v55 = vpack.i.bf16 %v720_v25, %v719_v34 }
  0xe6   : > { %v4832_v14 = vpop.permute.xlu0 %4831  ;;  %v2019_v53 = vpack.c.bf16 %v1991_v51, %v1990_v44  ;;  %v4839_v9 = vunpack.i.h.bf16 %v4837_v45  ;;  %v4838_v18 = vunpack.i.l.bf16 %v4837_v45 }
  0xe7   : > { %5126 = vrot.lane.b32.xlu1 %v6052_v46, %s5464_s24  ;;  %v4834_v19 = vunpack.i.h.bf16 %v4832_v14  ;;  %v4833_v52 = vunpack.i.l.bf16 %v4832_v14 }
  0xe8   : > { %5121 = vrot.lane.b32.xlu0 %v5990_v38, %s5464_s24  ;;  %4600 = vmatmul.mubr.msk.bf16.gmra.mxu0 %vm2059_vm10, %v2019_v53  ;;  %v1796_v21 = vsel %vm1785_vm4, %v1763_v29, %v4838_v18  ;;  %v1797_v36 = vsel %vm1785_vm4, %v1764_v13, %v4839_v9 }
  0xe9   : > { %v4847_v32 = vpop.permute.xlu1 %4846  ;;  %v1795_v11 = vsel %vm1785_vm4, %v1762_v30, %v4834_v19  ;;  %v1794_v12 = vsel %vm1785_vm4, %v1761_v33, %v4833_v52 }
  0xea   : > { %v4842_v31 = vpop.permute.xlu0 %4841  ;;  %v4849_v23 = vunpack.i.h.bf16 %v4847_v32  ;;  %v4848_v17 = vunpack.i.l.bf16 %v4847_v32 }
  0xeb   : > { %5136 = vrot.lane.b32.xlu1 %v5990_v38, %s5459_s13  ;;  %v4843_v5 = vunpack.i.l.bf16 %v4842_v31 }
  0xec   : > { %5131 = vrot.lane.b32.xlu0 %v5992_v42, %s5465_s25  ;;  %v1829_v62 = vsel %vm1818_vm5, %v1796_v21, %v4848_v17  ;;  %v1830_v61 = vsel %vm1818_vm5, %v1797_v36, %v4849_v23 }
  0xed   : > { %v6076_v57 = vpop.permute.xlu1 %4856 }
  0xee   : > { %v6078_v58 = vpop.permute.xlu0 %4851  ;;  %v4859_v49 = vunpack.i.h.bf16 %v6076_v57  ;;  %v4858_v50 = vunpack.i.l.bf16 %v6076_v57 }
  0xef   : > { %5146 = vrot.lane.b32.xlu1 %v6052_v46, %s5459_s13  ;;  %v4854_v37 = vunpack.i.h.bf16 %v6078_v58  ;;  %v4853_v39 = vunpack.i.l.bf16 %v6078_v58 }
  0xf0   : > { %5141 = vrot.lane.b32.xlu0 %v6074_v55, %s5465_s25  ;;  %v1862_v7 = vsel %vm1851_vm6, %v1829_v62, %v4858_v50  ;;  %v1863_v10 = vsel %vm1851_vm6, %v1830_v61, %v4859_v49  ;;  %v566_v61 = vld [vmem:[#allocation2 + $0x180] sm:$0xff]  ;;  %v453_v49 = vld [vmem:[#allocation2 + $0x98] sm:$0xff] }
  0xf1   : > { %v6084_v60 = vpop.permute.xlu1 %4866 }
  0xf2   : > { %v6086_v38 = vpop.permute.xlu0 %4861  ;;  %v4869_v53 = vunpack.i.h.bf16 %v6084_v60  ;;  %v4868_v32 = vunpack.i.l.bf16 %v6084_v60  ;;  %v691_v60 = vld [vmem:[#allocation2 + $0x169] sm:$0xff] }
  0xf3   : > { %5156 = vrot.lane.b32.xlu1 %v6074_v55, %s5458_s12  ;;  %v4864_v41 = vunpack.i.h.bf16 %v6086_v38  ;;  %v4863_v24 = vunpack.i.l.bf16 %v6086_v38  ;;  %v6162_v23 = vpack.i.bf16 %v692_v2, %v691_v60 }
  0xf4   : > { %5151 = vrot.lane.b32.xlu0 %v5992_v42, %s5458_s12  ;;  %v4844_v42 = vunpack.i.h.bf16 %v4842_v31  ;;  %v1895_v18 = vsel %vm1884_vm7, %v1862_v7, %v4868_v32  ;;  %v1896_v19 = vsel %vm1884_vm7, %v1863_v10, %v4869_v53  ;;  %v454_v32 = vld [vmem:[#allocation2 + $0xa8] sm:$0xff] }
  0xf5   : > { %v6098_v20 = vpop.permute.xlu1 %4876 }
  0xf6   : > { %v4872_v26 = vpop.permute.xlu0 %4871  ;;  %v1828_v35 = vsel %vm1818_vm5, %v1795_v11, %v4844_v42  ;;  %v4879_v57 = vunpack.i.h.bf16 %v6098_v20  ;;  %v4878_v58 = vunpack.i.l.bf16 %v6098_v20 }
  0xf7   : > { %5166 = vrot.lane.b32.xlu1 %v6092_v6, %s5460_s14  ;;  %v4874_v47 = vunpack.i.h.bf16 %v4872_v26  ;;  %v4873_v48 = vunpack.i.l.bf16 %v4872_v26  ;;  %v1861_v14 = vsel %vm1851_vm6, %v1828_v35, %v4854_v37  ;;  %v599_v35 = vld [vmem:[#allocation2 + $0x189] sm:$0xff] }
  0xf8   : > { %5161 = vrot.lane.b32.xlu0 %v5994_v43, %s5460_s14  ;;  %v1827_v43 = vsel %vm1818_vm5, %v1794_v12, %v4843_v5  ;;  %v1894_v31 = vsel %vm1884_vm7, %v1861_v14, %v4864_v41  ;;  %v1929_v17 = vsel %vm1917_vm8, %v1896_v19, %v4879_v57  ;;  %v723_v12 = vld [vmem:[#allocation2 + $0x16a] sm:$0xff]  ;;  %v6209_v14 = vld [vmem:[#allocation2 + $0x1a0] sm:$0xff] }
  0xf9   : > { %v4887_v40 = vpop.permute.xlu1 %4886  ;;  %v1860_v45 = vsel %vm1851_vm6, %v1827_v43, %v4853_v39  ;;  %v1927_v59 = vsel %vm1917_vm8, %v1894_v31, %v4874_v47  ;;  %v567_v41 = vld [vmem:[#allocation2 + $0x188] sm:$0xff] }
  0xfa   : > { %v4882_v8 = vpop.permute.xlu0 %4881  ;;  %v1893_v25 = vsel %vm1884_vm7, %v1860_v45, %v4863_v24  ;;  %v4889_v3 = vunpack.i.h.bf16 %v4887_v40  ;;  %v4888_v0 = vunpack.i.l.bf16 %v4887_v40  ;;  %v630_v47 = vld [vmem:[#allocation2 + $0x182] sm:$0xff]  ;;  %v6207_v45 = vld [vmem:[#allocation2 + $0x198] sm:$0xff] }
  0xfb   : > { %5176 = vrot.lane.b32.xlu1 %v6100_v22, %s5461_s15  ;;  %v4884_v51 = vunpack.i.h.bf16 %v4882_v8  ;;  %v4883_v44 = vunpack.i.l.bf16 %v4882_v8 }
  0xfc   : > { %5171 = vrot.lane.b32.xlu0 %v6052_v46, %s5461_s15  ;;  %v1926_v46 = vsel %vm1917_vm8, %v1893_v25, %v4873_v48  ;;  %v1962_v42 = vsel %vm1950_vm9, %v1929_v17, %v4889_v3  ;;  %v631_v48 = vld [vmem:[#allocation2 + $0x18a] sm:$0xff] }
  0xfd   : > { %v6140_v34 = vpop.permute.xlu1 %4896  ;;  %v1959_v4 = vsel %vm1950_vm9, %v1926_v46, %v4883_v44  ;;  %v1960_v27 = vsel %vm1950_vm9, %v1927_v59, %v4884_v51  ;;  %v6205_v44 = vpack.i.bf16 %v567_v41, %v566_v61  ;;  %v455_v25 = vld [vmem:[#allocation2 + $0xb0] sm:$0xff] }
  0xfe   : > { %v4892_v56 = vpop.permute.xlu0 %4891  ;;  %v4899_v8 = vunpack.i.h.bf16 %v6140_v34  ;;  %v4898_v53 = vunpack.i.l.bf16 %v6140_v34 }
  0xff   : > { %v4894_v38 = vunpack.i.h.bf16 %v4892_v56  ;;  %v4893_v63 = vunpack.i.l.bf16 %v4892_v56  ;;  %5186 = vrot.lane.b32.xlu1 %v6102_v15, %s5462_s16 }
 0x100   : > { %5181 = vrot.lane.b32.xlu0 %v6074_v55, %s5462_s16  ;;  %v1928_v55 = vsel %vm1917_vm8, %v1895_v18, %v4878_v58  ;;  %v452_v58 = vld [vmem:[#allocation2 + $0x90] sm:$0xff]  ;;  %v1766_v60 = vsel %vm319_vm0, %v453_v49, %v4899_v8 }
 0x101   : > { %v1992_v16 = vsel %vm1983_vm2, %v1959_v4, %v4893_v63  ;;  %v1993_v54 = vsel %vm1983_vm2, %v1960_v27, %v4894_v38  ;;  %v6158_v9 = vpop.permute.xlu1 %4906  ;;  %v1961_v29 = vsel %vm1950_vm9, %v1928_v55, %v4888_v0  ;;  %v6218_v63 = vpack.i.bf16 %v631_v48, %v630_v47 }
 0x102   : > { %v4902_v52 = vpop.permute.xlu0 %4901  ;;  %v2020_v20 = vpack.c.bf16 %v1993_v54, %v1992_v16  ;;  %v4909_v50 = vunpack.i.h.bf16 %v6158_v9  ;;  %v4908_v51 = vunpack.i.l.bf16 %v6158_v9  ;;  %v5275_v0 = vpack.i.bf16 %v6209_v14, %v6207_v45 }
 0x103   : > { %v4904_v26 = vunpack.i.h.bf16 %v4902_v52  ;;  %v4903_v13 = vunpack.i.l.bf16 %v4902_v52  ;;  %5196 = vrot.lane.b32.xlu1 %v6104_v28, %s5463_s19  ;;  %v1765_v10 = vsel %vm319_vm0, %v452_v58, %v4898_v53 }
 0x104   : > { %5191 = vrot.lane.b32.xlu0 %v6092_v6, %s5463_s19  ;;  %4603 = vmatprep.mubr.msk.bf16.mxu0 %vm2059_vm10, %v2020_v20  ;;  %v724_v6 = vld [vmem:[#allocation2 + $0x172] sm:$0xff]  ;;  %v1768_v4 = vsel %vm319_vm0, %v455_v25, %v4909_v50  ;;  %v696_v50 = vld [vmem:[#allocation2 + $0x1a1] sm:$0xff] }
 0x105   : > { %v1995_v5 = vsel %vm1983_vm2, %v1962_v42, %v4904_v26  ;;  %v1994_v30 = vsel %vm1983_vm2, %v1961_v29, %v4903_v13  ;;  %v4917_v33 = vpop.permute.xlu1 %4916  ;;  %v6186_v39 = vpack.i.bf16 %v724_v6, %v723_v12 }
 0x106   : > { %v4912_v21 = vpop.permute.xlu0 %4911  ;;  %v2021_v36 = vpack.c.bf16 %v1995_v5, %v1994_v30  ;;  %v4919_v31 = vunpack.i.h.bf16 %v4917_v33  ;;  %v4918_v57 = vunpack.i.l.bf16 %v4917_v33 }
 0x107   : > { %5206 = vrot.lane.b32.xlu1 %v6162_v23, %s5464_s24  ;;  %v4914_v56 = vunpack.i.h.bf16 %v4912_v21  ;;  %v4913_v46 = vunpack.i.l.bf16 %v4912_v21 }
 0x108   : > { %5201 = vrot.lane.b32.xlu0 %v6100_v22, %s5464_s24  ;;  %4604 = vmatmul.mubr.msk.bf16.gmra.mxu0 %vm2059_vm10, %v2021_v36  ;;  %v1801_v54 = vsel %vm1785_vm4, %v1768_v4, %v4919_v31 }
 0x109   : > { %v4927_v11 = vpop.permute.xlu1 %4926  ;;  %v1799_v18 = vsel %vm1785_vm4, %v1766_v60, %v4914_v56  ;;  %v1798_v19 = vsel %vm1785_vm4, %v1765_v10, %v4913_v46  ;;  %v728_v10 = vld [vmem:[#allocation2 + $0x1a2] sm:$0xff] }
 0x10a   : > { %v6180_v37 = vpop.permute.xlu0 %4921  ;;  %v4929_v2 = vunpack.i.h.bf16 %v4927_v11  ;;  %v4928_v34 = vunpack.i.l.bf16 %v4927_v11 }
 0x10b   : > { %5216 = vrot.lane.b32.xlu1 %v6100_v22, %s5459_s13  ;;  %v598_v22 = vld [vmem:[#allocation2 + $0x181] sm:$0xff]  ;;  %v4924_v27 = vunpack.i.h.bf16 %v6180_v37  ;;  %v4923_v7 = vunpack.i.l.bf16 %v6180_v37 }
 0x10c   : > { %5211 = vrot.lane.b32.xlu0 %v6102_v15, %s5465_s25  ;;  %v6216_v38 = vpack.i.bf16 %v599_v35, %v598_v22  ;;  %v1834_v26 = vsel %vm1818_vm5, %v1801_v54, %v4929_v2 }
 0x10d   : > { %v6188_v40 = vpop.permute.xlu1 %4936  ;;  %v1832_v5 = vsel %vm1818_vm5, %v1799_v18, %v4924_v27 }
 0x10e   : > { %v6190_v62 = vpop.permute.xlu0 %4931  ;;  %v4939_v30 = vunpack.i.h.bf16 %v6188_v40  ;;  %v4938_v21 = vunpack.i.l.bf16 %v6188_v40 }
 0x10f   : > { %5226 = vrot.lane.b32.xlu1 %v6162_v23, %s5459_s13  ;;  %v4933_v9 = vunpack.i.l.bf16 %v6190_v62  ;;  %v4934_v52 = vunpack.i.h.bf16 %v6190_v62 }
 0x110   : > { %5221 = vrot.lane.b32.xlu0 %v6186_v39, %s5465_s25  ;;  %v1867_v31 = vsel %vm1851_vm6, %v1834_v26, %v4939_v30  ;;  %v456_v30 = vld [vmem:[#allocation2 + $0xc0] sm:$0xff] }
 0x111   : > { %v6196_v24 = vpop.permute.xlu1 %4946  ;;  %v1865_v6 = vsel %vm1851_vm6, %v1832_v5, %v4934_v52 }
 0x112   : > { %v6199_v43 = vpop.permute.xlu0 %4941  ;;  %v4949_v37 = vunpack.i.h.bf16 %v6196_v24  ;;  %v4948_v62 = vunpack.i.l.bf16 %v6196_v24  ;;  %v695_v24 = vld [vmem:[#allocation2 + $0x199] sm:$0xff] }
 0x113   : > { %5236 = vrot.lane.b32.xlu1 %v6186_v39, %s5458_s12  ;;  %v4943_v20 = vunpack.i.l.bf16 %v6199_v43  ;;  %v4944_v13 = vunpack.i.h.bf16 %v6199_v43  ;;  %v5285_v2 = vpack.i.bf16 %v696_v50, %v695_v24 }
 0x114   : > { %5231 = vrot.lane.b32.xlu0 %v6102_v15, %s5458_s12  ;;  %v1767_v15 = vsel %vm319_vm0, %v454_v32, %v4908_v51  ;;  %v1900_v46 = vsel %vm1884_vm7, %v1867_v31, %v4949_v37  ;;  %s314_s12 = scalar_lea.vmem %s6997_s7, %s7000_s30 }
 0x115   : > { %v6214_v59 = vpop.permute.xlu1 %4956  ;;  %v1800_v16 = vsel %vm1785_vm4, %v1767_v15, %v4918_v57  ;;  %v1898_v22 = vsel %vm1884_vm7, %v1865_v6, %v4944_v13 }
 0x116   : > { %v4952_v3 = vpop.permute.xlu0 %4951  ;;  %v1833_v17 = vsel %vm1818_vm5, %v1800_v16, %v4928_v34  ;;  %v4959_v40 = vunpack.i.h.bf16 %v6214_v59  ;;  %v4958_v8 = vunpack.i.l.bf16 %v6214_v59 }
 0x117   : > { %5246 = vrot.lane.b32.xlu1 %v6205_v44, %s5460_s14  ;;  %v4953_v29 = vunpack.i.l.bf16 %v4952_v3  ;;  %v4954_v33 = vunpack.i.h.bf16 %v4952_v3  ;;  %v1866_v25 = vsel %vm1851_vm6, %v1833_v17, %v4938_v21 }
 0x118   : > { %5241 = vrot.lane.b32.xlu0 %v6104_v28, %s5460_s14  ;;  %v1831_v28 = vsel %vm1818_vm5, %v1798_v19, %v4923_v7  ;;  %v1933_v3 = vsel %vm1917_vm8, %v1900_v46, %v4959_v40  ;;  %v727_v7 = vld [vmem:[#allocation2 + $0x19a] sm:$0xff] }
 0x119   : > { %v6239_v55 = vpop.permute.xlu1 %4966  ;;  %v1864_v36 = vsel %vm1851_vm6, %v1831_v28, %v4933_v9  ;;  %v5295_v45 = vpack.i.bf16 %v728_v10, %v727_v7 }
 0x11a   : > { %v4962_v42 = vpop.permute.xlu0 %4961  ;;  %v1897_v61 = vsel %vm1884_vm7, %v1864_v36, %v4943_v20  ;;  %v4969_v47 = vunpack.i.h.bf16 %v6239_v55  ;;  %v4968_v51 = vunpack.i.l.bf16 %v6239_v55 }
 0x11b   : > { %5256 = vrot.lane.b32.xlu1 %v6216_v38, %s5461_s15  ;;  %v4964_v11 = vunpack.i.h.bf16 %v4962_v42  ;;  %v4963_v12 = vunpack.i.l.bf16 %v4962_v42  ;;  %v1930_v43 = vsel %vm1917_vm8, %v1897_v61, %v4953_v29  ;;  %v458_v29 = vld [vmem:[#allocation2 + $0xd8] sm:$0xff]  ;;  %v459_v42 = vld [vmem:[#allocation2 + $0xe0] sm:$0xff] }
 0x11c   : > { %5251 = vrot.lane.b32.xlu0 %v6162_v23, %s5461_s15  ;;  %v1931_v23 = vsel %vm1917_vm8, %v1898_v22, %v4954_v33  ;;  %v1966_v27 = vsel %vm1950_vm9, %v1933_v3, %v4969_v47 }
 0x11d   : > { %v6257_v41 = vpop.permute.xlu1 %4976  ;;  %v1963_v53 = vsel %vm1950_vm9, %v1930_v43, %v4963_v12  ;;  %v1964_v32 = vsel %vm1950_vm9, %v1931_v23, %v4964_v11 }
 0x11e   : > { %v4972_v35 = vpop.permute.xlu0 %4971  ;;  %v4978_v13 = vunpack.i.l.bf16 %v6257_v41 }
 0x11f   : > { %v4974_v48 = vunpack.i.h.bf16 %v4972_v35  ;;  %v4973_v49 = vunpack.i.l.bf16 %v4972_v35  ;;  %5266 = vrot.lane.b32.xlu1 %v6218_v63, %s5462_s16 }
 0x120   : > { %5261 = vrot.lane.b32.xlu0 %v6186_v39, %s5462_s16  ;;  %v1899_v39 = vsel %vm1884_vm7, %v1866_v25, %v4948_v62  ;;  %v1769_v40 = vsel %vm319_vm0, %v456_v30, %v4978_v13 }
 0x121   : > { %v1996_v57 = vsel %vm1983_vm2, %v1963_v53, %v4973_v49  ;;  %v1997_v58 = vsel %vm1983_vm2, %v1964_v32, %v4974_v48  ;;  %v6276_v56 = vpop.permute.xlu1 %4986  ;;  %v1932_v34 = vsel %vm1917_vm8, %v1899_v39, %v4958_v8 }
 0x122   : > { %v2022_v59 = vpack.c.bf16 %v1997_v58, %v1996_v57  ;;  %v4982_v60 = vpop.permute.xlu0 %4981  ;;  %v1965_v1 = vsel %vm1950_vm9, %v1932_v34, %v4968_v51  ;;  %v4989_v17 = vunpack.i.h.bf16 %v6276_v56  ;;  %v4988_v26 = vunpack.i.l.bf16 %v6276_v56 }
 0x123   : > { %v4984_v4 = vunpack.i.h.bf16 %v4982_v60  ;;  %v4983_v15 = vunpack.i.l.bf16 %v4982_v60  ;;  %5276 = vrot.lane.b32.xlu1 %v5275_v0, %s5463_s19 }
 0x124   : > { %5271 = vrot.lane.b32.xlu0 %v6205_v44, %s5463_s19  ;;  %4607 = vmatprep.mubr.msk.bf16.mxu0 %vm2059_vm10, %v2022_v59  ;;  %v1772_v37 = vsel %vm319_vm0, %v459_v42, %v4989_v17  ;;  %v1771_v62 = vsel %vm319_vm0, %v458_v29, %v4988_v26 }
 0x125   : > { %v1999_v16 = vsel %vm1983_vm2, %v1966_v27, %v4984_v4  ;;  %v1998_v54 = vsel %vm1983_vm2, %v1965_v1, %v4983_v15  ;;  %v4997_v9 = vpop.permute.xlu1 %4996 }
 0x126   : > { %v2023_v18 = vpack.c.bf16 %v1999_v16, %v1998_v54  ;;  %v4992_v19 = vpop.permute.xlu0 %4991  ;;  %v4999_v28 = vunpack.i.h.bf16 %v4997_v9  ;;  %v4998_v5 = vunpack.i.l.bf16 %v4997_v9 }
 0x127   : > { %5286 = vrot.lane.b32.xlu1 %v5285_v2, %s5464_s24  ;;  %v4994_v33 = vunpack.i.h.bf16 %v4992_v19  ;;  %v4993_v21 = vunpack.i.l.bf16 %v4992_v19 }
 0x128   : > { %5281 = vrot.lane.b32.xlu0 %v6216_v38, %s5464_s24  ;;  %4608 = vmatmul.mubr.msk.bf16.gmra.mxu0 %vm2059_vm10, %v2023_v18  ;;  %v4979_v38 = vunpack.i.h.bf16 %v6257_v41  ;;  %v1804_v8 = vsel %vm1785_vm4, %v1771_v62, %v4998_v5  ;;  %v1805_v43 = vsel %vm1785_vm4, %v1772_v37, %v4999_v28 }
 0x129   : > { %v5007_v44 = vpop.permute.xlu1 %5006  ;;  %v1802_v23 = vsel %vm1785_vm4, %v1769_v40, %v4993_v21 }
 0x12a   : > { %v5002_v14 = vpop.permute.xlu0 %5001  ;;  %v5009_v11 = vunpack.i.h.bf16 %v5007_v44  ;;  %v5008_v12 = vunpack.i.l.bf16 %v5007_v44 }
 0x12b   : > { %5296 = vrot.lane.b32.xlu1 %v5295_v45, %s5465_s25  ;;  %v5004_v61 = vunpack.i.h.bf16 %v5002_v14  ;;  %v5003_v22 = vunpack.i.l.bf16 %v5002_v14 }
 0x12c   : > { %5291 = vrot.lane.b32.xlu0 %v6218_v63, %s5465_s25  ;;  %v457_v63 = vld [vmem:[#allocation2 + $0xc8] sm:$0xff]  ;;  %v1837_v24 = vsel %vm1818_vm5, %v1804_v8, %v5008_v12  ;;  %v1838_v50 = vsel %vm1818_vm5, %v1805_v43, %v5009_v11 }
 0x12d   : > { %v6310_v0 = vpop.permute.xlu1 %5016  ;;  %v1770_v41 = vsel %vm319_vm0, %v457_v63, %v4979_v38  ;;  %v1835_v25 = vsel %vm1818_vm5, %v1802_v23, %v5003_v22 }
 0x12e   : > { %v5012_v52 = vpop.permute.xlu0 %5011  ;;  %v1803_v35 = vsel %vm1785_vm4, %v1770_v41, %v4994_v33  ;;  %v5019_v56 = vunpack.i.h.bf16 %v6310_v0  ;;  %v5018_v39 = vunpack.i.l.bf16 %v6310_v0 }
 0x12f   : > { %v5014_v47 = vunpack.i.h.bf16 %v5012_v52  ;;  %v5013_v48 = vunpack.i.l.bf16 %v5012_v52  ;;  %v1836_v31 = vsel %vm1818_vm5, %v1803_v35, %v5004_v61 }
 0x130   : > { %v1870_v0 = vsel %vm1851_vm6, %v1837_v24, %v5018_v39  ;;  %v1871_v52 = vsel %vm1851_vm6, %v1838_v50, %v5019_v56  ;;  %v460_v50 = vld [vmem:[#allocation2 + $0xf0] sm:$0xff] }
 0x131   : > { %v6312_v20 = vpop.permute.xlu1 %5026  ;;  %v1868_v60 = vsel %vm1851_vm6, %v1835_v25, %v5013_v48  ;;  %v1869_v2 = vsel %vm1851_vm6, %v1836_v31, %v5014_v47  ;;  %v462_v47 = vld [vmem:[#allocation2 + $0x108] sm:$0xff]  ;;  %v463_v48 = vld [vmem:[#allocation2 + $0x110] sm:$0xff] }
 0x132   : > { %v5022_v55 = vpop.permute.xlu0 %5021  ;;  %v5029_v34 = vunpack.i.h.bf16 %v6312_v20  ;;  %v5028_v3 = vunpack.i.l.bf16 %v6312_v20 }
 0x133   : > { %v5024_v51 = vunpack.i.h.bf16 %v5022_v55  ;;  %v5023_v53 = vunpack.i.l.bf16 %v5022_v55 }
 0x134   : > { %v1903_v26 = vsel %vm1884_vm7, %v1870_v0, %v5028_v3  ;;  %v1904_v38 = vsel %vm1884_vm7, %v1871_v52, %v5029_v34 }
 0x135   : > { %v5037_v36 = vpop.permute.xlu1 %5036  ;;  %v1901_v15 = vsel %vm1884_vm7, %v1868_v60, %v5023_v53  ;;  %v1902_v1 = vsel %vm1884_vm7, %v1869_v2, %v5024_v51  ;;  %v461_v51 = vld [vmem:[#allocation2 + $0xf8] sm:$0xff] }
 0x136   : > { %v5032_v6 = vpop.permute.xlu0 %5031  ;;  %v5039_v27 = vunpack.i.h.bf16 %v5037_v36  ;;  %v5038_v7 = vunpack.i.l.bf16 %v5037_v36 }
 0x137   : > { %v5034_v57 = vunpack.i.h.bf16 %v5032_v6  ;;  %v5033_v58 = vunpack.i.l.bf16 %v5032_v6 }
 0x138   : > { %v1936_v42 = vsel %vm1917_vm8, %v1903_v26, %v5038_v7  ;;  %v1937_v28 = vsel %vm1917_vm8, %v1904_v38, %v5039_v27 }
 0x139   : > { %v5047_v49 = vpop.permute.xlu1 %5046  ;;  %v1934_v16 = vsel %vm1917_vm8, %v1901_v15, %v5033_v58  ;;  %v1935_v54 = vsel %vm1917_vm8, %v1902_v1, %v5034_v57 }
 0x13a   : > { %v5042_v32 = vpop.permute.xlu0 %5041  ;;  %v5049_v19 = vunpack.i.h.bf16 %v5047_v49  ;;  %v5048_v45 = vunpack.i.l.bf16 %v5047_v49 }
 0x13b   : > { %v5044_v46 = vunpack.i.h.bf16 %v5042_v32  ;;  %v5043_v59 = vunpack.i.l.bf16 %v5042_v32 }
 0x13c   : > { %v1969_v63 = vsel %vm1950_vm9, %v1936_v42, %v5048_v45  ;;  %v1970_v33 = vsel %vm1950_vm9, %v1937_v28, %v5049_v19 }
 0x13d   : > { %v6336_v4 = vpop.permute.xlu1 %5056  ;;  %v1967_v44 = vsel %vm1950_vm9, %v1934_v16, %v5043_v59  ;;  %v1968_v14 = vsel %vm1950_vm9, %v1935_v54, %v5044_v46 }
 0x13e   : > { %v5052_v10 = vpop.permute.xlu0 %5051  ;;  %v5059_v35 = vunpack.i.h.bf16 %v6336_v4  ;;  %v5058_v23 = vunpack.i.l.bf16 %v6336_v4 }
 0x13f   : > { %v5054_v9 = vunpack.i.h.bf16 %v5052_v10  ;;  %v5053_v18 = vunpack.i.l.bf16 %v5052_v10 }
 0x140   : > { %v1774_v60 = vsel %vm319_vm0, %v461_v51, %v5059_v35  ;;  %v1773_v2 = vsel %vm319_vm0, %v460_v50, %v5058_v23 }
 0x141   : > { %v2000_v20 = vsel %vm1983_vm2, %v1967_v44, %v5053_v18  ;;  %v2001_v55 = vsel %vm1983_vm2, %v1968_v14, %v5054_v9  ;;  %v5067_v17 = vpop.permute.xlu1 %5066 }
 0x142   : > { %v2024_v13 = vpack.c.bf16 %v2001_v55, %v2000_v20  ;;  %v5062_v29 = vpop.permute.xlu0 %5061  ;;  %v5069_v8 = vunpack.i.h.bf16 %v5067_v17  ;;  %v5068_v43 = vunpack.i.l.bf16 %v5067_v17 }
 0x143   : > { %v5064_v5 = vunpack.i.h.bf16 %v5062_v29  ;;  %v5063_v30 = vunpack.i.l.bf16 %v5062_v29 }
 0x144   : > { %4611 = vmatprep.mubr.msk.bf16.mxu0 %vm2059_vm10, %v2024_v13  ;;  %v1776_v56 = vsel %vm319_vm0, %v463_v48, %v5069_v8  ;;  %v1775_v39 = vsel %vm319_vm0, %v462_v47, %v5068_v43 }
 0x145   : > { %v2003_v21 = vsel %vm1983_vm2, %v1970_v33, %v5064_v5  ;;  %v2002_v36 = vsel %vm1983_vm2, %v1969_v63, %v5063_v30  ;;  %v5077_v11 = vpop.permute.xlu1 %5076 }
 0x146   : > { %v2025_v12 = vpack.c.bf16 %v2003_v21, %v2002_v36  ;;  %v5072_v6 = vpop.permute.xlu0 %5071  ;;  %v5079_v49 = vunpack.i.h.bf16 %v5077_v11  ;;  %v5078_v24 = vunpack.i.l.bf16 %v5077_v11 }
 0x147   : > { %v5074_v53 = vunpack.i.h.bf16 %v5072_v6  ;;  %v5073_v32 = vunpack.i.l.bf16 %v5072_v6 }
 0x148   : > { %4612 = vmatmul.mubr.msk.bf16.gmra.mxu0 %vm2059_vm10, %v2025_v12  ;;  %v1808_v34 = vsel %vm1785_vm4, %v1775_v39, %v5078_v24  ;;  %v1809_v3 = vsel %vm1785_vm4, %v1776_v56, %v5079_v49 }
 0x149   : > { %v5087_v37 = vpop.permute.xlu1 %5086  ;;  %v1807_v4 = vsel %vm1785_vm4, %v1774_v60, %v5074_v53  ;;  %v1806_v15 = vsel %vm1785_vm4, %v1773_v2, %v5073_v32 }
 0x14a   : > { %v5082_v62 = vpop.permute.xlu0 %5081  ;;  %v5089_v31 = vunpack.i.h.bf16 %v5087_v37  ;;  %v5088_v57 = vunpack.i.l.bf16 %v5087_v37 }
 0x14b   : > { %v5084_v46 = vunpack.i.h.bf16 %v5082_v62  ;;  %v5083_v59 = vunpack.i.l.bf16 %v5082_v62 }
 0x14c   : > { %v1841_v10 = vsel %vm1818_vm5, %v1808_v34, %v5088_v57  ;;  %v1842_v16 = vsel %vm1818_vm5, %v1809_v3, %v5089_v31 }
 0x14d   : > { %v6358_v61 = vpop.permute.xlu1 %5096  ;;  %v1839_v19 = vsel %vm1818_vm5, %v1806_v15, %v5083_v59  ;;  %v1840_v45 = vsel %vm1818_vm5, %v1807_v4, %v5084_v46 }
 0x14e   : > { %v5092_v22 = vpop.permute.xlu0 %5091  ;;  %v5099_v0 = vunpack.i.h.bf16 %v6358_v61  ;;  %v5098_v52 = vunpack.i.l.bf16 %v6358_v61 }
 0x14f   : > { %v5094_v1 = vunpack.i.h.bf16 %v5092_v22  ;;  %v5093_v27 = vunpack.i.l.bf16 %v5092_v22 }
 0x150   : > { %v1874_v61 = vsel %vm1851_vm6, %v1841_v10, %v5098_v52  ;;  %v1875_v22 = vsel %vm1851_vm6, %v1842_v16, %v5099_v0  ;;  %v465_v10 = vld [vmem:[#allocation2 + $0x128] sm:$0xff]  ;;  %v2341_v0 = vlaneseq  ;;  %v5441_v52 = vld [vmem:[#allocation2 + $0x140] sm:$0xff] }
 0x151   : > { %v6360_v41 = vpop.permute.xlu1 %5106  ;;  %v1872_v17 = vsel %vm1851_vm6, %v1839_v19, %v5093_v27  ;;  %v1873_v26 = vsel %vm1851_vm6, %v1840_v45, %v5094_v1 }
 0x152   : > { %v5102_v40 = vpop.permute.xlu0 %5101  ;;  %v5109_v38 = vunpack.i.h.bf16 %v6360_v41  ;;  %v5108_v13 = vunpack.i.l.bf16 %v6360_v41 }
 0x153   : > { %v5104_v54 = vunpack.i.h.bf16 %v5102_v40  ;;  %v5103_v9 = vunpack.i.l.bf16 %v5102_v40 }
 0x154   : > { %v1907_v43 = vsel %vm1884_vm7, %v1874_v61, %v5108_v13  ;;  %v1908_v35 = vsel %vm1884_vm7, %v1875_v22, %v5109_v38 }
 0x155   : > { %v5117_v25 = vpop.permute.xlu1 %5116  ;;  %v1905_v42 = vsel %vm1884_vm7, %v1872_v17, %v5103_v9  ;;  %v1906_v28 = vsel %vm1884_vm7, %v1873_v26, %v5104_v54 }
 0x156   : > { %v5112_v58 = vpop.permute.xlu0 %5111  ;;  %v5119_v5 = vunpack.i.h.bf16 %v5117_v25  ;;  %v5118_v30 = vunpack.i.l.bf16 %v5117_v25 }
 0x157   : > { %v5114_v44 = vunpack.i.h.bf16 %v5112_v58  ;;  %v5113_v14 = vunpack.i.l.bf16 %v5112_v58 }
 0x158   : > { %v1940_v48 = vsel %vm1917_vm8, %v1907_v43, %v5118_v30  ;;  %v1941_v49 = vsel %vm1917_vm8, %v1908_v35, %v5119_v5 }
 0x159   : > { %v5127_v7 = vpop.permute.xlu1 %5126  ;;  %v1938_v33 = vsel %vm1917_vm8, %v1905_v42, %v5113_v14  ;;  %v1939_v21 = vsel %vm1917_vm8, %v1906_v28, %v5114_v44  ;;  %v5466_v44 = vmov 1983009808  }
 0x15a   : > { %v5122_v18 = vpop.permute.xlu0 %5121  ;;  %v5129_v12 = vunpack.i.h.bf16 %v5127_v7  ;;  %v5128_v6 = vunpack.i.l.bf16 %v5127_v7  ;;  %v464_v7 = vld [vmem:[#allocation2 + $0x120] sm:$0xff]  ;;  %v6412_v14 = vunpack.c.l.s4 %v5466_v44 }
 0x15b   : > { %v5124_v20 = vunpack.i.h.bf16 %v5122_v18  ;;  %v5123_v55 = vunpack.i.l.bf16 %v5122_v18 }
 0x15c   : > { %v1973_v51 = vsel %vm1950_vm9, %v1940_v48, %v5128_v6  ;;  %v1974_v53 = vsel %vm1950_vm9, %v1941_v49, %v5129_v12 }
 0x15d   : > { %v6382_v29 = vpop.permute.xlu1 %5136  ;;  %v1971_v37 = vsel %vm1950_vm9, %v1938_v33, %v5123_v55  ;;  %v1972_v62 = vsel %vm1950_vm9, %v1939_v21, %v5124_v20  ;;  %v5442_v55 = vld [vmem:[#allocation2 + $0x138] sm:$0xff] }
 0x15e   : > { %v5132_v63 = vpop.permute.xlu0 %5131  ;;  %v5139_v4 = vunpack.i.h.bf16 %v6382_v29  ;;  %v5138_v15 = vunpack.i.l.bf16 %v6382_v29 }
 0x15f   : > { %v5134_v36 = vunpack.i.h.bf16 %v5132_v63  ;;  %v5133_v11 = vunpack.i.l.bf16 %v5132_v63 }
 0x160   : > { %v1778_v13 = vsel %vm319_vm0, %v465_v10, %v5139_v4  ;;  %v1777_v29 = vsel %vm319_vm0, %v464_v7, %v5138_v15 }
 0x161   : > { %v2004_v41 = vsel %vm1983_vm2, %v1971_v37, %v5133_v11  ;;  %v2005_v40 = vsel %vm1983_vm2, %v1972_v62, %v5134_v36  ;;  %v5147_v8 = vpop.permute.xlu1 %5146 }
 0x162   : > { %v2026_v23 = vpack.c.bf16 %v2005_v40, %v2004_v41  ;;  %v5142_v47 = vpop.permute.xlu0 %5141  ;;  %v5149_v34 = vunpack.i.h.bf16 %v5147_v8  ;;  %v5148_v3 = vunpack.i.l.bf16 %v5147_v8 }
 0x163   : > { %v5144_v24 = vunpack.i.h.bf16 %v5142_v47  ;;  %v5143_v50 = vunpack.i.l.bf16 %v5142_v47 }
 0x164   : > { %4615 = vmatprep.mubr.msk.bf16.mxu0 %vm2059_vm10, %v2026_v23  ;;  %v1780_v20 = vsel %vm319_vm0, %v5441_v52, %v5149_v34  ;;  %v1779_v17 = vsel %vm319_vm0, %v5442_v55, %v5148_v3  ;;  %v2340_v55 = vunpack.c.0.s8 %v6412_v14 }
 0x165   : > { %v2007_v32 = vsel %vm1983_vm2, %v1974_v53, %v5144_v24  ;;  %v2006_v25 = vsel %vm1983_vm2, %v1973_v51, %v5143_v50  ;;  %v5157_v31 = vpop.permute.xlu1 %5156 }
 0x166   : > { %v2027_v57 = vpack.c.bf16 %v2007_v32, %v2006_v25  ;;  %v5152_v58 = vpop.permute.xlu0 %5151  ;;  %v5159_v1 = vunpack.i.h.bf16 %v5157_v31  ;;  %v5158_v27 = vunpack.i.l.bf16 %v5157_v31 }
 0x167   : > { %v5154_v16 = vunpack.i.h.bf16 %v5152_v58  ;;  %v5153_v54 = vunpack.i.l.bf16 %v5152_v58 }
 0x168   : > { %4616 = vmatmul.mubr.msk.bf16.gmra.mxu0 %vm2059_vm10, %v2027_v57  ;;  %v1812_v42 = vsel %vm1785_vm4, %v1779_v17, %v5158_v27  ;;  %v1813_v28 = vsel %vm1785_vm4, %v1780_v20, %v5159_v1  ;;  %v2342_v17 = vshrl.u32 %v2341_v0, 7 }
 0x169   : > { %v5167_v56 = vpop.permute.xlu1 %5166  ;;  %v1811_v5 = vsel %vm1785_vm4, %v1778_v13, %v5154_v16  ;;  %v1810_v30 = vsel %vm1785_vm4, %v1777_v29, %v5153_v54 }
 0x16a   : > { %v5162_v39 = vpop.permute.xlu0 %5161  ;;  %v5169_v18 = vunpack.i.h.bf16 %v5167_v56  ;;  %v5168_v19 = vunpack.i.l.bf16 %v5167_v56  ;;  %v6462_v0 = vsub.s32 %v2340_v55, %v2342_v17 }
 0x16b   : > { %v5164_v26 = vunpack.i.h.bf16 %v5162_v39  ;;  %v5163_v38 = vunpack.i.l.bf16 %v5162_v39 }
 0x16c   : > { %v1845_v36 = vsel %vm1818_vm5, %v1812_v42, %v5168_v19  ;;  %v1846_v11 = vsel %vm1818_vm5, %v1813_v28, %v5169_v18  ;;  %v6458_v42 = vld [vmem:[%s6992_s2] ss:$0 sm:$0xff] }
 0x16d   : > { %v6404_v46 = vpop.permute.xlu1 %5176  ;;  %v1843_v62 = vsel %vm1818_vm5, %v1810_v30, %v5163_v38  ;;  %v1844_v61 = vsel %vm1818_vm5, %v1811_v5, %v5164_v26 }
 0x16e   : > { %v5172_v59 = vpop.permute.xlu0 %5171  ;;  %v5179_v40 = vunpack.i.h.bf16 %v6404_v46  ;;  %v5178_v8 = vunpack.i.l.bf16 %v6404_v46 }
 0x16f   : > { %v5174_v63 = vunpack.i.h.bf16 %v5172_v59  ;;  %v5173_v33 = vunpack.i.l.bf16 %v5172_v59 }
 0x170   : > { %v1879_v34 = vsel %vm1851_vm6, %v1846_v11, %v5179_v40  ;;  %v5443_v11 = vld [vmem:[#allocation2 + $0x158] sm:$0xff]  ;;  %v5445_v40 = vld [vmem:[#allocation2 + $0x168] sm:$0xff] }
 0x171   : > { %v6406_v60 = vpop.permute.xlu1 %5186  ;;  %v1876_v23 = vsel %vm1851_vm6, %v1843_v62, %v5173_v33  ;;  %v1877_v47 = vsel %vm1851_vm6, %v1844_v61, %v5174_v63 }
 0x172   : > { %v5182_v2 = vpop.permute.xlu0 %5181  ;;  %v5189_v48 = vunpack.i.h.bf16 %v6406_v60  ;;  %v5188_v49 = vunpack.i.l.bf16 %v6406_v60 }
 0x173   : > { %v5184_v12 = vunpack.i.h.bf16 %v5182_v2  ;;  %v5183_v6 = vunpack.i.l.bf16 %v5182_v2  ;;  %v1878_v2 = vsel %vm1851_vm6, %v1845_v36, %v5178_v8  ;;  %v6464_v36 = vsub.s32 0, %v2342_v17 }
 0x174   : > { %v1911_v1 = vsel %vm1884_vm7, %v1878_v2, %v5188_v49  ;;  %v1912_v27 = vsel %vm1884_vm7, %v1879_v34, %v5189_v48 }
 0x175   : > { %v6410_v9 = vpop.permute.xlu1 %5196  ;;  %v1909_v50 = vsel %vm1884_vm7, %v1876_v23, %v5183_v6  ;;  %v1910_v51 = vsel %vm1884_vm7, %v1877_v47, %v5184_v12  ;;  %v5444_v6 = vld [vmem:[#allocation2 + $0x150] sm:$0xff] }
 0x176   : > { %v5192_v45 = vpop.permute.xlu0 %5191  ;;  %v5199_v53 = vunpack.i.h.bf16 %v6410_v9  ;;  %v5198_v32 = vunpack.i.l.bf16 %v6410_v9  ;;  %v5446_v47 = vld [vmem:[#allocation2 + $0x170] sm:$0xff] }
 0x177   : > { %v5194_v22 = vunpack.i.h.bf16 %v5192_v45  ;;  %v5193_v41 = vunpack.i.l.bf16 %v5192_v45 }
 0x178   : > { %v1944_v16 = vsel %vm1917_vm8, %v1911_v1, %v5198_v32  ;;  %v1945_v54 = vsel %vm1917_vm8, %v1912_v27, %v5199_v53 }
 0x179   : > { %v5207_v21 = vpop.permute.xlu1 %5206  ;;  %v1942_v31 = vsel %vm1917_vm8, %v1909_v50, %v5193_v41  ;;  %v1943_v57 = vsel %vm1917_vm8, %v1910_v51, %v5194_v22 }
 0x17a   : > { %v5202_v37 = vpop.permute.xlu0 %5201  ;;  %v5209_v39 = vunpack.i.h.bf16 %v5207_v21  ;;  %v5208_v46 = vunpack.i.l.bf16 %v5207_v21 }
 0x17b   : > { %v5204_v43 = vunpack.i.h.bf16 %v5202_v37  ;;  %v5203_v35 = vunpack.i.l.bf16 %v5202_v37 }
 0x17c   : > { %v1977_v19 = vsel %vm1950_vm9, %v1944_v16, %v5208_v46  ;;  %v1978_v45 = vsel %vm1950_vm9, %v1945_v54, %v5209_v39 }
 0x17d   : > { %v5217_v24 = vpop.permute.xlu1 %5216  ;;  %v1975_v59 = vsel %vm1950_vm9, %v1942_v31, %v5203_v35  ;;  %v1976_v60 = vsel %vm1950_vm9, %v1943_v57, %v5204_v43 }
 0x17e   : > { %v5212_v25 = vpop.permute.xlu0 %5211  ;;  %v5219_v26 = vunpack.i.h.bf16 %v5217_v24  ;;  %v5218_v38 = vunpack.i.l.bf16 %v5217_v24 }
 0x17f   : > { %v5214_v58 = vunpack.i.h.bf16 %v5212_v25  ;;  %v5213_v56 = vunpack.i.l.bf16 %v5212_v25 }
 0x180   : > { %v1782_v12 = vsel %vm319_vm0, %v5443_v11, %v5219_v26  ;;  %v1781_v37 = vsel %vm319_vm0, %v5444_v6, %v5218_v38 }
 0x181   : > { %v2008_v3 = vsel %vm1983_vm2, %v1975_v59, %v5213_v56  ;;  %v2009_v4 = vsel %vm1983_vm2, %v1976_v60, %v5214_v58  ;;  %v5227_v15 = vpop.permute.xlu1 %5226 }
 0x182   : > { %v2028_v7 = vpack.c.bf16 %v2009_v4, %v2008_v3  ;;  %v5222_v10 = vpop.permute.xlu0 %5221  ;;  %v5228_v28 = vunpack.i.l.bf16 %v5227_v15  ;;  %v5229_v5 = vunpack.i.h.bf16 %v5227_v15 }
 0x183   : > { %v5224_v9 = vunpack.i.h.bf16 %v5222_v10  ;;  %v5223_v18 = vunpack.i.l.bf16 %v5222_v10 }
 0x184   : > { %4619 = vmatprep.mubr.msk.bf16.mxu0 %vm2059_vm10, %v2028_v7  ;;  %v1783_v8 = vsel %vm319_vm0, %v5445_v40, %v5228_v28  ;;  %v1784_v48 = vsel %vm319_vm0, %v5446_v47, %v5229_v5  ;;  %vm3342_vm0 = vcmask 1045509  }
 0x185   : > { %v2011_v44 = vsel %vm1983_vm2, %v1978_v45, %v5224_v9  ;;  %v2010_v52 = vsel %vm1983_vm2, %v1977_v19, %v5223_v18  ;;  %v5237_v20 = vpop.permute.xlu1 %5236 }
 0x186   : > { %v2029_v13 = vpack.c.bf16 %v2011_v44, %v2010_v52  ;;  %v5232_v29 = vpop.permute.xlu0 %5231  ;;  %v5238_v30 = vunpack.i.l.bf16 %v5237_v20  ;;  %v5239_v33 = vunpack.i.h.bf16 %v5237_v20 }
 0x187   : > { %v5234_v62 = vunpack.i.h.bf16 %v5232_v29  ;;  %v5233_v61 = vunpack.i.l.bf16 %v5232_v29 }
 0x188   : > { %v4597_v63 = vpop.f32.mrf.mxu0  ;;  %4620 = vmatmul.mubr.msk.bf16.gmra.mxu0 %vm2059_vm10, %v2029_v13  ;;  %v1816_v49 = vsel %vm1785_vm4, %v1783_v8, %v5238_v30  ;;  %v1817_v53 = vsel %vm1785_vm4, %v1784_v48, %v5239_v33 }
 0x189   : > { %v2155_v14 = vadd.f32 %v4597_v63, %v6458_v42  ;;  %v5247_v21 = vpop.permute.xlu1 %5246  ;;  %v1815_v58 = vsel %vm1785_vm4, %v1782_v12, %v5234_v62  ;;  %v1814_v56 = vsel %vm1785_vm4, %v1781_v37, %v5233_v61  ;;  %vm3687_vm4 = vcmask 523264  }
 0x18a   : > { %v5242_v22 = vpop.permute.xlu0 %5241  ;;  %v2146_v41 = vpop.f32.mrf.mxu0  ;;  %v5249_v43 = vunpack.i.h.bf16 %v5247_v21  ;;  %v5248_v35 = vunpack.i.l.bf16 %v5247_v21 }
 0x18b   : > { %v2147_v23 = vadd.f32 %v6458_v42, %v2146_v41  ;;  %v5244_v24 = vunpack.i.h.bf16 %v5242_v22  ;;  %v5243_v50 = vunpack.i.l.bf16 %v5242_v22  ;;  %v2275_v32 = vmax.f32 %v2155_v14, 0.0 }
 0x18c   : > { %v4598_v51 = vpop.f32.mrf.mxu0  ;;  %v1849_v2 = vsel %vm1818_vm5, %v1816_v49, %v5248_v35  ;;  %v1850_v34 = vsel %vm1818_vm5, %v1817_v53, %v5249_v43 }
 0x18d   : > { %v2273_v25 = vmax.f32 %v2147_v23, 0.0  ;;  %v2158_v31 = vadd.f32 %v4598_v51, %v6458_v42  ;;  %v5257_v57 = vpop.permute.xlu1 %5256  ;;  %v1847_v15 = vsel %vm1818_vm5, %v1814_v56, %v5243_v50  ;;  %v1848_v1 = vsel %vm1818_vm5, %v1815_v58, %v5244_v24 }
 0x18e   : > { %v5259_v39 = vunpack.i.h.bf16 %v5257_v57  ;;  %v5258_v46 = vunpack.i.l.bf16 %v5257_v57  ;;  %v5252_v59 = vpop.permute.xlu0 %5251  ;;  %v2149_v60 = vpop.f32.mrf.mxu0  ;;  %vm3696_vm5 = vcmask 785408  }
 0x18f   : > { %v2305_v3 = vadd.f32 %v2275_v32, %v2273_v25  ;;  %v5253_v4 = vunpack.i.l.bf16 %v5252_v59  ;;  %v5254_v27 = vunpack.i.h.bf16 %v5252_v59  ;;  %v2150_v7 = vadd.f32 %v6458_v42, %v2149_v60 }
 0x190   : > { %v2276_v54 = vmax.f32 %v2158_v31, 0.0  ;;  %v1882_v9 = vsel %vm1851_vm6, %v1849_v2, %v5258_v46  ;;  %v1883_v19 = vsel %vm1851_vm6, %v1850_v34, %v5259_v39 }
 0x191   : > { %v2337_v10 = vcombine.high %v2305_v3, %v2305_v3  ;;  %v2344_v16 = vrot.slane %v2305_v3, %v6462_v0  ;;  %v5267_v18 = vpop.permute.xlu1 %5266  ;;  %v2274_v45 = vmax.f32 %v2150_v7, 0.0  ;;  %v1880_v38 = vsel %vm1851_vm6, %v1847_v15, %v5253_v4 }
 0x192   : > { %v5269_v44 = vunpack.i.h.bf16 %v5267_v18  ;;  %v5268_v52 = vunpack.i.l.bf16 %v5267_v18  ;;  %v5262_v20 = vpop.permute.xlu0 %5261  ;;  %v1881_v13 = vsel %vm1851_vm6, %v1848_v1, %v5254_v27  ;;  %vm4321_vm6 = vcmask 253952  }
 0x193   : > { %v2351_v55 = vrot.slane %v2337_v10, %v6462_v0  ;;  %v2352_v17 = vcombine.high %v2344_v16, %v2344_v16  ;;  %v4418_v26 = vrot.slane %v2344_v16, 9  ;;  %v2306_v29 = vadd.f32 %v2276_v54, %v2274_v45 }
 0x194   : > { %v5264_v28 = vunpack.i.h.bf16 %v5262_v20  ;;  %v5263_v5 = vunpack.i.l.bf16 %v5262_v20  ;;  %v1915_v6 = vsel %vm1884_vm7, %v1882_v9, %v5268_v52  ;;  %v1916_v37 = vsel %vm1884_vm7, %v1883_v19, %v5269_v44 }
 0x195   : > { %v2353_v30 = vcombine.high %v2351_v55, %v2351_v55  ;;  %v4419_v63 = vrot.slane %v2352_v17, 9  ;;  %v4420_v33 = vrot.slane %v2351_v55, 9  ;;  %v2865_v14 = vadd.f32 %v4418_v26, %v2344_v16  ;;  %v5277_v21 = vpop.permute.xlu1 %5276 }
 0x196   : > { %v2354_v11 = vcombine.high %v2306_v29, %v2306_v29  ;;  %v2361_v12 = vrot.slane %v2306_v29, %v6462_v0  ;;  %v5272_v62 = vpop.permute.xlu0 %5271  ;;  %v1913_v23 = vsel %vm1884_vm7, %v1880_v38, %v5263_v5  ;;  %v1914_v24 = vsel %vm1884_vm7, %v1881_v13, %v5264_v28 }
 0x197   : > { %v4421_v61 = vrot.slane %v2353_v30, 9  ;;  %v2866_v22 = vadd.f32 %v4419_v63, %v2352_v17  ;;  %v2867_v41 = vadd.f32 %v4420_v33, %v2351_v55  ;;  %v2929_v40 = vmul.f32 0.25, %v2865_v14 }
 0x198   : > { %v2368_v8 = vrot.slane %v2354_v11, %v6462_v0  ;;  %v2369_v43 = vcombine.high %v2361_v12, %v2361_v12  ;;  %v4422_v35 = vrot.slane %v2361_v12, 9  ;;  %v5279_v4 = vunpack.i.h.bf16 %v5277_v21 }
 0x199   : > { %v2868_v47 = vadd.f32 %v4421_v61, %v2353_v30  ;;  %v2930_v48 = vmul.f32 0.25, %v2866_v22  ;;  %v2931_v49 = vmul.f32 0.25, %v2867_v41  ;;  %v5287_v25 = vpop.permute.xlu1 %5286  ;;  %v3081_v57 = vrot.slane %v2929_v40, %v6464_v36 }
 0x19a   : > { %v2370_v50 = vcombine.high %v2368_v8, %v2368_v8  ;;  %v4423_v51 = vrot.slane %v2369_v43, 9  ;;  %v4424_v53 = vrot.slane %v2368_v8, 9  ;;  %v2869_v32 = vadd.f32 %v4422_v35, %v2361_v12  ;;  %v5282_v39 = vpop.permute.xlu0 %5281 }
 0x19b   : > { %v2932_v31 = vmul.f32 0.25, %v2868_v47  ;;  %v3085_v58 = vrot.slane %v2930_v48, %v6464_v36  ;;  %v3089_v56 = vrot.slane %v2931_v49, %v6464_v36  ;;  %v5278_v15 = vunpack.i.l.bf16 %v5277_v21 }
 0x19c   : > { %v4425_v46 = vrot.slane %v2370_v50, 9  ;;  %v2870_v59 = vadd.f32 %v4423_v51, %v2369_v43  ;;  %v2871_v60 = vadd.f32 %v4424_v53, %v2368_v8  ;;  %v2933_v2 = vmul.f32 0.25, %v2869_v32 }
 0x19d   : > { %v3093_v34 = vrot.slane %v2932_v31, %v6464_v36  ;;  %v3335_v3 = vsel %vm3334_vm12, %v3085_v58, %v3081_v57  ;;  %v5274_v9 = vunpack.i.h.bf16 %v5272_v62  ;;  %v5273_v18 = vunpack.i.l.bf16 %v5272_v62  ;;  %v5297_v20 = vpop.permute.xlu1 %5296 }
 0x19e   : > { %v3337_v1 = vsel %vm3336_vm13, %v3089_v56, %v3335_v3  ;;  %v2872_v27 = vadd.f32 %v4425_v46, %v2370_v50  ;;  %v2934_v7 = vmul.f32 0.25, %v2870_v59  ;;  %v2935_v10 = vmul.f32 0.25, %v2871_v60  ;;  %v5292_v13 = vpop.permute.xlu0 %5291  ;;  %v3422_v50 = vld [vmem:[#allocation3 + $0x1] sm:$0xff] }
 0x19f   : > { %v3097_v16 = vrot.slane %v2933_v2, %v6464_v36  ;;  %v3339_v54 = vsel %vm3338_vm14, %v3093_v34, %v3337_v1  ;;  %v5289_v52 = vunpack.i.h.bf16 %v5287_v25  ;;  %v1948_v17 = vsel %vm1917_vm8, %v1915_v6, %v5278_v15  ;;  %v3430_v56 = vld [vmem:[#allocation3 + $0x2] sm:$0xff] }
 0x1a0   : > { %v2936_v19 = vmul.f32 0.25, %v2872_v27  ;;  %v3101_v45 = vrot.slane %v2934_v7, %v6464_v36  ;;  %v3105_v44 = vrot.slane %v2935_v10, %v6464_v36  ;;  %v1949_v26 = vsel %vm1917_vm8, %v1916_v37, %v5279_v4 }
 0x1a1   : > { %v3341_v55 = vsel %vm3340_vm15, %v3097_v16, %v3339_v54  ;;  %v5288_v38 = vunpack.i.l.bf16 %v5287_v25  ;;  %v1946_v5 = vsel %vm1917_vm8, %v1913_v23, %v5273_v18  ;;  %v5284_v30 = vunpack.i.h.bf16 %v5282_v39 }
 0x1a2   : > { %v3109_v29 = vrot.slane %v2936_v19, %v6464_v36  ;;  %v3343_v28 = vsel %vm3342_vm0, %v3101_v45, %v3341_v55  ;;  %v1947_v33 = vsel %vm1917_vm8, %v1914_v24, %v5274_v9  ;;  %v5283_v14 = vunpack.i.l.bf16 %v5282_v39 }
 0x1a3   : > { %v3345_v63 = vsel %vm3344_vm1, %v3105_v44, %v3343_v28  ;;  %v5299_v21 = vunpack.i.h.bf16 %v5297_v20  ;;  %v1982_v12 = vsel %vm1950_vm9, %v1949_v26, %v5289_v52  ;;  %v5298_v6 = vunpack.i.l.bf16 %v5297_v20 }
 0x1a4   : > { %v3347_v11 = vsel %vm3346_vm3, %v3109_v29, %v3345_v63  ;;  %v5294_v37 = vunpack.i.h.bf16 %v5292_v13  ;;  %v1981_v62 = vsel %vm1950_vm9, %v1948_v17, %v5288_v38  ;;  %v1980_v61 = vsel %vm1950_vm9, %v1947_v33, %v5284_v30 }
 0x1a5   : > { %3406 = vst.msk [vmem:[#allocation3 + $0x11] sm:$0xff] %vm1983_vm2, %v3347_v11  ;;  %v2015_v22 = vsel %vm1983_vm2, %v1982_v12, %v5299_v21  ;;  %v5293_v41 = vunpack.i.l.bf16 %v5292_v13  ;;  %v1979_v40 = vsel %vm1950_vm9, %v1946_v5, %v5283_v14  ;;  %v2014_v8 = vsel %vm1983_vm2, %v1981_v62, %v5298_v6 }
 0x1a6   : > { %v2013_v43 = vsel %vm1983_vm2, %v1980_v61, %v5294_v37  ;;  %v2031_v35 = vpack.c.bf16 %v2015_v22, %v2014_v8 }
 0x1a7   : > { %v2012_v23 = vsel %vm1983_vm2, %v1979_v40, %v5293_v41 }
 0x1a8   : > { %v2030_v47 = vpack.c.bf16 %v2013_v43, %v2012_v23  ;;  %v4601_v48 = vpop.f32.mrf.mxu0 }
 0x1a9   : > { %v2171_v49 = vadd.f32 %v4601_v48, %v6458_v42 }
 0x1aa   : > { %4623 = vmatprep.mubr.msk.bf16.mxu0 %vm2059_vm10, %v2030_v47  ;;  %v2162_v24 = vpop.f32.mrf.mxu0 }
 0x1ab   : > { %4624 = vmatmul.mubr.msk.bf16.gmra.mxu0 %vm2059_vm10, %v2031_v35  ;;  %v2163_v51 = vadd.f32 %v6458_v42, %v2162_v24  ;;  %v2279_v25 = vmax.f32 %v2171_v49, 0.0 }
 0x1ac   : > { %v4602_v53 = vpop.f32.mrf.mxu0  ;;  %v3423_v32 = vld [vmem:[#allocation3 + $0x11] sm:$0xff] }
 0x1ad   : > { %v2277_v31 = vmax.f32 %v2163_v51, 0.0  ;;  %v2174_v57 = vadd.f32 %v4602_v53, %v6458_v42  ;;  %v5300_v58 = vpack.i.bf16 %v3423_v32, %v3422_v50  ;;  %v6526_v39 = vld [vmem:[#allocation3 + $0x12] sm:$0xff] }
 0x1ae   : > { %v2165_v46 = vpop.f32.mrf.mxu0  ;;  %v5305_v2 = vpack.i.bf16 %v6526_v39, %v3430_v56 }
 0x1af   : > { %v2307_v59 = vadd.f32 %v2279_v25, %v2277_v31  ;;  %v2166_v60 = vadd.f32 %v6458_v42, %v2165_v46  ;;  %5301 = vrot.lane.b32.xlu1 %v5300_v58, %s5465_s25  ;;  %v2280_v4 = vmax.f32 %v2174_v57, 0.0 }
 0x1b1   : > { %v2371_v34 = vcombine.high %v2307_v59, %v2307_v59  ;;  %v2378_v3 = vrot.slane %v2307_v59, %v6462_v0  ;;  %v2278_v15 = vmax.f32 %v2166_v60, 0.0 }
 0x1b3   : > { %v2385_v1 = vrot.slane %v2371_v34, %v6462_v0  ;;  %v2386_v27 = vcombine.high %v2378_v3, %v2378_v3  ;;  %v4426_v7 = vrot.slane %v2378_v3, 9  ;;  %v2308_v10 = vadd.f32 %v2280_v4, %v2278_v15  ;;  %5306 = vrot.lane.b32.xlu1 %v5305_v2, %s5467_s28  ;;  %v6556_v2 = vld [vmem:[#allocation3 + $0x10] sm:$0xff] }
 0x1b5   : > { %v2387_v16 = vcombine.high %v2385_v1, %v2385_v1  ;;  %v4427_v54 = vrot.slane %v2386_v27, 9  ;;  %v4428_v9 = vrot.slane %v2385_v1, 9  ;;  %v2873_v18 = vadd.f32 %v4426_v7, %v2378_v3 }
 0x1b6   : > { %v2388_v19 = vcombine.high %v2308_v10, %v2308_v10  ;;  %v2395_v45 = vrot.slane %v2308_v10, %v6462_v0 }
 0x1b7   : > { %v4429_v44 = vrot.slane %v2387_v16, 9  ;;  %v2874_v52 = vadd.f32 %v4427_v54, %v2386_v27  ;;  %v2875_v20 = vadd.f32 %v4428_v9, %v2385_v1  ;;  %v2937_v55 = vmul.f32 0.25, %v2873_v18 }
 0x1b8   : > { %v2402_v17 = vrot.slane %v2388_v19, %v6462_v0  ;;  %v2403_v26 = vcombine.high %v2395_v45, %v2395_v45  ;;  %v4430_v38 = vrot.slane %v2395_v45, 9  ;;  %v5424_v19 = vld [vmem:[%s6993_s3 + $0x38] sm:$0xff]  }
 0x1b9   : > { %v2876_v13 = vadd.f32 %v4429_v44, %v2387_v16  ;;  %v2938_v29 = vmul.f32 0.25, %v2874_v52  ;;  %v2939_v28 = vmul.f32 0.25, %v2875_v20  ;;  %v3113_v21 = vrot.slane %v2937_v55, %v6464_v36 }
 0x1ba   : > { %v2404_v5 = vcombine.high %v2402_v17, %v2402_v17  ;;  %v4431_v30 = vrot.slane %v2403_v26, 9  ;;  %v4432_v63 = vrot.slane %v2402_v17, 9  ;;  %v2877_v33 = vadd.f32 %v4430_v38, %v2395_v45 }
 0x1bb   : > { %v2940_v14 = vmul.f32 0.25, %v2876_v13  ;;  %v3117_v11 = vrot.slane %v2938_v29, %v6464_v36  ;;  %v3121_v12 = vrot.slane %v2939_v28, %v6464_v36  ;;  %v5425_v13 = vld [vmem:[%s6993_s3 + $0x70] sm:$0xff]  }
 0x1bc   : > { %v4433_v6 = vrot.slane %v2404_v5, 9  ;;  %v2878_v37 = vadd.f32 %v4431_v30, %v2403_v26  ;;  %v2879_v62 = vadd.f32 %v4432_v63, %v2402_v17  ;;  %v2941_v61 = vmul.f32 0.25, %v2877_v33 }
 0x1bd   : > { %v3125_v22 = vrot.slane %v2940_v14, %v6464_v36  ;;  %v3348_v41 = vsel %vm3334_vm12, %v3117_v11, %v3113_v21 }
 0x1be   : > { %v3349_v40 = vsel %vm3336_vm13, %v3121_v12, %v3348_v41  ;;  %v2880_v8 = vadd.f32 %v4433_v6, %v2404_v5  ;;  %v2942_v43 = vmul.f32 0.25, %v2878_v37  ;;  %v2943_v35 = vmul.f32 0.25, %v2879_v62  ;;  %v5426_v5 = vld [vmem:[%s6993_s3 + $0x30] sm:$0xff]  }
 0x1bf   : > { %v3129_v23 = vrot.slane %v2941_v61, %v6464_v36  ;;  %v3350_v47 = vsel %vm3338_vm14, %v3125_v22, %v3349_v40  ;;  %v5427_v61 = vld [vmem:[%s6993_s3 + $0x68] sm:$0xff]  }
 0x1c0   : > { %v2944_v48 = vmul.f32 0.25, %v2880_v8  ;;  %v3133_v49 = vrot.slane %v2942_v43, %v6464_v36  ;;  %v3137_v24 = vrot.slane %v2943_v35, %v6464_v36  ;;  %v5428_v43 = vld [vmem:[%s6993_s3 + $0x28] sm:$0xff]  }
 0x1c1   : > { %v3351_v50 = vsel %vm3340_vm15, %v3129_v23, %v3350_v47 }
 0x1c2   : > { %v3141_v51 = vrot.slane %v2944_v48, %v6464_v36  ;;  %v3352_v53 = vsel %vm3342_vm0, %v3133_v49, %v3351_v50 }
 0x1c3   : > { %v3353_v32 = vsel %vm3344_vm1, %v3137_v24, %v3352_v53 }
 0x1c4   : > { %v3354_v25 = vsel %vm3346_vm3, %v3141_v51, %v3353_v32 }
 0x1c5   : > { %3407 = vst.msk [vmem:[#allocation3 + $0x21] sm:$0xff] %vm1983_vm2, %v3354_v25  ;;  %v5429_v25 = vld [vmem:[%s6993_s3 + $0x60] sm:$0xff]  }
 0x1c8   : > { %v4605_v31 = vpop.f32.mrf.mxu0 }
 0x1c9   : > { %v2187_v57 = vadd.f32 %v4605_v31, %v6458_v42 }
 0x1ca   : > { %v2178_v58 = vpop.f32.mrf.mxu0 }
 0x1cb   : > { %v2179_v56 = vadd.f32 %v6458_v42, %v2178_v58  ;;  %v2283_v46 = vmax.f32 %v2187_v57, 0.0 }
 0x1cc   : > { %v4606_v59 = vpop.f32.mrf.mxu0  ;;  %v6554_v60 = vld [vmem:[#allocation3 + $0x22] sm:$0xff] }
 0x1cd   : > { %v6558_v34 = vld [vmem:[#allocation3 + $0x20] sm:$0xff]  ;;  %v2281_v3 = vmax.f32 %v2179_v56, 0.0  ;;  %v2190_v4 = vadd.f32 %v4606_v59, %v6458_v42  ;;  %v5310_v15 = vpack.i.bf16 %v6554_v60, %v6526_v39  ;;  %v5423_v39 = vld [vmem:[%s6993_s3 + $0x78] sm:$0xff]  }
 0x1ce   : > { %v5315_v1 = vpack.i.bf16 %v6558_v34, %v6556_v2  ;;  %v2181_v27 = vpop.f32.mrf.mxu0  ;;  %4543 = vmatprep.subr.bf16.mxu1 %v5423_v39  ;;  %v5433_v39 = vld [vmem:[%s6993_s3 + $0x50] sm:$0xff]  }
 0x1cf   : > { %v2309_v7 = vadd.f32 %v2283_v46, %v2281_v3  ;;  %v2182_v10 = vadd.f32 %v6458_v42, %v2181_v27  ;;  %5311 = vrot.lane.b32.xlu0 %v5310_v15, %s5465_s25  ;;  %v2284_v9 = vmax.f32 %v2190_v4, 0.0  ;;  %4544 = vmatpush3.bf16.msra.mxu1 %v5424_v19  ;;  %v5430_v46 = vld [vmem:[%s6993_s3 + $0x20] sm:$0xff]   ;;  %v5434_v19 = vld [vmem:[%s6993_s3 + $0x10] sm:$0xff]  }
 0x1d0   : > { %5316 = vrot.lane.b32.xlu1 %v5315_v1, %s5468_s6  ;;  %4545 = vmatprep.subr.bf16.mxu1 %v5425_v13 }
 0x1d1   : > { %v2405_v16 = vcombine.high %v2309_v7, %v2309_v7  ;;  %v2412_v54 = vrot.slane %v2309_v7, %v6462_v0  ;;  %v2282_v18 = vmax.f32 %v2182_v10, 0.0  ;;  %v5431_v7 = vld [vmem:[%s6993_s3 + $0x58] sm:$0xff]  }
 0x1d3   : > { %v2419_v45 = vrot.slane %v2405_v16, %v6462_v0  ;;  %v2420_v44 = vcombine.high %v2412_v54, %v2412_v54  ;;  %v4434_v52 = vrot.slane %v2412_v54, 9  ;;  %v2310_v20 = vadd.f32 %v2284_v9, %v2282_v18  ;;  %4546 = vmatpush3.bf16.msra.mxu1 %v5426_v5 }
 0x1d4   : > { %4547 = vmatprep.subr.bf16.mxu1 %v5427_v61 }
 0x1d5   : > { %v2421_v55 = vcombine.high %v2419_v45, %v2419_v45  ;;  %v4435_v17 = vrot.slane %v2420_v44, 9  ;;  %v4436_v26 = vrot.slane %v2419_v45, 9  ;;  %v2881_v38 = vadd.f32 %v4434_v52, %v2412_v54  ;;  %v5432_v54 = vld [vmem:[%s6993_s3 + $0x18] sm:$0xff]   ;;  %v5436_v52 = vld [vmem:[%s6993_s3 + $0x8] sm:$0xff]  }
 0x1d6   : > { %v2422_v29 = vcombine.high %v2310_v20, %v2310_v20  ;;  %v2429_v28 = vrot.slane %v2310_v20, %v6462_v0 }
 0x1d7   : > { %v4437_v30 = vrot.slane %v2421_v55, 9  ;;  %v2882_v63 = vadd.f32 %v4435_v17, %v2420_v44  ;;  %v2883_v33 = vadd.f32 %v4436_v26, %v2419_v45  ;;  %v2945_v14 = vmul.f32 0.25, %v2881_v38  ;;  %4548 = vmatpush3.bf16.msra.mxu1 %v5428_v43  ;;  %v5435_v45 = vld [vmem:[%s6993_s3 + $0x48] sm:$0xff]  }
 0x1d8   : > { %v2436_v21 = vrot.slane %v2422_v29, %v6462_v0  ;;  %v2437_v11 = vcombine.high %v2429_v28, %v2429_v28  ;;  %v4438_v12 = vrot.slane %v2429_v28, 9  ;;  %4549 = vmatprep.subr.bf16.mxu1 %v5429_v25  ;;  %v6634_v29 = vld [vmem:[#allocation3 + $0x21] sm:$0xff] }
 0x1d9   : > { %v2884_v6 = vadd.f32 %v4437_v30, %v2421_v55  ;;  %v2946_v37 = vmul.f32 0.25, %v2882_v63  ;;  %v2947_v62 = vmul.f32 0.25, %v2883_v33  ;;  %v3145_v23 = vrot.slane %v2945_v14, %v6464_v36 }
 0x1da   : > { %v2438_v22 = vcombine.high %v2436_v21, %v2436_v21  ;;  %v4439_v41 = vrot.slane %v2437_v11, 9  ;;  %v4440_v40 = vrot.slane %v2436_v21, 9  ;;  %v2885_v8 = vadd.f32 %v4438_v12, %v2429_v28  ;;  %v5438_v12 = vld [vmem:[%s6993_s3] sm:$0xff]  }
 0x1db   : > { %v2948_v35 = vmul.f32 0.25, %v2884_v6  ;;  %v3149_v47 = vrot.slane %v2946_v37, %v6464_v36  ;;  %v3153_v48 = vrot.slane %v2947_v62, %v6464_v36  ;;  %4550 = vmatpush3.bf16.msra.mxu1 %v5430_v46 }
 0x1dc   : > { %v4441_v49 = vrot.slane %v2438_v22, 9  ;;  %v2886_v24 = vadd.f32 %v4439_v41, %v2437_v11  ;;  %v2887_v50 = vadd.f32 %v4440_v40, %v2436_v21  ;;  %v2949_v51 = vmul.f32 0.25, %v2885_v8  ;;  %4551 = vmatprep.subr.bf16.mxu1 %v5431_v7  ;;  %v5437_v21 = vld [vmem:[%s6993_s3 + $0x40] sm:$0xff]  }
 0x1dd   : > { %v3157_v53 = vrot.slane %v2948_v35, %v6464_v36  ;;  %v3355_v32 = vsel %vm3334_vm12, %v3149_v47, %v3145_v23 }
 0x1de   : > { %v3356_v31 = vsel %vm3336_vm13, %v3153_v48, %v3355_v32  ;;  %v2888_v57 = vadd.f32 %v4441_v49, %v2438_v22  ;;  %v2950_v58 = vmul.f32 0.25, %v2886_v24  ;;  %v2951_v56 = vmul.f32 0.25, %v2887_v50 }
 0x1df   : > { %v3161_v59 = vrot.slane %v2949_v51, %v6464_v36  ;;  %v3357_v3 = vsel %vm3338_vm14, %v3157_v53, %v3356_v31  ;;  %4552 = vmatpush3.bf16.msra.mxu1 %v5432_v54 }
 0x1e0   : > { %v2952_v4 = vmul.f32 0.25, %v2888_v57  ;;  %v3165_v15 = vrot.slane %v2950_v58, %v6464_v36  ;;  %v3169_v1 = vrot.slane %v2951_v56, %v6464_v36  ;;  %4553 = vmatprep.subr.bf16.mxu1 %v5433_v39 }
 0x1e1   : > { %v3358_v27 = vsel %vm3340_vm15, %v3161_v59, %v3357_v3 }
 0x1e2   : > { %v3173_v10 = vrot.slane %v2952_v4, %v6464_v36  ;;  %v3359_v16 = vsel %vm3342_vm0, %v3165_v15, %v3358_v27 }
 0x1e3   : > { %v3360_v9 = vsel %vm3344_vm1, %v3169_v1, %v3359_v16  ;;  %4554 = vmatpush3.bf16.msra.mxu1 %v5434_v19 }
 0x1e4   : > { %v3361_v18 = vsel %vm3346_vm3, %v3173_v10, %v3360_v9  ;;  %4555 = vmatprep.subr.bf16.mxu1 %v5435_v45 }
 0x1e5   : > { %3408 = vst.msk [vmem:[#allocation3 + $0x31] sm:$0xff] %vm1983_vm2, %v3361_v18 }
 0x1e7   : > { %4556 = vmatpush3.bf16.msra.mxu1 %v5436_v52 }
 0x1e8   : > { %v4609_v44 = vpop.f32.mrf.mxu0  ;;  %4557 = vmatprep.subr.bf16.mxu1 %v5437_v21 }
 0x1e9   : > { %v2203_v20 = vadd.f32 %v4609_v44, %v6458_v42 }
 0x1ea   : > { %v2194_v55 = vpop.f32.mrf.mxu0 }
 0x1eb   : > { %v2195_v17 = vadd.f32 %v6458_v42, %v2194_v55  ;;  %v2287_v26 = vmax.f32 %v2203_v20, 0.0  ;;  %4558 = vmatpush3.bf16.msra.mxu1 %v5438_v12 }
 0x1ec   : > { %v4610_v38 = vpop.f32.mrf.mxu0  ;;  %v6632_v13 = vld [vmem:[#allocation3 + $0x30] sm:$0xff] }
 0x1ed   : > { %v6636_v28 = vld [vmem:[#allocation3 + $0x31] sm:$0xff]  ;;  %v2285_v5 = vmax.f32 %v2195_v17, 0.0  ;;  %v2206_v30 = vadd.f32 %v4610_v38, %v6458_v42  ;;  %v5320_v63 = vpack.i.bf16 %v6632_v13, %v6558_v34 }
 0x1ee   : > { %v5330_v33 = vpack.i.bf16 %v6636_v28, %v6634_v29  ;;  %v6643_v14 = vld [vmem:[#allocation3 + $0x32] sm:$0xff]  ;;  %v2197_v11 = vpop.f32.mrf.mxu0 }
 0x1ef   : > { %v2311_v6 = vadd.f32 %v2287_v26, %v2285_v5  ;;  %v2198_v37 = vadd.f32 %v6458_v42, %v2197_v11  ;;  %5321 = vrot.lane.b32.xlu0 %v5320_v63, %s5467_s28  ;;  %v5335_v34 = vpack.i.bf16 %v6643_v14, %v6554_v60  ;;  %v2288_v22 = vmax.f32 %v2206_v30, 0.0 }
 0x1f0   : > { %5331 = vrot.lane.b32.xlu1 %v5330_v33, %s5465_s25 }
 0x1f1   : > { %v2439_v62 = vcombine.high %v2311_v6, %v2311_v6  ;;  %v2446_v61 = vrot.slane %v2311_v6, %v6462_v0  ;;  %v2286_v41 = vmax.f32 %v2198_v37, 0.0 }
 0x1f3   : > { %v2453_v40 = vrot.slane %v2439_v62, %v6462_v0  ;;  %v2454_v8 = vcombine.high %v2446_v61, %v2446_v61  ;;  %v4442_v43 = vrot.slane %v2446_v61, 9  ;;  %v2312_v35 = vadd.f32 %v2288_v22, %v2286_v41  ;;  %5326 = vrot.lane.b32.xlu0 %v5330_v33, %s5468_s6 }
 0x1f4   : > { %5336 = vrot.lane.b32.xlu1 %v5335_v34, %s5467_s28 }
 0x1f5   : > { %v2455_v23 = vcombine.high %v2453_v40, %v2453_v40  ;;  %v4443_v47 = vrot.slane %v2454_v8, 9  ;;  %v4444_v48 = vrot.slane %v2453_v40, 9  ;;  %v2889_v60 = vadd.f32 %v4442_v43, %v2446_v61 }
 0x1f6   : > { %v2456_v49 = vcombine.high %v2312_v35, %v2312_v35  ;;  %v2463_v24 = vrot.slane %v2312_v35, %v6462_v0 }
 0x1f7   : > { %v4445_v50 = vrot.slane %v2455_v23, 9  ;;  %v2890_v51 = vadd.f32 %v4443_v47, %v2454_v8  ;;  %v2891_v53 = vadd.f32 %v4444_v48, %v2453_v40  ;;  %v2953_v32 = vmul.f32 0.25, %v2889_v60 }
 0x1f8   : > { %v2470_v25 = vrot.slane %v2456_v49, %v6462_v0  ;;  %v2471_v31 = vcombine.high %v2463_v24, %v2463_v24  ;;  %v4446_v57 = vrot.slane %v2463_v24, 9 }
 0x1f9   : > { %v2892_v58 = vadd.f32 %v4445_v50, %v2455_v23  ;;  %v2954_v56 = vmul.f32 0.25, %v2890_v51  ;;  %v2955_v46 = vmul.f32 0.25, %v2891_v53  ;;  %v3177_v27 = vrot.slane %v2953_v32, %v6464_v36 }
 0x1fa   : > { %v2472_v59 = vcombine.high %v2470_v25, %v2470_v25  ;;  %v4447_v3 = vrot.slane %v2471_v31, 9  ;;  %v4448_v4 = vrot.slane %v2470_v25, 9  ;;  %v2893_v15 = vadd.f32 %v4446_v57, %v2463_v24 }
 0x1fb   : > { %v2956_v1 = vmul.f32 0.25, %v2892_v58  ;;  %v3181_v7 = vrot.slane %v2954_v56, %v6464_v36  ;;  %v3185_v10 = vrot.slane %v2955_v46, %v6464_v36 }
 0x1fc   : > { %v4449_v16 = vrot.slane %v2472_v59, 9  ;;  %v2894_v54 = vadd.f32 %v4447_v3, %v2471_v31  ;;  %v2895_v9 = vadd.f32 %v4448_v4, %v2470_v25  ;;  %v2957_v18 = vmul.f32 0.25, %v2893_v15 }
 0x1fd   : > { %v3189_v39 = vrot.slane %v2956_v1, %v6464_v36  ;;  %v3362_v19 = vsel %vm3334_vm12, %v3181_v7, %v3177_v27 }
 0x1fe   : > { %v3363_v45 = vsel %vm3336_vm13, %v3185_v10, %v3362_v19  ;;  %v2896_v44 = vadd.f32 %v4449_v16, %v2472_v59  ;;  %v2958_v52 = vmul.f32 0.25, %v2894_v54  ;;  %v2959_v20 = vmul.f32 0.25, %v2895_v9 }
 0x1ff   : > { %v3193_v55 = vrot.slane %v2957_v18, %v6464_v36  ;;  %v3364_v17 = vsel %vm3338_vm14, %v3189_v39, %v3363_v45 }
 0x200   : > { %v2960_v26 = vmul.f32 0.25, %v2896_v44  ;;  %v3197_v38 = vrot.slane %v2958_v52, %v6464_v36  ;;  %v3201_v5 = vrot.slane %v2959_v20, %v6464_v36 }
 0x201   : > { %v3365_v30 = vsel %vm3340_vm15, %v3193_v55, %v3364_v17 }
 0x202   : > { %v3205_v63 = vrot.slane %v2960_v26, %v6464_v36  ;;  %v3366_v33 = vsel %vm3342_vm0, %v3197_v38, %v3365_v30 }
 0x203   : > { %v3367_v21 = vsel %vm3344_vm1, %v3201_v5, %v3366_v33 }
 0x204   : > { %v3368_v11 = vsel %vm3346_vm3, %v3205_v63, %v3367_v21 }
 0x205   : > { %3409 = vst.msk [vmem:[#allocation3 + $0x41] sm:$0xff] %vm1983_vm2, %v3368_v11 }
 0x208   : > { %v4613_v12 = vpop.f32.mrf.mxu0 }
 0x209   : > { %v2219_v6 = vadd.f32 %v4613_v12, %v6458_v42 }
 0x20a   : > { %v2210_v37 = vpop.f32.mrf.mxu0 }
 0x20b   : > { %v2211_v34 = vadd.f32 %v6458_v42, %v2210_v37  ;;  %v2291_v62 = vmax.f32 %v2219_v6, 0.0 }
 0x20c   : > { %v4614_v61 = vpop.f32.mrf.mxu0  ;;  %v6680_v22 = vld [vmem:[#allocation3 + $0x42] sm:$0xff] }
 0x20d   : > { %v6682_v41 = vld [vmem:[#allocation3 + $0x40] sm:$0xff]  ;;  %v2289_v40 = vmax.f32 %v2211_v34, 0.0  ;;  %v2222_v8 = vadd.f32 %v4614_v61, %v6458_v42  ;;  %v5340_v43 = vpack.i.bf16 %v6680_v22, %v6643_v14 }
 0x20e   : > { %v5345_v35 = vpack.i.bf16 %v6682_v41, %v6632_v13  ;;  %v2213_v23 = vpop.f32.mrf.mxu0 }
 0x20f   : > { %v2313_v47 = vadd.f32 %v2291_v62, %v2289_v40  ;;  %v2214_v48 = vadd.f32 %v6458_v42, %v2213_v23  ;;  %5341 = vrot.lane.b32.xlu0 %v5340_v43, %s5465_s25  ;;  %v2292_v24 = vmax.f32 %v2222_v8, 0.0 }
 0x210   : > { %5346 = vrot.lane.b32.xlu1 %v5345_v35, %s5468_s6 }
 0x211   : > { %v2473_v60 = vcombine.high %v2313_v47, %v2313_v47  ;;  %v2480_v49 = vrot.slane %v2313_v47, %v6462_v0  ;;  %v2290_v50 = vmax.f32 %v2214_v48, 0.0 }
 0x213   : > { %v2487_v51 = vrot.slane %v2473_v60, %v6462_v0  ;;  %v2488_v53 = vcombine.high %v2480_v49, %v2480_v49  ;;  %v4450_v14 = vrot.slane %v2480_v49, 9  ;;  %v2314_v32 = vadd.f32 %v2292_v24, %v2290_v50 }
 0x215   : > { %v2489_v25 = vcombine.high %v2487_v51, %v2487_v51  ;;  %v4451_v31 = vrot.slane %v2488_v53, 9  ;;  %v4452_v57 = vrot.slane %v2487_v51, 9  ;;  %v2897_v58 = vadd.f32 %v4450_v14, %v2480_v49  ;;  %v6714_v49 = vld [vmem:[#allocation3 + $0x41] sm:$0xff] }
 0x216   : > { %v2490_v56 = vcombine.high %v2314_v32, %v2314_v32  ;;  %v2497_v46 = vrot.slane %v2314_v32, %v6462_v0 }
 0x217   : > { %v4453_v59 = vrot.slane %v2489_v25, 9  ;;  %v2898_v3 = vadd.f32 %v4451_v31, %v2488_v53  ;;  %v2899_v4 = vadd.f32 %v4452_v57, %v2487_v51  ;;  %v2961_v15 = vmul.f32 0.25, %v2897_v58 }
 0x218   : > { %v2504_v1 = vrot.slane %v2490_v56, %v6462_v0  ;;  %v2505_v27 = vcombine.high %v2497_v46, %v2497_v46  ;;  %v4454_v7 = vrot.slane %v2497_v46, 9 }
 0x219   : > { %v2900_v10 = vadd.f32 %v4453_v59, %v2489_v25  ;;  %v2962_v16 = vmul.f32 0.25, %v2898_v3  ;;  %v2963_v54 = vmul.f32 0.25, %v2899_v4  ;;  %v3209_v44 = vrot.slane %v2961_v15, %v6464_v36 }
 0x21a   : > { %v2506_v9 = vcombine.high %v2504_v1, %v2504_v1  ;;  %v4455_v18 = vrot.slane %v2505_v27, 9  ;;  %v4456_v39 = vrot.slane %v2504_v1, 9  ;;  %v2901_v19 = vadd.f32 %v4454_v7, %v2497_v46 }
 0x21b   : > { %v2964_v45 = vmul.f32 0.25, %v2900_v10  ;;  %v3213_v52 = vrot.slane %v2962_v16, %v6464_v36  ;;  %v3217_v20 = vrot.slane %v2963_v54, %v6464_v36 }
 0x21c   : > { %v4457_v55 = vrot.slane %v2506_v9, 9  ;;  %v2902_v17 = vadd.f32 %v4455_v18, %v2505_v27  ;;  %v2903_v26 = vadd.f32 %v4456_v39, %v2504_v1  ;;  %v2965_v38 = vmul.f32 0.25, %v2901_v19 }
 0x21d   : > { %v3221_v5 = vrot.slane %v2964_v45, %v6464_v36  ;;  %v3369_v30 = vsel %vm3334_vm12, %v3213_v52, %v3209_v44 }
 0x21e   : > { %v3370_v63 = vsel %vm3336_vm13, %v3217_v20, %v3369_v30  ;;  %v2904_v33 = vadd.f32 %v4457_v55, %v2506_v9  ;;  %v2966_v21 = vmul.f32 0.25, %v2902_v17  ;;  %v2967_v11 = vmul.f32 0.25, %v2903_v26 }
 0x21f   : > { %v3225_v12 = vrot.slane %v2965_v38, %v6464_v36  ;;  %v3371_v6 = vsel %vm3338_vm14, %v3221_v5, %v3370_v63 }
 0x220   : > { %v2968_v37 = vmul.f32 0.25, %v2904_v33  ;;  %v3229_v34 = vrot.slane %v2966_v21, %v6464_v36  ;;  %v3233_v62 = vrot.slane %v2967_v11, %v6464_v36 }
 0x221   : > { %v3372_v61 = vsel %vm3340_vm15, %v3225_v12, %v3371_v6 }
 0x222   : > { %v3237_v40 = vrot.slane %v2968_v37, %v6464_v36  ;;  %v3373_v8 = vsel %vm3342_vm0, %v3229_v34, %v3372_v61 }
 0x223   : > { %v3374_v43 = vsel %vm3344_vm1, %v3233_v62, %v3373_v8 }
 0x224   : > { %v3375_v35 = vsel %vm3346_vm3, %v3237_v40, %v3374_v43 }
 0x225   : > { %3410 = vst.msk [vmem:[#allocation3 + $0x51] sm:$0xff] %vm1983_vm2, %v3375_v35 }
 0x228   : > { %v4617_v23 = vpop.f32.mrf.mxu0 }
 0x229   : > { %v2235_v47 = vadd.f32 %v4617_v23, %v6458_v42 }
 0x22a   : > { %v2226_v48 = vpop.f32.mrf.mxu0 }
 0x22b   : > { %v2227_v60 = vadd.f32 %v6458_v42, %v2226_v48  ;;  %v2295_v24 = vmax.f32 %v2235_v47, 0.0 }
 0x22c   : > { %v4618_v50 = vpop.f32.mrf.mxu0  ;;  %v6716_v51 = vld [vmem:[#allocation3 + $0x50] sm:$0xff] }
 0x22d   : > { %v6718_v53 = vld [vmem:[#allocation3 + $0x51] sm:$0xff]  ;;  %v2293_v32 = vmax.f32 %v2227_v60, 0.0  ;;  %v2238_v25 = vadd.f32 %v4618_v50, %v6458_v42  ;;  %v5350_v31 = vpack.i.bf16 %v6716_v51, %v6682_v41 }
 0x22e   : > { %v6720_v14 = vld [vmem:[#allocation3 + $0x52] sm:$0xff]  ;;  %v5360_v57 = vpack.i.bf16 %v6718_v53, %v6714_v49  ;;  %v2229_v58 = vpop.f32.mrf.mxu0 }
 0x22f   : > { %v3734_v56 = vpack.c.bf16 %v6720_v14, %v6680_v22  ;;  %v2315_v46 = vadd.f32 %v2295_v24, %v2293_v32  ;;  %v2230_v59 = vadd.f32 %v6458_v42, %v2229_v58  ;;  %5351 = vrot.lane.b32.xlu0 %v5350_v31, %s5467_s28  ;;  %v5365_v3 = vpack.i.bf16 %v6720_v14, %v6680_v22 }
 0x230   : > { %5361 = vrot.lane.b32.xlu1 %v5360_v57, %s5465_s25  ;;  %v2296_v1 = vmax.f32 %v2238_v25, 0.0 }
 0x231   : > { %v2507_v4 = vcombine.high %v2315_v46, %v2315_v46  ;;  %v2514_v15 = vrot.slane %v2315_v46, %v6462_v0  ;;  %v2294_v27 = vmax.f32 %v2230_v59, 0.0 }
 0x233   : > { %v2521_v7 = vrot.slane %v2507_v4, %v6462_v0  ;;  %v2522_v10 = vcombine.high %v2514_v15, %v2514_v15  ;;  %v4458_v16 = vrot.slane %v2514_v15, 9  ;;  %v2316_v54 = vadd.f32 %v2296_v1, %v2294_v27  ;;  %5356 = vrot.lane.b32.xlu0 %v5360_v57, %s5468_s6  ;;  %v6759_v1 = vld [vmem:[%s6992_s2] ss:$0 sm:$0xff] }
 0x234   : > { %5366 = vrot.lane.b32.xlu1 %v5365_v3, %s5467_s28 }
 0x235   : > { %v2523_v42 = vcombine.high %v2521_v7, %v2521_v7  ;;  %v4459_v9 = vrot.slane %v2522_v10, 9  ;;  %v4460_v18 = vrot.slane %v2521_v7, 9  ;;  %v2905_v39 = vadd.f32 %v4458_v16, %v2514_v15 }
 0x236   : > { %v2524_v19 = vcombine.high %v2316_v54, %v2316_v54  ;;  %v2531_v45 = vrot.slane %v2316_v54, %v6462_v0 }
 0x237   : > { %v4461_v44 = vrot.slane %v2523_v42, 9  ;;  %v2906_v52 = vadd.f32 %v4459_v9, %v2522_v10  ;;  %v2907_v20 = vadd.f32 %v4460_v18, %v2521_v7  ;;  %v2969_v55 = vmul.f32 0.25, %v2905_v39 }
 0x238   : > { %v2538_v17 = vrot.slane %v2524_v19, %v6462_v0  ;;  %v2539_v26 = vcombine.high %v2531_v45, %v2531_v45  ;;  %v4462_v38 = vrot.slane %v2531_v45, 9 }
 0x239   : > { %v2908_v5 = vadd.f32 %v4461_v44, %v2523_v42  ;;  %v2970_v30 = vmul.f32 0.25, %v2906_v52  ;;  %v2971_v63 = vmul.f32 0.25, %v2907_v20  ;;  %v3241_v37 = vrot.slane %v2969_v55, %v6464_v36 }
 0x23a   : > { %v2540_v33 = vcombine.high %v2538_v17, %v2538_v17  ;;  %v4463_v21 = vrot.slane %v2539_v26, 9  ;;  %v4464_v11 = vrot.slane %v2538_v17, 9  ;;  %v2909_v12 = vadd.f32 %v4462_v38, %v2531_v45 }
 0x23b   : > { %v2972_v6 = vmul.f32 0.25, %v2908_v5  ;;  %v3245_v34 = vrot.slane %v2970_v30, %v6464_v36  ;;  %v3249_v62 = vrot.slane %v2971_v63, %v6464_v36 }
 0x23c   : > { %v4465_v61 = vrot.slane %v2540_v33, 9  ;;  %v2910_v40 = vadd.f32 %v4463_v21, %v2539_v26  ;;  %v2911_v8 = vadd.f32 %v4464_v11, %v2538_v17  ;;  %v2973_v43 = vmul.f32 0.25, %v2909_v12  ;;  %v6777_v21 = vpop.permute.xlu1 %5301 }
 0x23d   : > { %v3253_v35 = vrot.slane %v2972_v6, %v6464_v36  ;;  %v3376_v23 = vsel %vm3334_vm12, %v3245_v34, %v3241_v37 }
 0x23e   : > { %v3377_v47 = vsel %vm3336_vm13, %v3249_v62, %v3376_v23  ;;  %v2912_v48 = vadd.f32 %v4465_v61, %v2540_v33  ;;  %v2974_v60 = vmul.f32 0.25, %v2910_v40  ;;  %v2975_v24 = vmul.f32 0.25, %v2911_v8 }
 0x23f   : > { %v3257_v50 = vrot.slane %v2973_v43, %v6464_v36  ;;  %v3378_v32 = vsel %vm3338_vm14, %v3253_v35, %v3377_v47 }
 0x240   : > { %v2976_v25 = vmul.f32 0.25, %v2912_v48  ;;  %v3261_v31 = vrot.slane %v2974_v60, %v6464_v36  ;;  %v3265_v57 = vrot.slane %v2975_v24, %v6464_v36 }
 0x241   : > { %v3379_v58 = vsel %vm3340_vm15, %v3257_v50, %v3378_v32 }
 0x242   : > { %v3269_v46 = vrot.slane %v2976_v25, %v6464_v36  ;;  %v3380_v59 = vsel %vm3342_vm0, %v3261_v31, %v3379_v58 }
 0x243   : > { %v3381_v3 = vsel %vm3344_vm1, %v3265_v57, %v3380_v59  ;;  %v5307_v57 = vpop.permute.xlu1 %5306 }
 0x244   : > { %v3382_v4 = vsel %vm3346_vm3, %v3269_v46, %v3381_v3 }
 0x245   : > { %3411 = vst.msk [vmem:[#allocation3 + $0x61] sm:$0xff] %vm1983_vm2, %v3382_v4 }
 0x248   : > { %v4621_v15 = vpop.f32.mrf.mxu0 }
 0x249   : > { %v2251_v27 = vadd.f32 %v6759_v1, %v4621_v15 }
 0x24a   : > { %v2242_v7 = vpop.f32.mrf.mxu0 }
 0x24b   : > { %v2243_v10 = vadd.f32 %v6759_v1, %v2242_v7  ;;  %v2299_v16 = vmax.f32 %v2251_v27, 0.0 }
 0x24c   : > { %v4622_v54 = vpop.f32.mrf.mxu0  ;;  %v6763_v42 = vld [vmem:[#allocation3 + $0x62] sm:$0xff] }
 0x24d   : > { %v6765_v9 = vld [vmem:[#allocation3 + $0x60] sm:$0xff]  ;;  %v2297_v18 = vmax.f32 %v2243_v10, 0.0  ;;  %v2254_v39 = vadd.f32 %v6759_v1, %v4622_v54  ;;  %v5370_v19 = vpack.i.bf16 %v6763_v42, %v6720_v14  ;;  %v5312_v10 = vpop.permute.xlu0 %5311 }
 0x24e   : > { %v5375_v45 = vpack.i.bf16 %v6765_v9, %v6716_v51  ;;  %v2245_v44 = vpop.f32.mrf.mxu0 }
 0x24f   : > { %v2317_v52 = vadd.f32 %v2299_v16, %v2297_v18  ;;  %v2246_v20 = vadd.f32 %v6759_v1, %v2245_v44  ;;  %5371 = vrot.lane.b32.xlu0 %v5370_v19, %s5465_s25  ;;  %v2300_v26 = vmax.f32 %v2254_v39, 0.0  ;;  %v5304_v44 = vunpack.i.h.bf16 %v6777_v21 }
 0x250   : > { %5376 = vrot.lane.b32.xlu1 %v5375_v45, %s5468_s6 }
 0x251   : > { %v2541_v55 = vcombine.high %v2317_v52, %v2317_v52  ;;  %v2548_v17 = vrot.slane %v2317_v52, %v6462_v0  ;;  %v2298_v38 = vmax.f32 %v2246_v20, 0.0  ;;  %v5317_v52 = vpop.permute.xlu1 %5316 }
 0x253   : > { %v2555_v5 = vrot.slane %v2541_v55, %v6462_v0  ;;  %v2556_v30 = vcombine.high %v2548_v17, %v2548_v17  ;;  %v4466_v63 = vrot.slane %v2548_v17, 9  ;;  %v2318_v33 = vadd.f32 %v2300_v26, %v2298_v38 }
 0x255   : > { %v2557_v11 = vcombine.high %v2555_v5, %v2555_v5  ;;  %v4467_v12 = vrot.slane %v2556_v30, 9  ;;  %v4468_v6 = vrot.slane %v2555_v5, 9  ;;  %v2913_v37 = vadd.f32 %v4466_v63, %v2548_v17 }
 0x256   : > { %v2558_v34 = vcombine.high %v2318_v33, %v2318_v33  ;;  %v2565_v62 = vrot.slane %v2318_v33, %v6462_v0  ;;  %v5303_v17 = vunpack.i.l.bf16 %v6777_v21  ;;  %v5309_v63 = vunpack.i.h.bf16 %v5307_v57 }
 0x257   : > { %v4469_v61 = vrot.slane %v2557_v11, 9  ;;  %v2914_v40 = vadd.f32 %v4467_v12, %v2556_v30  ;;  %v2915_v8 = vadd.f32 %v4468_v6, %v2555_v5  ;;  %v2977_v43 = vmul.f32 0.25, %v2913_v37  ;;  %v3414_v30 = vld [vmem:[#allocation3] sm:$0xff] }
 0x258   : > { %v2572_v35 = vrot.slane %v2558_v34, %v6462_v0  ;;  %v2573_v23 = vcombine.high %v2565_v62, %v2565_v62  ;;  %v4470_v47 = vrot.slane %v2565_v62, 9  ;;  %v5308_v33 = vunpack.i.l.bf16 %v5307_v57 }
 0x259   : > { %v2916_v48 = vadd.f32 %v4469_v61, %v2557_v11  ;;  %v2978_v60 = vmul.f32 0.25, %v2914_v40  ;;  %v2979_v24 = vmul.f32 0.25, %v2915_v8  ;;  %v3273_v46 = vrot.slane %v2977_v43, %v6464_v36 }
 0x25a   : > { %v2574_v50 = vcombine.high %v2572_v35, %v2572_v35  ;;  %v4471_v32 = vrot.slane %v2573_v23, 9  ;;  %v4472_v25 = vrot.slane %v2572_v35, 9  ;;  %v2917_v31 = vadd.f32 %v4470_v47, %v2565_v62 }
 0x25b   : > { %v2980_v58 = vmul.f32 0.25, %v2916_v48  ;;  %v3277_v59 = vrot.slane %v2978_v60, %v6464_v36  ;;  %v3281_v3 = vrot.slane %v2979_v24, %v6464_v36  ;;  %v5314_v11 = vunpack.i.h.bf16 %v5312_v10 }
 0x25c   : > { %v4473_v4 = vrot.slane %v2574_v50, 9  ;;  %v2918_v15 = vadd.f32 %v4471_v32, %v2573_v23  ;;  %v2919_v27 = vadd.f32 %v4472_v25, %v2572_v35  ;;  %v2981_v7 = vmul.f32 0.25, %v2917_v31 }
 0x25d   : > { %v3285_v16 = vrot.slane %v2980_v58, %v6464_v36  ;;  %v3383_v54 = vsel %vm3334_vm12, %v3277_v59, %v3273_v46  ;;  %v5313_v37 = vunpack.i.l.bf16 %v5312_v10  ;;  %v5319_v34 = vunpack.i.h.bf16 %v5317_v52  ;;  %v6813_v10 = vld [vmem:[#allocation3 + $0x61] sm:$0xff] }
 0x25e   : > { %v3384_v18 = vsel %vm3336_vm13, %v3281_v3, %v3383_v54  ;;  %v2920_v39 = vadd.f32 %v4473_v4, %v2574_v50  ;;  %v2982_v19 = vmul.f32 0.25, %v2918_v15  ;;  %v2983_v45 = vmul.f32 0.25, %v2919_v27  ;;  %v3446_v50 = vld [vmem:[#allocation3 + $0x11] sm:$0xff] }
 0x25f   : > { %v3289_v20 = vrot.slane %v2981_v7, %v6464_v36  ;;  %v3385_v55 = vsel %vm3338_vm14, %v3285_v16, %v3384_v18  ;;  %v5318_v40 = vunpack.i.l.bf16 %v5317_v52  ;;  %v3679_v35 = vsel %vm1983_vm2, %v3414_v30, %v5303_v17 }
 0x260   : > { %v2984_v26 = vmul.f32 0.25, %v2920_v39  ;;  %v3293_v38 = vrot.slane %v2982_v19, %v6464_v36  ;;  %v3297_v5 = vrot.slane %v2983_v45, %v6464_v36  ;;  %v3680_v23 = vsel %vm1983_vm2, %v6556_v2, %v5304_v44  ;;  %v5439_v44 = vld [vmem:[%s6993_s3 + $0x88] sm:$0xff]  }
 0x261   : > { %v3386_v12 = vsel %vm3340_vm15, %v3289_v20, %v3385_v55  ;;  %v5322_v6 = vpop.permute.xlu0 %5321  ;;  %v3688_v48 = vsel %vm3687_vm4, %v3679_v35, %v5308_v33  ;;  %v3689_v60 = vsel %vm3687_vm4, %v3680_v23, %v5309_v63  ;;  %v3705_v31 = vsel %vm1983_vm2, %v3446_v50, %v5313_v37  ;;  %4627 = vmatprep.subr.bf16.mxu1 %v5439_v44 }
 0x262   : > { %v3301_v62 = vrot.slane %v2984_v26, %v6464_v36  ;;  %v3387_v61 = vsel %vm3342_vm0, %v3293_v38, %v3386_v12  ;;  %v5324_v8 = vunpack.i.h.bf16 %v5322_v6  ;;  %v5323_v43 = vunpack.i.l.bf16 %v5322_v6 }
 0x263   : > { %v3388_v21 = vsel %vm3344_vm1, %v3297_v5, %v3387_v61  ;;  %v3706_v57 = vsel %vm1983_vm2, %v6634_v29, %v5314_v11  ;;  %v3697_v46 = vsel %vm3696_vm5, %v3688_v48, %v5318_v40  ;;  %v3698_v59 = vsel %vm3696_vm5, %v3689_v60, %v5319_v34 }
 0x264   : > { %v3389_v47 = vsel %vm3346_vm3, %v3301_v62, %v3388_v21  ;;  %v3713_v2 = vsel %vm3687_vm4, %v3705_v31, %v5323_v43  ;;  %v3714_v58 = vsel %vm3687_vm4, %v3706_v57, %v5324_v8  ;;  %v3729_v27 = vpack.c.bf16 %v3698_v59, %v3697_v46 }
 0x265   : > { %3412 = vst.msk [vmem:[#allocation3 + $0x71] sm:$0xff] %vm1983_vm2, %v3389_v47  ;;  %v5327_v24 = vpop.permute.xlu0 %5326 }
 0x266   : > { %v5329_v32 = vunpack.i.h.bf16 %v5327_v24  ;;  %v5328_v25 = vunpack.i.l.bf16 %v5327_v24 }
 0x268   : > { %v3721_v3 = vsel %vm3696_vm5, %v3713_v2, %v5328_v25  ;;  %v3722_v4 = vsel %vm3696_vm5, %v3714_v58, %v5329_v32 }
 0x269   : > { %v3730_v15 = vpack.c.bf16 %v3722_v4, %v3721_v3 }
 0x26b   : > { %v4625_v7 = vpop.f32.mrf.mxu0  ;;  %3936 = vmatprep.mubr.bf16.mxu1 %v3730_v15 }
 0x26c   : > { %v2267_v29 = vadd.f32 %v6759_v1, %v4625_v7  ;;  %3937 = vmatmul.mubr.bf16.vlgmr.msra.gmra.mxu1 %v3729_v27  ;;  %v6816_v16 = vld [vmem:[#allocation3 + $0x70] sm:$0xff] }
 0x26d   : > { %v6818_v54 = vld [vmem:[#allocation3 + $0x71] sm:$0xff]  ;;  %v2258_v39 = vpop.f32.mrf.mxu0  ;;  %v5380_v19 = vpack.i.bf16 %v6816_v16, %v6765_v9  ;;  %4628 = vmatpush3.bf16.msra.mxu1 %v5439_v44 }
 0x26e   : > { %v6820_v18 = vld [vmem:[#allocation3 + $0x72] sm:$0xff]  ;;  %v5390_v45 = vpack.i.bf16 %v6818_v54, %v6813_v10  ;;  %v2259_v20 = vadd.f32 %v6759_v1, %v2258_v39  ;;  %v2303_v17 = vmax.f32 %v2267_v29, 0.0 }
 0x26f   : > { %v3737_v52 = vpack.c.bf16 %v6820_v18, %v6763_v42  ;;  %v4626_v55 = vpop.f32.mrf.mxu0  ;;  %5381 = vrot.lane.b32.xlu0 %v5380_v19, %s5467_s28  ;;  %v5395_v30 = vpack.i.bf16 %v6820_v18, %v6763_v42 }
 0x270   : > { %5391 = vrot.lane.b32.xlu1 %v5390_v45, %s5465_s25  ;;  %v2301_v26 = vmax.f32 %v2259_v20, 0.0  ;;  %v2270_v38 = vadd.f32 %v6759_v1, %v4626_v55 }
 0x271   : > { %v2261_v5 = vpop.f32.mrf.mxu0 }
 0x272   : > { %v2319_v63 = vadd.f32 %v2303_v17, %v2301_v26  ;;  %v2262_v33 = vadd.f32 %v6759_v1, %v2261_v5  ;;  %v2304_v6 = vmax.f32 %v2270_v38, 0.0 }
 0x273   : > { %5386 = vrot.lane.b32.xlu0 %v5390_v45, %s5468_s6 }
 0x274   : > { %5396 = vrot.lane.b32.xlu1 %v5395_v30, %s5467_s28  ;;  %v2575_v11 = vcombine.high %v2319_v63, %v2319_v63  ;;  %v2582_v12 = vrot.slane %v2319_v63, %v6462_v0  ;;  %v2302_v37 = vmax.f32 %v2262_v33, 0.0 }
 0x276   : > { %v2589_v34 = vrot.slane %v2575_v11, %v6462_v0  ;;  %v2590_v62 = vcombine.high %v2582_v12, %v2582_v12  ;;  %v4474_v61 = vrot.slane %v2582_v12, 9  ;;  %v2320_v40 = vadd.f32 %v2304_v6, %v2302_v37 }
 0x278   : > { %v2591_v21 = vcombine.high %v2589_v34, %v2589_v34  ;;  %v4475_v8 = vrot.slane %v2590_v62, 9  ;;  %v4476_v43 = vrot.slane %v2589_v34, 9  ;;  %v2921_v35 = vadd.f32 %v4474_v61, %v2582_v12  ;;  %v5440_v61 = vld [vmem:[%s6993_s3 + $0x80] sm:$0xff]  }
 0x279   : > { %v2592_v23 = vcombine.high %v2320_v40, %v2320_v40  ;;  %v2599_v1 = vrot.slane %v2320_v40, %v6462_v0  ;;  %4629 = vmatprep.subr.bf16.mxu1 %v5440_v61 }
 0x27a   : > { %v4477_v47 = vrot.slane %v2591_v21, 9  ;;  %v2922_v48 = vadd.f32 %v4475_v8, %v2590_v62  ;;  %v2923_v60 = vadd.f32 %v4476_v43, %v2589_v34  ;;  %v2985_v24 = vmul.f32 0.25, %v2921_v35  ;;  %4630 = vmatpush3.bf16.msra.mxu1 %v5440_v61  ;;  %v3470_v35 = vld [vmem:[#allocation3 + $0x90] sm:$0xff] }
 0x27b   : > { %v2606_v50 = vrot.slane %v2592_v23, %v6462_v0  ;;  %v2607_v32 = vcombine.high %v2599_v1, %v2599_v1  ;;  %v4478_v25 = vrot.slane %v2599_v1, 9 }
 0x27c   : > { %v2924_v31 = vadd.f32 %v4477_v47, %v2591_v21  ;;  %v2986_v57 = vmul.f32 0.25, %v2922_v48  ;;  %v2987_v2 = vmul.f32 0.25, %v2923_v60  ;;  %v3305_v15 = vrot.slane %v2985_v24, %v6464_v36  ;;  %v3478_v47 = vld [vmem:[#allocation3 + $0x91] sm:$0xff]  ;;  %v5332_v48 = vpop.permute.xlu1 %5331 }
 0x27d   : > { %v2608_v58 = vcombine.high %v2606_v50, %v2606_v50  ;;  %v4479_v46 = vrot.slane %v2607_v32, 9  ;;  %v4480_v59 = vrot.slane %v2606_v50, 9  ;;  %v2925_v3 = vadd.f32 %v4478_v25, %v2599_v1 }
 0x27e   : > { %v2988_v4 = vmul.f32 0.25, %v2924_v31  ;;  %v3309_v27 = vrot.slane %v2986_v57, %v6464_v36  ;;  %v3313_v7 = vrot.slane %v2987_v2, %v6464_v36  ;;  %v5333_v25 = vunpack.i.l.bf16 %v5332_v48 }
 0x27f   : > { %v4481_v29 = vrot.slane %v2608_v58, 9  ;;  %v2926_v39 = vadd.f32 %v4479_v46, %v2607_v32  ;;  %v2927_v19 = vadd.f32 %v4480_v59, %v2606_v50  ;;  %v2989_v45 = vmul.f32 0.25, %v2925_v3 }
 0x280   : > { %v3317_v44 = vrot.slane %v2988_v4, %v6464_v36  ;;  %v3390_v20 = vsel %vm3334_vm12, %v3309_v27, %v3305_v15  ;;  %v5337_v24 = vpop.permute.xlu1 %5336  ;;  %v5334_v32 = vunpack.i.h.bf16 %v5332_v48 }
 0x281   : > { %v3391_v55 = vsel %vm3336_vm13, %v3313_v7, %v3390_v20  ;;  %v2928_v17 = vadd.f32 %v4481_v29, %v2608_v58  ;;  %v2990_v26 = vmul.f32 0.25, %v2926_v39  ;;  %v2991_v38 = vmul.f32 0.25, %v2927_v19  ;;  %v5342_v50 = vpop.permute.xlu0 %5341  ;;  %v5448_v29 = vld [vmem:[#allocation3 + $0x20] sm:$0xff] }
 0x282   : > { %v3321_v5 = vrot.slane %v2989_v45, %v6464_v36  ;;  %v3392_v30 = vsel %vm3338_vm14, %v3317_v44, %v3391_v55  ;;  %v5339_v57 = vunpack.i.h.bf16 %v5337_v24  ;;  %v5338_v2 = vunpack.i.l.bf16 %v5337_v24 }
 0x283   : > { %v2992_v63 = vmul.f32 0.25, %v2928_v17  ;;  %v3325_v33 = vrot.slane %v2990_v26, %v6464_v36  ;;  %v3329_v11 = vrot.slane %v2991_v38, %v6464_v36  ;;  %v5344_v46 = vunpack.i.h.bf16 %v5342_v50 }
 0x284   : > { %v3393_v12 = vsel %vm3340_vm15, %v3321_v5, %v3392_v30  ;;  %v5347_v31 = vpop.permute.xlu1 %5346  ;;  %v5343_v59 = vunpack.i.l.bf16 %v5342_v50  ;;  %v3682_v7 = vsel %vm1983_vm2, %v6632_v13, %v5334_v32  ;;  %v3681_v39 = vsel %vm1983_vm2, %v5448_v29, %v5333_v25 }
 0x285   : > { %v3333_v6 = vrot.slane %v2992_v63, %v6464_v36  ;;  %v3394_v37 = vsel %vm3342_vm0, %v3325_v33, %v3393_v12  ;;  %v5349_v3 = vunpack.i.h.bf16 %v5347_v31  ;;  %v5348_v4 = vunpack.i.l.bf16 %v5347_v31 }
 0x286   : > { %v3395_v34 = vsel %vm3344_vm1, %v3329_v11, %v3394_v37  ;;  %v3690_v19 = vsel %vm3687_vm4, %v3681_v39, %v5338_v2  ;;  %v3691_v45 = vsel %vm3687_vm4, %v3682_v7, %v5339_v57  ;;  %v3708_v20 = vsel %vm1983_vm2, %v6714_v49, %v5344_v46 }
 0x287   : > { %v3396_v62 = vsel %vm3346_vm3, %v3333_v6, %v3395_v34  ;;  %v3707_v55 = vsel %vm1983_vm2, %v6636_v28, %v5343_v59  ;;  %v3699_v5 = vsel %vm3696_vm5, %v3690_v19, %v5348_v4  ;;  %v3700_v30 = vsel %vm3696_vm5, %v3691_v45, %v5349_v3 }
 0x288   : > { %3413 = vst.msk [vmem:[#allocation3 + $0x81] sm:$0xff] %vm1983_vm2, %v3396_v62  ;;  %v3732_v12 = vpack.c.bf16 %v3700_v30, %v3699_v5 }
 0x28f   : > { %v6863_v40 = vld [vmem:[#allocation3 + $0x82] sm:$0xff] }
 0x290   : > { %v3445_v21 = vld [vmem:[#allocation3 + $0x80] sm:$0xff]  ;;  %v5400_v8 = vpack.i.bf16 %v6863_v40, %v6820_v18 }
 0x291   : > { %v5415_v43 = vpack.i.bf16 %v3445_v21, %v6816_v16  ;;  %v5405_v23 = vpack.i.bf16 %v3470_v35, %v3445_v21  ;;  %v6870_v1 = vld [vmem:[#allocation3 + $0x81] sm:$0xff] }
 0x292   : > { %5401 = vrot.lane.b32.xlu0 %v5400_v8, %s5465_s25  ;;  %v5410_v60 = vpack.i.bf16 %v3478_v47, %v6870_v1 }
 0x293   : > { %5416 = vrot.lane.b32.xlu1 %v5415_v43, %s5468_s6 }
 0x296   : > { %5406 = vrot.lane.b32.xlu0 %v5405_v23, %s5467_s28 }
 0x29a   : > { %5411 = vrot.lane.b32.xlu0 %v5410_v60, %s5468_s6 }
 0x2a1   : > { %v5352_v58 = vpop.permute.xlu0 %5351 }
 0x2a2   : > { %v5354_v15 = vunpack.i.h.bf16 %v5352_v58  ;;  %v5353_v27 = vunpack.i.l.bf16 %v5352_v58  ;;  %v5362_v49 = vpop.permute.xlu1 %5361 }
 0x2a3   : > { %v5364_v37 = vunpack.i.h.bf16 %v5362_v49  ;;  %v5363_v34 = vunpack.i.l.bf16 %v5362_v49 }
 0x2a4   : > { %v3715_v38 = vsel %vm3687_vm4, %v3707_v55, %v5353_v27  ;;  %v3716_v13 = vsel %vm3687_vm4, %v3708_v20, %v5354_v15 }
 0x2a5   : > { %v5357_v44 = vpop.permute.xlu0 %5356  ;;  %v3684_v24 = vsel %vm1983_vm2, %v6716_v51, %v5364_v37  ;;  %v3683_v50 = vsel %vm1983_vm2, %v6682_v41, %v5363_v34 }
 0x2a6   : > { %v5359_v17 = vunpack.i.h.bf16 %v5357_v44  ;;  %v5358_v26 = vunpack.i.l.bf16 %v5357_v44  ;;  %v5367_v28 = vpop.permute.xlu1 %5366 }
 0x2a7   : > { %v5369_v61 = vunpack.i.h.bf16 %v5367_v28  ;;  %v5368_v21 = vunpack.i.l.bf16 %v5367_v28 }
 0x2a8   : > { %v3723_v63 = vsel %vm3696_vm5, %v3715_v38, %v5358_v26  ;;  %v3724_v33 = vsel %vm3696_vm5, %v3716_v13, %v5359_v17 }
 0x2a9   : > { %v3733_v11 = vpack.c.bf16 %v3724_v33, %v3723_v63  ;;  %v3692_v32 = vsel %vm3687_vm4, %v3683_v50, %v5368_v21  ;;  %v3693_v25 = vsel %vm3687_vm4, %v3684_v24, %v5369_v61 }
 0x2ab   : > { %3944 = vmatprep.mubr.bf16.mxu1 %v3733_v11 }
 0x2ac   : > { %3945 = vmatmul.mubr.bf16.gmra.mxu1 %v3732_v12 }
 0x2c1   : > { %v5372_v6 = vpop.permute.xlu0 %5371 }
 0x2c2   : > { %v5377_v62 = vpop.permute.xlu1 %5376  ;;  %v5374_v43 = vunpack.i.h.bf16 %v5372_v6  ;;  %v5373_v35 = vunpack.i.l.bf16 %v5372_v6 }
 0x2c3   : > { %v5379_v23 = vunpack.i.h.bf16 %v5377_v62  ;;  %v5378_v47 = vunpack.i.l.bf16 %v5377_v62 }
 0x2c4   : > { %v3710_v57 = vsel %vm1983_vm2, %v6813_v10, %v5374_v43  ;;  %v3709_v2 = vsel %vm1983_vm2, %v6718_v53, %v5373_v35  ;;  %v3480_v43 = vld [vmem:[#allocation3 + $0x32] sm:$0xff] }
 0x2c5   : > { %v3701_v3 = vsel %vm3696_vm5, %v3692_v32, %v5378_v47  ;;  %v3702_v41 = vsel %vm3696_vm5, %v3693_v25, %v5379_v23  ;;  %v3479_v23 = vld [vmem:[#allocation3 + $0x22] sm:$0xff]  ;;  %v3486_v47 = vld [vmem:[#allocation3 + $0x92] sm:$0xff] }
 0x2c6   : > { %v3735_v7 = vpack.c.bf16 %v3702_v41, %v3701_v3  ;;  %v4482_v3 = vld [vmem:[%s6994_s4] ss:$0 sm:$0xff] }
 0x2e1   : > { %v5382_v8 = vpop.permute.xlu0 %5381 }
 0x2e2   : > { %v5384_v48 = vunpack.i.h.bf16 %v5382_v8  ;;  %v5383_v60 = vunpack.i.l.bf16 %v5382_v8  ;;  %v5392_v10 = vpop.permute.xlu1 %5391 }
 0x2e3   : > { %v5394_v39 = vunpack.i.h.bf16 %v5392_v10  ;;  %v5393_v19 = vunpack.i.l.bf16 %v5392_v10 }
 0x2e4   : > { %v3717_v59 = vsel %vm3687_vm4, %v3709_v2, %v5383_v60  ;;  %v3718_v51 = vsel %vm3687_vm4, %v3710_v57, %v5384_v48  ;;  %v3740_v48 = vpack.c.bf16 %v3486_v47, %v6863_v40 }
 0x2e5   : > { %v5387_v31 = vpop.permute.xlu0 %5386  ;;  %v3686_v63 = vsel %vm1983_vm2, %v6816_v16, %v5394_v39  ;;  %v3685_v33 = vsel %vm1983_vm2, %v6765_v9, %v5393_v19 }
 0x2e6   : > { %v5389_v58 = vunpack.i.h.bf16 %v5387_v31  ;;  %v5388_v46 = vunpack.i.l.bf16 %v5387_v31  ;;  %v5397_v53 = vpop.permute.xlu1 %5396 }
 0x2e7   : > { %v5399_v44 = vunpack.i.h.bf16 %v5397_v53  ;;  %v5398_v20 = vunpack.i.l.bf16 %v5397_v53 }
 0x2e8   : > { %v3725_v4 = vsel %vm3696_vm5, %v3717_v59, %v5388_v46  ;;  %v3726_v15 = vsel %vm3696_vm5, %v3718_v51, %v5389_v58 }
 0x2e9   : > { %v3736_v27 = vpack.c.bf16 %v3726_v15, %v3725_v4  ;;  %v3694_v11 = vsel %vm3687_vm4, %v3685_v33, %v5398_v20  ;;  %v3695_v12 = vsel %vm3687_vm4, %v3686_v63, %v5399_v44 }
 0x2eb   : > { %3952 = vmatprep.mubr.bf16.mxu1 %v3736_v27 }
 0x2ec   : > { %3953 = vmatmul.mubr.bf16.gmra.mxu1 %v3735_v7 }
 0x304   : > { %v5402_v29 = vpop.permute.xlu0 %5401 }
 0x305   : > { %v5417_v45 = vpop.permute.xlu1 %5416  ;;  %v5404_v17 = vunpack.i.h.bf16 %v5402_v29  ;;  %v5403_v26 = vunpack.i.l.bf16 %v5402_v29 }
 0x306   : > { %v5419_v38 = vunpack.i.h.bf16 %v5417_v45  ;;  %v5418_v13 = vunpack.i.l.bf16 %v5417_v45 }
 0x307   : > { %v3712_v28 = vsel %vm1983_vm2, %v6870_v1, %v5404_v17  ;;  %v3711_v6 = vsel %vm1983_vm2, %v6818_v54, %v5403_v26  ;;  %v3731_v54 = vpack.c.bf16 %v3480_v43, %v3479_v23 }
 0x308   : > { %v5407_v55 = vpop.permute.xlu0 %5406  ;;  %v3703_v61 = vsel %vm3696_vm5, %v3694_v11, %v5418_v13  ;;  %v3704_v9 = vsel %vm3696_vm5, %v3695_v12, %v5419_v38 }
 0x309   : > { %v5409_v5 = vunpack.i.h.bf16 %v5407_v55  ;;  %v5408_v30 = vunpack.i.l.bf16 %v5407_v55  ;;  %v3738_v1 = vpack.c.bf16 %v3704_v9, %v3703_v61 }
 0x30b   : > { %v3719_v62 = vsel %vm3687_vm4, %v3711_v6, %v5408_v30  ;;  %v3720_v16 = vsel %vm3687_vm4, %v3712_v28, %v5409_v5 }
 0x30c   : > { %v5412_v49 = vpop.permute.xlu0 %5411 }
 0x30d   : > { %v5414_v37 = vunpack.i.h.bf16 %v5412_v49  ;;  %v5413_v34 = vunpack.i.l.bf16 %v5412_v49 }
 0x30f   : > { %v3727_v21 = vsel %vm3696_vm5, %v3719_v62, %v5413_v34  ;;  %v3728_v8 = vsel %vm3696_vm5, %v3720_v16, %v5414_v37 }
 0x310   : > { %v3739_v35 = vpack.c.bf16 %v3728_v8, %v3727_v21 }
 0x312   : > { %3960 = vmatprep.mubr.bf16.mxu1 %v3739_v35 }
 0x313   : > { %3961 = vmatmul.mubr.bf16.gmra.mxu1 %v3738_v1 }
 0x314   : > { %4631 = vmatprep.mubr.msk.bf16.mxu1 %vm1983_vm2, %v3731_v54 }
 0x31b   : > { %4632 = vmatmul.mubr.msk.bf16.vlgmr.msra.gmra.mxu1 %vm1983_vm2, %v3734_v56 }
 0x31c   : > { %4635 = vmatprep.mubr.msk.bf16.mxu1 %vm1983_vm2, %v3737_v52 }
 0x323   : > { %4636 = vmatmul.mubr.msk.bf16.gmra.mxu1 %vm1983_vm2, %v3740_v48 }
 0x32c   : > { %v4559_v60 = vpop.f32.mrf.mxu1 }
 0x32e   : > { %v4560_v24 = vpop.f32.mrf.mxu1 }
 0x32f   : > { %v4561_v59 = vadd.f32 %v4560_v24, %v4559_v60 }
 0x330   : > { %v4562_v50 = vpop.f32.mrf.mxu1 }
 0x331   : > { %v3939_v7 = vadd.f32 %v4561_v59, %v4482_v3 }
 0x332   : > { %v4563_v32 = vpop.f32.mrf.mxu1 }
 0x333   : > { %v4564_v4 = vadd.f32 %v4563_v32, %v4562_v50 }
 0x335   : > { %v3942_v45 = vadd.f32 %v4564_v4, %v4482_v3 }
 0x36c   : > { %v4565_v25 = vpop.f32.mrf.mxu1 }
 0x36e   : > { %v4566_v31 = vpop.f32.mrf.mxu1 }
 0x36f   : > { %v4567_v40 = vadd.f32 %v4566_v31, %v4565_v25 }
 0x370   : > { %v4568_v57 = vpop.f32.mrf.mxu1 }
 0x371   : > { %v3947_v27 = vadd.f32 %v4567_v40, %v4482_v3 }
 0x372   : > { %v4569_v22 = vpop.f32.mrf.mxu1 }
 0x373   : > { %v4570_v51 = vadd.f32 %v4569_v22, %v4568_v57 }
 0x375   : > { %v3950_v10 = vadd.f32 %v4570_v51, %v4482_v3 }
 0x3ac   : > { %v4571_v14 = vpop.f32.mrf.mxu1 }
 0x3ae   : > { %v4572_v56 = vpop.f32.mrf.mxu1 }
 0x3af   : > { %v4573_v62 = vadd.f32 %v4572_v56, %v4571_v14 }
 0x3b0   : > { %v4574_v2 = vpop.f32.mrf.mxu1 }
 0x3b1   : > { %v3955_v50 = vadd.f32 %v4573_v62, %v4482_v3 }
 0x3b2   : > { %v4575_v58 = vpop.f32.mrf.mxu1 }
 0x3b3   : > { %v4576_v43 = vadd.f32 %v4575_v58, %v4574_v2 }
 0x3d3   : > { %v4577_v42 = vpop.f32.mrf.mxu1 }
 0x3d5   : > { %v4578_v18 = vpop.f32.mrf.mxu1 }
 0x3d6   : > { %v4579_v38 = vadd.f32 %v4578_v18, %v4577_v42  ;;  %v3958_v42 = vadd.f32 %v4576_v43, %v4482_v3 }
 0x3d7   : > { %v4580_v52 = vpop.f32.mrf.mxu1 }
 0x3d8   : > { %v3963_v6 = vadd.f32 %v4579_v38, %v4482_v3 }
 0x3d9   : > { %v4581_v46 = vpop.f32.mrf.mxu1 }
 0x3da   : > { %v4582_v17 = vadd.f32 %v4581_v46, %v4580_v52 }
 0x3db   : > { %v4633_v41 = vpop.f32.mrf.mxu1 }
 0x3dc   : > { %v4012_v29 = vadd.f32 %v4633_v41, %v3947_v27  ;;  %v3966_v12 = vadd.f32 %v4582_v17, %v4482_v3 }
 0x3dd   : > { %v4003_v15 = vpop.f32.mrf.mxu1 }
 0x3de   : > { %v4004_v39 = vadd.f32 %v4003_v15, %v3939_v7  ;;  %v4036_v13 = vmax.f32 %v4012_v29, 0.0 }
 0x3df   : > { %v4634_v53 = vpop.f32.mrf.mxu1 }
 0x3e0   : > { %v4015_v19 = vadd.f32 %v4634_v53, %v3950_v10  ;;  %v4034_v5 = vmax.f32 %v4004_v39, 0.0 }
 0x3e1   : > { %v4006_v44 = vpop.f32.mrf.mxu1 }
 0x3e2   : > { %v4037_v20 = vmax.f32 %v4015_v19, 0.0  ;;  %v4007_v55 = vadd.f32 %v4006_v44, %v3942_v45 }
 0x3e3   : > { %v4637_v26 = vpop.f32.mrf.mxu1 }
 0x3e4   : > { %v4035_v30 = vmax.f32 %v4007_v55, 0.0  ;;  %v4043_v33 = vadd.f32 %v4037_v20, %v4036_v13  ;;  %v4028_v61 = vadd.f32 %v4637_v26, %v3963_v6 }
 0x3e5   : > { %v4019_v63 = vpop.f32.mrf.mxu1 }
 0x3e6   : > { %v4042_v11 = vadd.f32 %v4035_v30, %v4034_v5  ;;  %v4074_v16 = vrot.slane %v4043_v33, %v6462_v0  ;;  %v4067_v48 = vcombine.high %v4043_v33, %v4043_v33  ;;  %v4040_v24 = vmax.f32 %v4028_v61, 0.0 }
 0x3e7   : > { %v4638_v49 = vpop.f32.mrf.mxu1  ;;  %v4020_v58 = vadd.f32 %v4019_v63, %v3955_v50 }
 0x3e8   : > { %v4050_v28 = vcombine.high %v4042_v11, %v4042_v11  ;;  %v4057_v37 = vrot.slane %v4042_v11, %v6462_v0  ;;  %v4031_v34 = vadd.f32 %v4638_v49, %v3966_v12  ;;  %v4082_v60 = vcombine.high %v4074_v16, %v4074_v16 }
 0x3e9   : > { %v4022_v22 = vpop.f32.mrf.mxu1  ;;  %v4509_v14 = vrot.slane %v4074_v16, 9  ;;  %v4081_v46 = vrot.slane %v4067_v48, %v6462_v0  ;;  %v4038_v39 = vmax.f32 %v4020_v58, 0.0 }
 0x3ea   : > { %v4064_v9 = vrot.slane %v4050_v28, %v6462_v0  ;;  %v4065_v21 = vcombine.high %v4057_v37, %v4057_v37  ;;  %v4505_v8 = vrot.slane %v4057_v37, 9  ;;  %v4041_v35 = vmax.f32 %v4031_v34, 0.0 }
 0x3eb   : > { %v4023_v51 = vadd.f32 %v4022_v22, %v3958_v42  ;;  %v4510_v41 = vrot.slane %v4082_v60, 9  ;;  %v4186_v7 = vadd.f32 %v4509_v14, %v4074_v16  ;;  %v4083_v19 = vcombine.high %v4081_v46, %v4081_v46 }
 0x3ec   : > { %v4066_v1 = vcombine.high %v4064_v9, %v4064_v9  ;;  %v4506_v23 = vrot.slane %v4065_v21, 9  ;;  %v4507_v54 = vrot.slane %v4064_v9, 9  ;;  %v4182_v47 = vadd.f32 %v4505_v8, %v4057_v37 }
 0x3ed   : > { %v4045_v56 = vadd.f32 %v4041_v35, %v4040_v24  ;;  %v4039_v53 = vmax.f32 %v4023_v51, 0.0  ;;  %v4511_v45 = vrot.slane %v4081_v46, 9  ;;  %v4187_v17 = vadd.f32 %v4510_v41, %v4082_v60 }
 0x3ee   : > { %v4508_v32 = vrot.slane %v4066_v1, 9  ;;  %v4183_v25 = vadd.f32 %v4506_v23, %v4065_v21  ;;  %v4184_v31 = vadd.f32 %v4507_v54, %v4064_v9  ;;  %v4198_v57 = vmul.f32 0.25, %v4182_v47 }
 0x3ef   : > { %v4101_v59 = vcombine.high %v4045_v56, %v4045_v56  ;;  %v4108_v40 = vrot.slane %v4045_v56, %v6462_v0  ;;  %v4044_v55 = vadd.f32 %v4039_v53, %v4038_v39  ;;  %v4202_v26 = vmul.f32 0.25, %v4186_v7 }
 0x3f0   : > { %v4185_v18 = vadd.f32 %v4508_v32, %v4066_v1  ;;  %v4199_v52 = vmul.f32 0.25, %v4183_v25  ;;  %v4200_v2 = vmul.f32 0.25, %v4184_v31  ;;  %v4233_v15 = vrot.slane %v4198_v57, %v6464_v36 }
 0x3f1   : > { %v4115_v3 = vrot.slane %v4101_v59, %v6462_v0  ;;  %v4116_v44 = vcombine.high %v4108_v40, %v4108_v40  ;;  %v4084_v5 = vcombine.high %v4044_v55, %v4044_v55  ;;  %v4091_v30 = vrot.slane %v4044_v55, %v6462_v0 }
 0x3f2   : > { %v4201_v4 = vmul.f32 0.25, %v4185_v18  ;;  %v4237_v27 = vrot.slane %v4199_v52, %v6464_v36  ;;  %v4241_v10 = vrot.slane %v4200_v2, %v6464_v36  ;;  %v4512_v63 = vrot.slane %v4083_v19, 9 }
 0x3f3   : > { %v4117_v13 = vcombine.high %v4115_v3, %v4115_v3  ;;  %v4188_v33 = vadd.f32 %v4511_v45, %v4081_v46  ;;  %v4517_v11 = vrot.slane %v4108_v40, 9  ;;  %v4518_v12 = vrot.slane %v4116_v44, 9 }
 0x3f4   : > { %v4294_v29 = vsel %vm3334_vm12, %v4237_v27, %v4233_v15  ;;  %v4245_v20 = vrot.slane %v4201_v4, %v6464_v36  ;;  %v4098_v28 = vrot.slane %v4084_v5, %v6462_v0  ;;  %v4099_v6 = vcombine.high %v4091_v30, %v4091_v30 }
 0x3f5   : > { %v4295_v38 = vsel %vm3336_vm13, %v4241_v10, %v4294_v29  ;;  %v4513_v37 = vrot.slane %v4091_v30, 9  ;;  %v4203_v34 = vmul.f32 0.25, %v4187_v17  ;;  %v4249_v62 = vrot.slane %v4202_v26, %v6464_v36 }
 0x3f6   : > { %v4296_v49 = vsel %vm3338_vm14, %v4245_v20, %v4295_v38  ;;  %v4519_v16 = vrot.slane %v4115_v3, 9  ;;  %v4520_v61 = vrot.slane %v4117_v13, 9  ;;  %v4100_v9 = vcombine.high %v4098_v28, %v4098_v28 }
 0x3f7   : > { %v4514_v21 = vrot.slane %v4099_v6, 9  ;;  %v4515_v8 = vrot.slane %v4098_v28, 9  ;;  %v4190_v43 = vadd.f32 %v4513_v37, %v4091_v30  ;;  %v4189_v35 = vadd.f32 %v4512_v63, %v4083_v19 }
 0x3f8   : > { %v4194_v1 = vadd.f32 %v4517_v11, %v4108_v40  ;;  %v4195_v23 = vadd.f32 %v4518_v12, %v4116_v44  ;;  %v4297_v54 = vsel %vm3340_vm15, %v4249_v62, %v4296_v49  ;;  %v4516_v47 = vrot.slane %v4100_v9, 9  ;;  %v4319_v11 = vld [vmem:[%s6995_s5] sm:$0x1] }
 0x3f9   : > { %v4191_v48 = vadd.f32 %v4514_v21, %v4099_v6  ;;  %v4192_v60 = vadd.f32 %v4515_v8, %v4098_v28  ;;  %v4206_v0 = vmul.f32 0.25, %v4190_v43  ;;  %v4204_v24 = vmul.f32 0.25, %v4188_v33  ;;  %v4327_v33 = vld [vmem:[%s314_s12] sm:$0x1] }
 0x3fa   : > { %v4253_v50 = vrot.slane %v4203_v34, %v6464_v36  ;;  %v4196_v32 = vadd.f32 %v4519_v16, %v4115_v3  ;;  %v4197_v25 = vadd.f32 %v4520_v61, %v4117_v13  ;;  %v4193_v31 = vadd.f32 %v4516_v47, %v4100_v9  ;;  %v4325_v34 = vld [vmem:[#allocation4] sm:$0x1] }
 0x3fb   : > { %v4207_v57 = vmul.f32 0.25, %v4191_v48  ;;  %v4208_v22 = vmul.f32 0.25, %v4192_v60  ;;  %v4205_v14 = vmul.f32 0.25, %v4189_v35  ;;  %v4210_v56 = vmul.f32 0.25, %v4194_v1 }
 0x3fc   : > { %v4211_v42 = vmul.f32 0.25, %v4195_v23  ;;  %v4298_v18 = vsel %vm3342_vm0, %v4253_v50, %v4297_v54  ;;  %v4209_v52 = vmul.f32 0.25, %v4193_v31  ;;  %v4265_v2 = vrot.slane %v4206_v0, %v6464_v36 }
 0x3fd   : > { %v4269_v58 = vrot.slane %v4207_v57, %v6464_v36  ;;  %v4273_v46 = vrot.slane %v4208_v22, %v6464_v36  ;;  %v4257_v59 = vrot.slane %v4204_v24, %v6464_v36  ;;  %v4212_v40 = vmul.f32 0.25, %v4196_v32 }
 0x3fe   : > { %v4213_v51 = vmul.f32 0.25, %v4197_v25  ;;  %v4277_v41 = vrot.slane %v4209_v52, %v6464_v36  ;;  %v4281_v15 = vrot.slane %v4210_v56, %v6464_v36  ;;  %v4261_v10 = vrot.slane %v4205_v14, %v6464_v36 }
 0x3ff   : > { %v4301_v4 = vsel %vm3334_vm12, %v4269_v58, %v4265_v2  ;;  %v4299_v7 = vsel %vm3344_vm1, %v4257_v59, %v4298_v18  ;;  %v4285_v3 = vrot.slane %v4211_v42, %v6464_v36  ;;  %v4289_v29 = vrot.slane %v4212_v40, %v6464_v36 }
 0x400   : > { %v4302_v27 = vsel %vm3336_vm13, %v4273_v46, %v4301_v4  ;;  %v4293_v19 = vrot.slane %v4213_v51, %v6464_v36  ;;  %v4300_v45 = vsel %vm3346_vm3, %v4261_v10, %v4299_v7 }
 0x401   : > { %v4303_v53 = vsel %vm3338_vm14, %v4277_v41, %v4302_v27  ;;  %v4310_v17 = vsel %vm1983_vm2, %v4300_v45, 0.0 }
 0x402   : > { %v4304_v39 = vsel %vm3340_vm15, %v4281_v15, %v4303_v53 }
 0x403   : > { %v4305_v44 = vsel %vm3342_vm0, %v4285_v3, %v4304_v39 }
 0x404   : > { %v4306_v20 = vsel %vm3344_vm1, %v4289_v29, %v4305_v44 }
 0x405   : > { %v4307_v55 = vsel %vm3346_vm3, %v4293_v19, %v4306_v20 }
 0x406   : > { %v4311_v26 = vsel %vm1983_vm2, %v4307_v55, 0.0  ;;  %vm4333_vm2 = vcmask 0  }
 0x407   : > { %v4312_v38 = vadd.f32 %v4311_v26, %v4310_v17 }
 0x409   : > { %v4313_v13 = vrot.slane %v4312_v38, 4 }
 0x40b   : > { %v4314_v5 = vadd.f32 %v4313_v13, %v4312_v38 }
 0x40d   : > { %v4315_v30 = vrot.slane %v4314_v5, 2 }
 0x40f   : > { %v4316_v36 = vadd.f32 %v4315_v30, %v4314_v5 }
 0x411   : > { %v4317_v63 = vrot.slane %v4316_v36, 1 }
 0x413   : > { %v4318_v12 = vadd.f32 %v4317_v63, %v4316_v36 }
 0x415   : > { %v4328_v49 = vmul.f32 %v4327_v33, %v4318_v12  ;;  %v4320_v28 = vmul.f32 %v4319_v11, %v4318_v12 }
 0x417   : > { %v4329_v6 = vsel %vm4321_vm6, %v4328_v49, 0.0  ;;  %v4322_v37 = vsel %vm4321_vm6, %v4320_v28, 0.0 }
 0x418   : > { %4330 = vadd.xlane.f32.xlu1 %v4329_v6  ;;  %4323 = vadd.xlane.f32.xlu0 %v4322_v37 }
 0x4a1   : > { %v4324_v62 = vpop.xlane.xlu0 %4323  ;;  %v4331_v61 = vpop.xlane.xlu1 %4330 }
 0x4a2   : > { %v4326_v16 = vadd.f32 %v4325_v34, %v4324_v62 }
 0x4a4   : > { %v4332_v9 = vadd.f32 %v4331_v61, %v4326_v16 }
 0x4a6   : > { %4334 = vst.msk [vmem:[%s317_s17] sm:$0x1] %vm4333_vm2, %v4332_v9 }
 0x4a7 PF: > { %s20_s29 = sadd.s32 1, %s5455_s29  }
 0x4a8   : > { %p17_p4 = scmp.ge.s32.totalorder %s20_s29, 4  }
 0x4aa   :  { %19 = sbr.rel (!%p17_p4) target bundleno = 3 (0x3), region = 89 }

</bundles_post_ra>
